<compile_context>
chip_gen: v5e
topology: v5e:2x2
jax: 0.10.0
libtpu: 0.0.40
codegen_flags: <defaults>
</compile_context>

<pallas_src>
import math
import functools

import jax
import jax.numpy as jnp
from jax.experimental import pallas as pl
from jax.experimental.pallas import tpu as pltpu


def _shifted_softplus(x):
    # softplus(x) - log(2); f32 on purpose (no bf16 VPU/EUP on v5e). Keep the
    # log(1 + exp(-|x|)) form that is known to lower cleanly in Mosaic.
    return jnp.maximum(x, 0.0) + jnp.log(1.0 + jnp.exp(-jnp.abs(x))) - math.log(2.0)


def _round_up(v, m):
    return (v + m - 1) // m * m


# --------------------------------------------------------------------------------------
# Kernel 1: CFConv message passing (filter network + cutoff + gather + scatter-add).
# Grid = (P edge partitions ["parallel"], T edge tiles ["arbitrary" reduction]).
# Output: per-partition aggregation [P, N_pad, F_pad] (f32), accumulated in the
# revisited output block itself.
# --------------------------------------------------------------------------------------
def cfconv_kernel(cutoff,
                  x1_ref, ea_ref, ew_ref, src_ref, dst_ref,
                  wt_m1_ref, b_m1_ref, wt_m2_ref, b_m2_ref,
                  agg_ref):
    t = pl.program_id(1)
    n_pad = x1_ref.shape[0]
    t_e = ea_ref.shape[0]
    bf16, f32 = jnp.bfloat16, jnp.float32

    # init the (per-partition) resident output accumulator at the first edge tile
    @pl.when(t == 0)
    def _():
        agg_ref[...] = jnp.zeros_like(agg_ref)

    # ---- filter network (self.mlp) on this edge tile: [tE, G] -> [tE, F] ----
    h = jnp.dot(ea_ref[...], wt_m1_ref[...],
                preferred_element_type=f32) + b_m1_ref[...]
    h = _shifted_softplus(h)
    h = jnp.dot(h.astype(bf16), wt_m2_ref[...],
                preferred_element_type=f32) + b_m2_ref[...]

    # ---- cosine cutoff: C = 0.5 * (cos(w * pi / cutoff) + 1) ----
    C = 0.5 * (jnp.cos(ew_ref[...] * (math.pi / cutoff)) + 1.0)      # [tE, 1]
    W = h * C                                                         # [tE, F]

    # ---- gather x_j = x1[src] as a one-hot matmul on the MXU ----
    # padded edges have src = -1 -> all-zero one-hot row -> zero contribution
    iota_en = jax.lax.broadcasted_iota(jnp.int32, (t_e, n_pad), 1)
    onehot_src = (iota_en == src_ref[...]).astype(bf16)               # [tE, N]
    x_j = jnp.dot(onehot_src, x1_ref[...], preferred_element_type=f32)

    # ---- message + scatter-add to dst as a plain matmul (transpose-free) ----
    msg = (x_j * W).astype(bf16)                                      # [tE, F]
    iota_ne = jax.lax.broadcasted_iota(jnp.int32, (n_pad, t_e), 0)
    onehot_dst_t = (iota_ne == dst_ref[...]).astype(bf16)             # [N, tE]
    agg_ref[...] += jnp.dot(onehot_dst_t, msg,
                            preferred_element_type=f32)[None]         # [1, N, F]


# --------------------------------------------------------------------------------------
# Kernel 2: reduce the per-partition partials, then lin2 -> shifted softplus -> lin.
# Single-block call (whole arrays resident in VMEM).
# --------------------------------------------------------------------------------------
def output_kernel(agg_ref, wt_l2_ref, b_l2_ref, wt_lin_ref, b_lin_ref, out_ref):
    bf16, f32 = jnp.bfloat16, jnp.float32
    agg = jnp.sum(agg_ref[...], axis=0)                               # [N, F] f32
    y = jnp.dot(agg.astype(bf16), wt_l2_ref[...],
                preferred_element_type=f32) + b_l2_ref[...]
    y = _shifted_softplus(y)
    y = jnp.dot(y.astype(bf16), wt_lin_ref[...],
                preferred_element_type=f32) + b_lin_ref[...]
    out_ref[...] = y.astype(out_ref.dtype)


def interaction_block(x, edge_index, edge_weight, edge_attr, params, cutoff,
                      *, edge_tile=512, edge_partitions=2):
    N, H = x.shape
    E, G = edge_attr.shape
    F = params["w_lin1"].shape[0]

    LANE = 128
    f32, bf16 = jnp.float32, jnp.bfloat16

    H_pad = _round_up(H, LANE)
    F_pad = _round_up(F, LANE)
    N_pad = _round_up(N, 16)

    P = max(1, int(edge_partitions))                 # "parallel" partitions (v7x: 2 TCs)
    t_e = _round_up(max(1, min(edge_tile, E)), LANE) # multiple of 128 (MXU M / dst lanes)
    T = max(1, pl.cdiv(E, P * t_e))                  # reduction tiles per partition
    E_pad = P * T * t_e

    # ---- lin1 (no bias) hoisted to XLA; streamed in as a bf16 resident block ----
    x1 = x.astype(f32) @ params["w_lin1"].T.astype(f32)
    x1_p = jnp.zeros((N_pad, F_pad), f32).at[:N, :F].set(x1).astype(bf16)

    # ---- edge streams: G axis unpadded, edge_attr in bf16 ----
    ea_p = jnp.zeros((E_pad, G), f32).at[:E, :].set(edge_attr.astype(f32)).astype(bf16)
    ew_p = jnp.zeros((E_pad, 1), f32).at[:E, 0].set(edge_weight.astype(f32))
    # Padded edges get src/dst = -1: their one-hot rows/cols are all-zero so they add
    # nothing to the aggregation.  Do NOT change these fill values.
    src_p = jnp.full((E_pad, 1), -1, jnp.int32).at[:E, 0].set(edge_index[0].astype(jnp.int32))
    dst_p = jnp.full((1, E_pad), -1, jnp.int32).at[0, :E].set(edge_index[1].astype(jnp.int32))

    def pad_wt(w, rows, cols):
        # torch layout [out, in] -> pre-transposed, zero-padded, bf16 for the MXU
        wt = w.T.astype(f32)
        out = jnp.zeros((rows, cols), f32).at[:wt.shape[0], :wt.shape[1]].set(wt)
        return out.astype(bf16)

    def pad_b(b, cols):
        return jnp.zeros((1, cols), f32).at[0, :b.shape[0]].set(b.astype(f32))

    wt_m1 = pad_wt(params["w_mlp1"], G, F_pad)       # [G, F_pad], G unpadded
    b_m1 = pad_b(params["b_mlp1"], F_pad)
    wt_m2 = pad_wt(params["w_mlp2"], F_pad, F_pad)
    b_m2 = pad_b(params["b_mlp2"], F_pad)
    wt_l2 = pad_wt(params["w_lin2"], F_pad, H_pad)
    b_l2 = pad_b(params["b_lin2"], H_pad)
    wt_ln = pad_wt(params["w_lin"], H_pad, H_pad)
    b_ln = pad_b(params["b_lin"], H_pad)

    def resident(shape):
        return pl.BlockSpec(shape, lambda p, t: (0, 0))

    def edge_col(cols):
        return pl.BlockSpec((t_e, cols), lambda p, t: (p * T + t, 0))

    # ---- VMEM budget from actual double-buffered block sizes (capped for v7x 64 MiB) --
    in_block_bytes = (x1_p.size * 2 + t_e * G * 2 + t_e * 4 + t_e * 4 + t_e * 4
                      + wt_m1.size * 2 + wt_m2.size * 2
                      + b_m1.size * 4 + b_m2.size * 4)
    out_block_bytes = N_pad * F_pad * 4
    vmem_limit = int(min(56 << 20,
                         max(32 << 20, 3 * (in_block_bytes + out_block_bytes) + (4 << 20))))

    flops = 2 * E_pad * (G * F_pad            # mlp layer 1
                         + F_pad * F_pad      # mlp layer 2
                         + 2 * N_pad * F_pad) # one-hot gather + scatter
    bytes_accessed = (ea_p.size * 2 + (ew_p.size + src_p.size + dst_p.size) * 4
                      + x1_p.size * 2 + wt_m1.size * 2 + wt_m2.size * 2
                      + (b_m1.size + b_m2.size) * 4 + P * N_pad * F_pad * 4)
    cost = pl.CostEstimate(flops=int(flops),
                           transcendentals=int(E_pad * (F_pad + 1)),
                           bytes_accessed=int(bytes_accessed))

    # ---- kernel 1: message passing, per-partition partial aggregation ----
    agg = pl.pallas_call(
        functools.partial(cfconv_kernel, float(cutoff)),
        out_shape=jax.ShapeDtypeStruct((P, N_pad, F_pad), f32),
        grid_spec=pltpu.PrefetchScalarGridSpec(
            num_scalar_prefetch=0,
            grid=(P, T),
            in_specs=[
                resident((N_pad, F_pad)),                            # x1 (bf16)
                edge_col(G),                                         # edge_attr tile (bf16)
                edge_col(1),                                         # edge_weight tile
                edge_col(1),                                         # src tile (column)
                pl.BlockSpec((1, t_e), lambda p, t: (0, p * T + t)), # dst tile (row)
                resident((G, F_pad)),                                # w_mlp1^T
                resident((1, F_pad)),                                # b_mlp1
                resident((F_pad, F_pad)),                            # w_mlp2^T
                resident((1, F_pad)),                                # b_mlp2
            ],
            out_specs=pl.BlockSpec((1, N_pad, F_pad), lambda p, t: (p, 0, 0)),
        ),
        compiler_params=pltpu.CompilerParams(
            dimension_semantics=("parallel", "arbitrary"),
            vmem_limit_bytes=vmem_limit,
        ),
        cost_estimate=cost,
    )(x1_p, ea_p, ew_p, src_p, dst_p, wt_m1, b_m1, wt_m2, b_m2)

    # ---- kernel 2: reduce partitions + lin2 -> act -> lin (single block) ----
    out_p = pl.pallas_call(
        output_kernel,
        out_shape=jax.ShapeDtypeStruct((N_pad, H_pad), f32),
    )(agg, wt_l2, b_l2, wt_ln, b_ln)

    return out_p[:N, :H]


def _xavier_uniform(key, shape):
    fan_out, fan_in = shape
    bound = math.sqrt(6.0 / (fan_in + fan_out))
    return jax.random.uniform(key, shape, jnp.float32, -bound, bound)


def make_params(key, hidden_channels, num_gaussians, num_filters):
    ks = jax.random.split(key, 6)
    return {
        # self.mlp = Linear(G, F) -> ShiftedSoftplus -> Linear(F, F)
        "w_mlp1": _xavier_uniform(ks[0], (num_filters, num_gaussians)),
        "b_mlp1": jnp.zeros((num_filters,), jnp.float32),
        "w_mlp2": _xavier_uniform(ks[1], (num_filters, num_filters)),
        "b_mlp2": jnp.zeros((num_filters,), jnp.float32),
        # CFConv lin1 (no bias), lin2 (bias init 0)
        "w_lin1": _xavier_uniform(ks[2], (num_filters, hidden_channels)),
        "w_lin2": _xavier_uniform(ks[3], (hidden_channels, num_filters)),
        "b_lin2": jnp.zeros((hidden_channels,), jnp.float32),
        # final Linear(H, H), bias init 0
        "w_lin": _xavier_uniform(ks[4], (hidden_channels, hidden_channels)),
        "b_lin": jnp.zeros((hidden_channels,), jnp.float32),
    }


def reference(x, edge_index, edge_weight, edge_attr, params, cutoff):
    # plain-JAX f32 reference matching the PyTorch forward
    h = edge_attr @ params["w_mlp1"].T + params["b_mlp1"]
    h = _shifted_softplus(h)
    h = h @ params["w_mlp2"].T + params["b_mlp2"]
    C = 0.5 * (jnp.cos(edge_weight * math.pi / cutoff) + 1.0)
    W = h * C[:, None]
    x1 = x @ params["w_lin1"].T
    msg = x1[edge_index[0]] * W
    agg = jnp.zeros_like(x1).at[edge_index[1]].add(msg)
    y = agg @ params["w_lin2"].T + params["b_lin2"]
    y = _shifted_softplus(y)
    return y @ params["w_lin"].T + params["b_lin"]


if __name__ == "__main__":
    hidden_channels = 32
    num_gaussians = 16
    num_filters = 32
    cutoff = 5.0

    N = 24    # nodes
    E = 300   # edges

    key = jax.random.PRNGKey(0)
    k_x, k_ei, k_ew, k_ea, k_p = jax.random.split(key, 5)

    x = jax.random.normal(k_x, (N, hidden_channels), jnp.float32)
    edge_index = jax.random.randint(k_ei, (2, E), 0, N, jnp.int32)
    edge_weight = jax.random.uniform(k_ew, (E,), jnp.float32, 0.0, cutoff)
    edge_attr = jax.random.normal(k_ea, (E, num_gaussians), jnp.float32)

    params = make_params(k_p, hidden_channels, num_gaussians, num_filters)

    # edge_tile=128, 2 partitions -> grid (2, 2): exercises the parallel-partition path
    # and the init/accumulate reduction path.
    out = interaction_block(x, edge_index, edge_weight, edge_attr, params, cutoff,
                            edge_tile=128, edge_partitions=2)
    out = jax.block_until_ready(out)

    ref = reference(x, edge_index, edge_weight, edge_attr, params, cutoff)
    assert out.shape == (N, hidden_channels)
    # bf16 MXU operands with f32 accumulation -> bf16-level tolerance vs the f32 reference
    assert jnp.allclose(out, ref, atol=5e-2, rtol=5e-2), "mismatch vs reference"

    print("KERNEL_OK")
</pallas_src>

<mosaic_0001>
module attributes {stable_mosaic.version = 11 : i64} {
  func.func @cfconv_kernel(%arg0: i32, %arg1: i32, %arg2: memref<32x128xbf16, #tpu.memory_space<vmem>>, %arg3: memref<128x16xbf16, #tpu.memory_space<vmem>>, %arg4: memref<128x1xf32, #tpu.memory_space<vmem>>, %arg5: memref<128x1xi32, #tpu.memory_space<vmem>>, %arg6: memref<1x128xi32, #tpu.memory_space<vmem>>, %arg7: memref<16x128xbf16, #tpu.memory_space<vmem>>, %arg8: memref<1x128xf32, #tpu.memory_space<vmem>>, %arg9: memref<128x128xbf16, #tpu.memory_space<vmem>>, %arg10: memref<1x128xf32, #tpu.memory_space<vmem>>, %arg11: memref<1x32x128xf32, #tpu.memory_space<vmem>>) attributes {dimension_semantics = [#tpu.dimension_semantics<parallel>, #tpu.dimension_semantics<arbitrary>], iteration_bounds = array<i64: 2, 2>, scalar_prefetch = 0 : i64, scratch_operands = 0 : i64, tpu.core_type = #tpu.core_type<tc>, window_params = [{pipeline_mode = #tpu.pipeline_mode<synchronous>, transform_indices = @transform_0, window_bounds = array<i64: 32, 128>}, {transform_indices = @transform_1, window_bounds = array<i64: 128, 16>}, {transform_indices = @transform_2, window_bounds = array<i64: 128, 1>}, {transform_indices = @transform_3, window_bounds = array<i64: 128, 1>}, {transform_indices = @transform_4, window_bounds = array<i64: 1, 128>}, {pipeline_mode = #tpu.pipeline_mode<synchronous>, transform_indices = @transform_5, window_bounds = array<i64: 16, 128>}, {pipeline_mode = #tpu.pipeline_mode<synchronous>, transform_indices = @transform_6, window_bounds = array<i64: 1, 128>}, {pipeline_mode = #tpu.pipeline_mode<synchronous>, transform_indices = @transform_7, window_bounds = array<i64: 128, 128>}, {pipeline_mode = #tpu.pipeline_mode<synchronous>, transform_indices = @transform_8, window_bounds = array<i64: 1, 128>}, {transform_indices = @transform_9, window_bounds = array<i64: 1, 32, 128>}]} {
    %c0_i32 = arith.constant 0 : i32
    %0 = arith.cmpi eq, %arg1, %c0_i32 : i32
    %1 = arith.extui %0 : i1 to i32
    %c0_i32_0 = arith.constant 0 : i32
    %2 = arith.cmpi ne, %1, %c0_i32_0 : i32
    scf.if %2 {
      %cst_34 = arith.constant 0.000000e+00 : f32
      %60 = vector.broadcast %cst_34 : f32 to vector<1x32x128xf32>
      %c0_35 = arith.constant 0 : index
      %c0_36 = arith.constant 0 : index
      %c0_37 = arith.constant 0 : index
      %61 = vector.load %arg11[%c0_35, %c0_36, %c0_37] : memref<1x32x128xf32, #tpu.memory_space<vmem>>, vector<1x32x128xf32>
      tpu.vector_store %arg11[%c0_35, %c0_36, %c0_37], %60 {strides = array<i32>} : memref<1x32x128xf32, #tpu.memory_space<vmem>>, vector<1x32x128xf32>,
    } else {
    }
    %c0 = arith.constant 0 : index
    %c0_1 = arith.constant 0 : index
    %3 = vector.load %arg3[%c0, %c0_1] : memref<128x16xbf16, #tpu.memory_space<vmem>>, vector<128x16xbf16>
    %c0_2 = arith.constant 0 : index
    %c0_3 = arith.constant 0 : index
    %4 = vector.load %arg7[%c0_2, %c0_3] : memref<16x128xbf16, #tpu.memory_space<vmem>>, vector<16x128xbf16>
    %cst = arith.constant dense<0.000000e+00> : vector<128x128xf32>
    %5 = tpu.matmul %3, %4, %cst {dimension_numbers = #tpu.dot_dimension_numbers<[1], [0], [0], [1], [0, 0, 1, 1], [], []>} : vector<128x16xbf16>, vector<16x128xbf16>, vector<128x128xf32> -> vector<128x128xf32>
    %c0_4 = arith.constant 0 : index
    %c0_5 = arith.constant 0 : index
    %6 = vector.load %arg8[%c0_4, %c0_5] : memref<1x128xf32, #tpu.memory_space<vmem>>, vector<1x128xf32>
    %7 = vector.broadcast %6 : vector<1x128xf32> to vector<128x128xf32>
    %8 = arith.addf %5, %7 : vector<128x128xf32>
    %cst_6 = arith.constant 0.000000e+00 : f32
    %9 = vector.broadcast %cst_6 : f32 to vector<128x128xf32>
    %10 = arith.maximumf %8, %9 : vector<128x128xf32>
    %11 = math.absf %8 : vector<128x128xf32>
    %cst_7 = arith.constant 0.000000e+00 : f32
    %12 = vector.broadcast %cst_7 : f32 to vector<128x128xf32>
    %13 = arith.subf %12, %11 : vector<128x128xf32>
    %14 = math.exp %13 : vector<128x128xf32>
    %cst_8 = arith.constant 1.000000e+00 : f32
    %15 = vector.broadcast %cst_8 : f32 to vector<128x128xf32>
    %16 = arith.addf %15, %14 : vector<128x128xf32>
    %17 = math.log %16 : vector<128x128xf32>
    %18 = arith.addf %10, %17 : vector<128x128xf32>
    %cst_9 = arith.constant 0.693147182 : f32
    %19 = vector.broadcast %cst_9 : f32 to vector<128x128xf32>
    %20 = arith.subf %18, %19 : vector<128x128xf32>
    %21 = arith.truncf %20 : vector<128x128xf32> to vector<128x128xbf16>
    %c0_10 = arith.constant 0 : index
    %c0_11 = arith.constant 0 : index
    %22 = vector.load %arg9[%c0_10, %c0_11] : memref<128x128xbf16, #tpu.memory_space<vmem>>, vector<128x128xbf16>
    %cst_12 = arith.constant dense<0.000000e+00> : vector<128x128xf32>
    %23 = tpu.matmul %21, %22, %cst_12 {dimension_numbers = #tpu.dot_dimension_numbers<[1], [0], [0], [1], [0, 0, 1, 1], [], []>} : vector<128x128xbf16>, vector<128x128xbf16>, vector<128x128xf32> -> vector<128x128xf32>
    %c0_13 = arith.constant 0 : index
    %c0_14 = arith.constant 0 : index
    %24 = vector.load %arg10[%c0_13, %c0_14] : memref<1x128xf32, #tpu.memory_space<vmem>>, vector<1x128xf32>
    %25 = vector.broadcast %24 : vector<1x128xf32> to vector<128x128xf32>
    %26 = arith.addf %23, %25 : vector<128x128xf32>
    %c0_15 = arith.constant 0 : index
    %c0_16 = arith.constant 0 : index
    %27 = vector.load %arg4[%c0_15, %c0_16] : memref<128x1xf32, #tpu.memory_space<vmem>>, vector<128x1xf32>
    %cst_17 = arith.constant 0.628318548 : f32
    %28 = vector.broadcast %cst_17 : f32 to vector<128x1xf32>
    %29 = arith.mulf %27, %28 : vector<128x1xf32>
    %30 = math.cos %29 : vector<128x1xf32>
    %cst_18 = arith.constant 1.000000e+00 : f32
    %31 = vector.broadcast %cst_18 : f32 to vector<128x1xf32>
    %32 = arith.addf %30, %31 : vector<128x1xf32>
    %cst_19 = arith.constant 5.000000e-01 : f32
    %33 = vector.broadcast %cst_19 : f32 to vector<128x1xf32>
    %34 = arith.mulf %33, %32 : vector<128x1xf32>
    %35 = vector.broadcast %34 : vector<128x1xf32> to vector<128x128xf32>
    %36 = arith.mulf %26, %35 : vector<128x128xf32>
    %37 = tpu.iota {dimensions = array<i32: 1>} : vector<128x32xi32>
    %c0_20 = arith.constant 0 : index
    %c0_21 = arith.constant 0 : index
    %38 = vector.load %arg5[%c0_20, %c0_21] : memref<128x1xi32, #tpu.memory_space<vmem>>, vector<128x1xi32>
    %39 = vector.broadcast %38 : vector<128x1xi32> to vector<128x32xi32>
    %40 = arith.cmpi eq, %37, %39 : vector<128x32xi32>
    %41 = arith.extui %40 : vector<128x32xi1> to vector<128x32xi32>
    %42 = arith.sitofp %41 : vector<128x32xi32> to vector<128x32xf32>
    %43 = arith.truncf %42 : vector<128x32xf32> to vector<128x32xbf16>
    %c0_22 = arith.constant 0 : index
    %c0_23 = arith.constant 0 : index
    %44 = vector.load %arg2[%c0_22, %c0_23] : memref<32x128xbf16, #tpu.memory_space<vmem>>, vector<32x128xbf16>
    %cst_24 = arith.constant dense<0.000000e+00> : vector<128x128xf32>
    %45 = tpu.matmul %43, %44, %cst_24 {dimension_numbers = #tpu.dot_dimension_numbers<[1], [0], [0], [1], [0, 0, 1, 1], [], []>} : vector<128x32xbf16>, vector<32x128xbf16>, vector<128x128xf32> -> vector<128x128xf32>
    %46 = arith.mulf %45, %36 : vector<128x128xf32>
    %47 = arith.truncf %46 : vector<128x128xf32> to vector<128x128xbf16>
    %48 = tpu.iota {dimensions = array<i32: 0>} : vector<32x128xi32>
    %c0_25 = arith.constant 0 : index
    %c0_26 = arith.constant 0 : index
    %49 = vector.load %arg6[%c0_25, %c0_26] : memref<1x128xi32, #tpu.memory_space<vmem>>, vector<1x128xi32>
    %50 = vector.broadcast %49 : vector<1x128xi32> to vector<32x128xi32>
    %51 = arith.cmpi eq, %48, %50 : vector<32x128xi32>
    %52 = arith.extui %51 : vector<32x128xi1> to vector<32x128xi32>
    %53 = arith.sitofp %52 : vector<32x128xi32> to vector<32x128xf32>
    %54 = arith.truncf %53 : vector<32x128xf32> to vector<32x128xbf16>
    %c0_27 = arith.constant 0 : index
    %c0_28 = arith.constant 0 : index
    %c0_29 = arith.constant 0 : index
    %55 = vector.load %arg11[%c0_27, %c0_28, %c0_29] : memref<1x32x128xf32, #tpu.memory_space<vmem>>, vector<1x32x128xf32>
    %cst_30 = arith.constant dense<0.000000e+00> : vector<32x128xf32>
    %56 = tpu.matmul %54, %47, %cst_30 {dimension_numbers = #tpu.dot_dimension_numbers<[1], [0], [0], [1], [0, 0, 1, 1], [], []>} : vector<32x128xbf16>, vector<128x128xbf16>, vector<32x128xf32> -> vector<32x128xf32>
    %57 = vector.shape_cast %56 : vector<32x128xf32> to vector<1x32x128xf32>
    %58 = arith.addf %55, %57 : vector<1x32x128xf32>
    %c0_31 = arith.constant 0 : index
    %c0_32 = arith.constant 0 : index
    %c0_33 = arith.constant 0 : index
    %59 = vector.load %arg11[%c0_31, %c0_32, %c0_33] : memref<1x32x128xf32, #tpu.memory_space<vmem>>, vector<1x32x128xf32>
    tpu.vector_store %arg11[%c0_31, %c0_32, %c0_33], %58 {strides = array<i32>} : memref<1x32x128xf32, #tpu.memory_space<vmem>>, vector<1x32x128xf32>,
    return
  }
  func.func @transform_0(%arg0: i32, %arg1: i32) -> (i32, i32) {
    %c0_i32 = arith.constant 0 : i32
    %c0_i32_0 = arith.constant 0 : i32
    %c0_i32_1 = arith.constant 0 : i32
    return %c0_i32, %c0_i32_0 : i32, i32
  }
  func.func @transform_1(%arg0: i32, %arg1: i32) -> (i32, i32) {
    %c2_i32 = arith.constant 2 : i32
    %0 = arith.muli %arg0, %c2_i32 : i32
    %1 = arith.addi %0, %arg1 : i32
    %c0_i32 = arith.constant 0 : i32
    %c0_i32_0 = arith.constant 0 : i32
    return %1, %c0_i32 : i32, i32
  }
  func.func @transform_2(%arg0: i32, %arg1: i32) -> (i32, i32) {
    %c2_i32 = arith.constant 2 : i32
    %0 = arith.muli %arg0, %c2_i32 : i32
    %1 = arith.addi %0, %arg1 : i32
    %c0_i32 = arith.constant 0 : i32
    %c0_i32_0 = arith.constant 0 : i32
    return %1, %c0_i32 : i32, i32
  }
  func.func @transform_3(%arg0: i32, %arg1: i32) -> (i32, i32) {
    %c2_i32 = arith.constant 2 : i32
    %0 = arith.muli %arg0, %c2_i32 : i32
    %1 = arith.addi %0, %arg1 : i32
    %c0_i32 = arith.constant 0 : i32
    %c0_i32_0 = arith.constant 0 : i32
    return %1, %c0_i32 : i32, i32
  }
  func.func @transform_4(%arg0: i32, %arg1: i32) -> (i32, i32) {
    %c2_i32 = arith.constant 2 : i32
    %0 = arith.muli %arg0, %c2_i32 : i32
    %1 = arith.addi %0, %arg1 : i32
    %c0_i32 = arith.constant 0 : i32
    %c0_i32_0 = arith.constant 0 : i32
    return %c0_i32, %1 : i32, i32
  }
  func.func @transform_5(%arg0: i32, %arg1: i32) -> (i32, i32) {
    %c0_i32 = arith.constant 0 : i32
    %c0_i32_0 = arith.constant 0 : i32
    %c0_i32_1 = arith.constant 0 : i32
    return %c0_i32, %c0_i32_0 : i32, i32
  }
  func.func @transform_6(%arg0: i32, %arg1: i32) -> (i32, i32) {
    %c0_i32 = arith.constant 0 : i32
    %c0_i32_0 = arith.constant 0 : i32
    %c0_i32_1 = arith.constant 0 : i32
    return %c0_i32, %c0_i32_0 : i32, i32
  }
  func.func @transform_7(%arg0: i32, %arg1: i32) -> (i32, i32) {
    %c0_i32 = arith.constant 0 : i32
    %c0_i32_0 = arith.constant 0 : i32
    %c0_i32_1 = arith.constant 0 : i32
    return %c0_i32, %c0_i32_0 : i32, i32
  }
  func.func @transform_8(%arg0: i32, %arg1: i32) -> (i32, i32) {
    %c0_i32 = arith.constant 0 : i32
    %c0_i32_0 = arith.constant 0 : i32
    %c0_i32_1 = arith.constant 0 : i32
    return %c0_i32, %c0_i32_0 : i32, i32
  }
  func.func @transform_9(%arg0: i32, %arg1: i32) -> (i32, i32, i32) {
    %c0_i32 = arith.constant 0 : i32
    %c0_i32_0 = arith.constant 0 : i32
    %c0_i32_1 = arith.constant 0 : i32
    return %arg0, %c0_i32, %c0_i32_0 : i32, i32, i32
  }
}

</mosaic_0001>

<bundles_post_ra>
// kernel: tpu_custom_call.1
= control target key start
LH: loop header
LB: loop body
LE: loop exit
PB: predicated region body
PF: predicated region fallthrough
CT: control target
= control target key end

     0   :  { %14 = vsyncpa [#allocation3], 0  ;;  %s6705_s0 = inlined_call_operand.vmem [shape: bf16[32,128], index: 0, kind: input, shape index: {}]   ;;  %s6706_s1 = inlined_call_operand.vmem [shape: bf16[512,16], index: 1, kind: input, shape index: {}]   ;;  %s6707_s2 = inlined_call_operand.vmem [shape: f32[512,1], index: 2, kind: input, shape index: {}]   ;;  %s6708_s3 = inlined_call_operand.vmem [shape: s32[512,1], index: 3, kind: input, shape index: {}]   ;;  %s6709_s4 = inlined_call_operand.vmem [shape: s32[1,512], index: 4, kind: input, shape index: {}]   ;;  %s6710_s5 = inlined_call_operand.vmem [shape: bf16[16,128], index: 5, kind: input, shape index: {}]   ;;  %s6711_s6 = inlined_call_operand.vmem [shape: f32[1,128], index: 6, kind: input, shape index: {}]   ;;  %s6712_s7 = inlined_call_operand.vmem [shape: bf16[128,128], index: 7, kind: input, shape index: {}]   ;;  %s6713_s8 = inlined_call_operand.vmem [shape: f32[1,128], index: 8, kind: input, shape index: {}]   ;;  %s6714_s9 = inlined_call_operand.hbm [shape: f32[2,32,128], index: 9, kind: output, shape index: {}]  }
   0x1   :  { %16 = vsyncpa [#allocation3 + $0x1], 0  ;;  %s4478_s30 = smov 0   ;;  %s4480_s10 = smov 0  }
   0x2   :  { %s4482_s11 = smov 0   ;;  %s4484_s12 = smov 0  }
   0x3   :  { %s4486_s13 = smov 0   ;;  %s4488_s14 = smov 0  }
   0x4   :  { %s4490_s15 = smov 0   ;;  %s4492_s16 = smov 0  }
   0x5 LB: > { %6724 = sst [smem:[#allocation5_spill]] %s4386_s30  ;;  %s3929_s17 = sadd.s32 4294967295, %s4414_s16   ;;  %s4414_s16 = sphi %s4492_s16, %s22_s16   ;;  %s4410_s15 = sphi %s4490_s15, %s6774_s15   ;;  %s4406_s14 = sphi %s4488_s14, %s6773_s14   ;;  %s4402_s13 = sphi %s4486_s13, %s6772_s13   ;;  %s4398_s12 = sphi %s4484_s12, %s6771_s12   ;;  %s4394_s11 = sphi %s4482_s11, %s6770_s11   ;;  %s4390_s10 = sphi %s4480_s10, %s6776_s10   ;;  %s4386_s30 = sphi %s4478_s30, %s6775_s30  }
   0x6   : > { %6725 = sst [smem:[#allocation6_spill]] %s4394_s11  ;;  %s3930_s18 = sadd.s32 4294967294, %s4414_s16  }
   0x7   : > { %6726 = sst [smem:[#allocation7_spill]] %s4406_s14  ;;  %s31_s19 = sadd.s32 1, %s4406_s14 }
   0x8   : > { %6727 = sst [smem:[#allocation8_spill]] %s4410_s15  ;;  %p32_p0 = scmp.ge.s32.totalorder %s31_s19, 2 }
   0x9   : > { %6728 = sst [smem:[#allocation9_spill]] %s4414_s16  ;;  %s34_s20 = sadd.s32 1, %s4410_s15 }
   0xa   : > { %p276_p1 = scmp.ne.s32.totalorder %s4394_s11, %s4390_s10  ;;  %p277_p2 = scmp.eq.s32.totalorder %s3929_s17, 3 }
   0xb   : > { %s6778_s19 = smov (%p32_p0, %s31_s19), 0  ;;  %s6780_s20 = smov (!%p32_p0, %s34_s20), %s4410_s15 }
   0xc   : > { %6729 = sst [smem:[#allocation10_spill]] %s6778_s19  ;;  %p4527_p3 = por %p277_p2, %p276_p1 }
   0xd   : > { %p282_p4 = scmp.ne.s32.totalorder %s4390_s10, %s4386_s30  ;;  %p36_p5 = scmp.ge.s32.totalorder %s6780_s20, 2 }
   0xe   : > { %p283_p6 = scmp.eq.s32.totalorder %s3930_s18, 3  ;;  %p3941_p7 = scmp.ge.s32.totalorder %s4414_s16, 1 }
   0xf   : > { %p365_p8 = scmp.lt.s32.totalorder %s4414_s16, 5  ;;  %s6782_s20 = smov (%p36_p5, %s6780_s20), 0 }
  0x10   : > { %6731 = sst [smem:[#allocation11_spill]] %s6782_s20  ;;  %p4537_p9 = por %p283_p6, %p282_p4 }
  0x11   : > { %p366_p10 = pnand %p3941_p7, %p365_p8  ;;  %s263_s23 = ssub.s32 %s4410_s15, %s6782_s20 }
  0x12   : > { %s6732_s22 = scalar_select %p4537_p9, 1, 0 }
  0x13   : > { %s266_s24 = sadd.s32 1, %s4394_s11  ;;  %p264_p11 = scmp.eq.s32.totalorder %s263_s23, 0 }
  0x14   : > { %6733 = sst [smem:[#allocation12_spill]] %s6732_s22  ;;  %369 = sbr.rel (%p366_p10) target bundleno = 1118 (0x45e), region = 56 }
  0x15   : > { %s4545_s25 = scalar_select %p264_p11, %s4394_s11, %s266_s24  }
  0x16   : > { %s6718_s26 = sand.u32 (!%p366_p10), 1, %s4390_s10   ;;  %s3943_s27 = sshll.u32 (!%p366_p10), %s4402_s13, 1 }
  0x17   : > { %6734 = sst [smem:[#allocation13_spill]] %s4545_s25  ;;  %s3942_s28 = sshll.u32 (!%p366_p10), %s6718_s26, 5 }
  0x18   : > { %s423_s29 = sadd.s32 (!%p366_p10), %s4398_s12, %s3943_s27  ;;  %p3953_p0 = scmp.ne.s32.totalorder (!%p366_p10), %s4398_s12, 0 }
  0x19   : > { %s3944_s17 = sshll.u32 %s423_s29, 4  ;;  %p454_p13 = scmp.lt.s32.totalorder %s423_s29, 3 }
  0x1a   : > { %p425_p12 = scmp.lt.s32.totalorder %s3944_s17, 63 }
  0x1b   : > { %s6786_s29 = smov (!%p454_p13, %s423_s29), 3  ;;  %463 = sbr.rel (%p3953_p0) target bundleno = 37 (0x25), region = 60 }
  0x1c   : > { %s6784_s17 = smov (!%p425_p12, %s3944_s17), 63  ;;  %s456_s16 = scalar_lea.vmem %s6709_s4, %s6786_s29 }
  0x1d   : > { %s3945_s18 = sshll.u32 %s6784_s17, 2  ;;  %s3948_s23 = sshll.u32 %s6784_s17, 3 }
  0x1e   : > { %s4557_s19 = scalar_lea.vmem %s6706_s1, %s3945_s18  ;;  %s4562_s25 = scalar_lea.vmem %s6707_s2, %s3948_s23 }
  0x1f   : > { %s4567_s11 = scalar_lea.vmem %s6708_s3, %s3948_s23  ;;  %s4573_s17 = scalar_lea.vmem [#allocation2], %s3942_s28 }
  0x20   : > { %v4416_v0 = vmov 0.0  }
  0x21   : > { %464 = vst [vmem:[%s4573_s17] sm:$0xff] %v4416_v0 }
  0x22   : > { %465 = vst [vmem:[%s4573_s17 + $0x8] sm:$0xff] %v4416_v0 }
  0x23   : > { %466 = vst [vmem:[%s4573_s17 + $0x10] sm:$0xff] %v4416_v0 }
  0x24   : > { %467 = vst [vmem:[%s4573_s17 + $0x18] sm:$0xff] %v4416_v0 }
  0x25 PF: > { %v3521_v1 = vld [vmem:[%s4567_s11] sm:$0xff]  ;;  %v4417_v3 = vmov 0   ;;  %v3523_v5 = vld [vmem:[%s4567_s11 + $0x10] sm:$0xff]  ;;  %vm536_vm0 = vcmask 130048   ;;  %v910_v6 = vld [vmem:[%s4562_s25 + $0x78] sm:$0xff]  ;;  %s3820_s30 = sshll.u32 %s4573_s17, 4  ;;  %s3821_s30 = int_to_ptr.vmem [resolvable:$true] %s3820_s30 }
  0x26   : > { %v4147_v2 = vld [vmem:[%s6710_s5] sm:$0xff]  ;;  %4250 = vset.pattern.permute.xlu0 %v4417_v3  ;;  %4251 = vset.pattern.permute.xlu1 %v4417_v3  ;;  %v4590_v7 = vmul.f32 0.62831855, %v910_v6  ;;  %v3522_v11 = vld [vmem:[%s4567_s11 + $0x8] sm:$0xff]  ;;  %v909_v12 = vld [vmem:[%s4562_s25 + $0x70] sm:$0xff]  ;;  %s4340_s22 = scalar_lea.hbm %s6714_s9, 64 }
  0x27   : > { %v4139_v4 = vld [vmem:[%s4557_s19] sm:$0xff]  ;;  %3538 = vperm.xlu0 %4250, %v3521_v1   ;;  %568 = vmatpush.bf16.msra.mxu0 %v4147_v2  ;;  %v3524_v13 = vld [vmem:[%s4567_s11 + $0x18] sm:$0xff]  ;;  %v4601_v16 = vmul.f32 0.62831855, %v909_v12  ;;  %v3526_v20 = vld [vmem:[%s4567_s11 + $0x28] sm:$0xff] }
  0x28   : > { %3544 = vperm.xlu1 %4251, %v3523_v5   ;;  %4252 = vset.pattern.permute.xlu2 %v4417_v3  ;;  %v3525_v8 = vld [vmem:[%s4567_s11 + $0x20] sm:$0xff]  ;;  %v3237_v9 = vand.u32 2147483647, %v4590_v7  ;;  %v3240_v10 = vand.u32 2139095040, %v4590_v7  ;;  %v3527_v26 = vld [vmem:[%s4567_s11 + $0x30] sm:$0xff]  ;;  %v3528_v27 = vld [vmem:[%s4567_s11 + $0x38] sm:$0xff] }
  0x29   : > { %3550 = vperm.xlu2 %4252, %v3525_v8   ;;  %v3086_v18 = vand.u32 2139095040, %v4601_v16  ;;  %v907_v19 = vld [vmem:[%s4562_s25 + $0x60] sm:$0xff]  ;;  %v3083_v24 = vand.u32 2147483647, %v4601_v16  ;;  %v4140_v29 = vld [vmem:[%s4557_s19 + $0x8] sm:$0xff]  ;;  %v3531_v1 = vld [vmem:[%s4567_s11 + $0x50] sm:$0xff] }
  0x2a   : > { %3990 = vmatmul.msk.bf16.vlgmr.msra.gmra.mxu0 %vm536_vm0, %v4139_v4  ;;  %v3241_v14 = vshrl.u32 %v3240_v10, 23  ;;  %v3244_v15 = vand.u32 8388607, %v3237_v9  ;;  %v4607_v25 = vmul.f32 0.62831855, %v907_v19  ;;  %v3529_v53 = vld [vmem:[%s4567_s11 + $0x40] sm:$0xff] }
  0x2b   : > { %v3087_v23 = vshrl.u32 %v3086_v18, 23  ;;  %v4618_v34 = vand.u32 8388607, %v3083_v24  ;;  %v4418_v38 = vmov 683565275   ;;  %v3530_v61 = vld [vmem:[%s4567_s11 + $0x48] sm:$0xff] }
  0x2c   : > { %v4091_v17 = vadd.s32 4294967169, %v3241_v14  ;;  %v3245_v21 = vor.u32 8388608, %v3244_v15  ;;  %v2778_v36 = vand.u32 2139095040, %v4607_v25  ;;  %v4419_v40 = vmov 2475754826  }
  0x2d   : > { %v4088_v28 = vadd.s32 4294967169, %v3087_v23  ;;  %v4420_v42 = vmov 2131351028   ;;  %v4421_v44 = vmov 2102212464  }
  0x2e   : > { %v3247_v22 = vadd.s32 1, %v4091_v17  ;;  %v4612_v31 = vshll.u32 %v3245_v21, 8  ;;  %v4422_v46 = vmov 920167782   ;;  %v4423_v56 = vmov 1326507024  }
  0x2f   : > { %3541 = vperm.xlu0 %4250, %v3522_v11   ;;  %v3093_v35 = vadd.s32 1, %v4088_v28  ;;  %v3091_v11 = vor.u32 8388608, %v4618_v34  ;;  %v3532_v17 = vld [vmem:[%s4567_s11 + $0x58] sm:$0xff]  ;;  %v4666_v21 = vshrl.u32 %v2778_v36, 23 }
  0x30   : > { %3547 = vperm.xlu1 %4251, %v3524_v13   ;;  %vm3248_vm1 = vcmp.gt.s32.totalorder %v3247_v22, 0  ;;  %v3286_v48 = vand.u32 65535, %v4612_v31  ;;  %v4628_v49 = vshrl.u32 %v4612_v31, 16 }
  0x31   : > { %3553 = vperm.xlu2 %4252, %v3526_v20   ;;  %v3249_v30 = vsel %vm3248_vm1, %v3247_v22, 0  ;;  %vm3094_vm4 = vcmp.gt.s32.totalorder %v3093_v35, 0 }
  0x32   : > { %v4614_v32 = vshrl.u32 %v3249_v30, 5  ;;  %v3251_v33 = vand.u32 31, %v3249_v30  ;;  %v3095_v0 = vsel %vm3094_vm4, %v3093_v35, 0 }
  0x33   : > { %v4657_v15 = vand.u32 31, %v3095_v0  ;;  %v4664_v20 = vshrl.u32 %v3095_v0, 5 }
  0x34   : > { %v3252_v37 = vsub.s32 32, %v3251_v33  ;;  %v3254_v39 = vshll.u32 %v4418_v38, %v3251_v33  ;;  %v3257_v41 = vshll.u32 %v4419_v40, %v3251_v33  ;;  %v3260_v43 = vshll.u32 %v4420_v42, %v3251_v33 }
  0x35   : > { %v3263_v45 = vshll.u32 %v4421_v44, %v3251_v33  ;;  %v3266_v47 = vshll.u32 %v4422_v46, %v3251_v33  ;;  %vm3269_vm2 = vcmp.lt.s32.totalorder %v4614_v32, 1  ;;  %vm3272_vm3 = vcmp.lt.s32.totalorder %v4614_v32, 4 }
  0x36   : > { %v3255_v50 = vshrl.u32 %v4419_v40, %v3252_v37  ;;  %v3258_v51 = vshrl.u32 %v4420_v42, %v3252_v37  ;;  %v3261_v52 = vshrl.u32 %v4421_v44, %v3252_v37  ;;  %v3253_v54 = vshrl.u32 %v4418_v38, %v3252_v37 }
  0x37   : > { %3556 = vperm.xlu0 %4250, %v3527_v26   ;;  %v3264_v55 = vshrl.u32 %v4422_v46, %v3252_v37  ;;  %v3267_v57 = vshrl.u32 %v4423_v56, %v3252_v37  ;;  %vm3271_vm5 = vcmp.lt.s32.totalorder %v4614_v32, 3  ;;  %vm3270_vm6 = vcmp.lt.s32.totalorder %v4614_v32, 2  ;;  %v3533_v32 = vld [vmem:[%s4567_s11 + $0x60] sm:$0xff] }
  0x38   : > { %3559 = vperm.xlu1 %4251, %v3528_v27   ;;  %v3256_v58 = vor.u32 %v3255_v50, %v3254_v39  ;;  %v3259_v59 = vor.u32 %v3258_v51, %v3257_v41  ;;  %v3262_v60 = vor.u32 %v3261_v52, %v3260_v43  ;;  %v3100_v30 = vshll.u32 %v4418_v38, %v4657_v15 }
  0x39   : > { %3562 = vperm.xlu2 %4252, %v3529_v53   ;;  %v3265_v62 = vor.u32 %v3264_v55, %v3263_v45  ;;  %v3268_v63 = vor.u32 %v3267_v57, %v3266_v47  ;;  %v4677_v33 = vshll.u32 %v3091_v11, 8  ;;  %v3103_v37 = vshll.u32 %v4419_v40, %v4657_v15  ;;  %v3534_v47 = vld [vmem:[%s4567_s11 + $0x68] sm:$0xff] }
  0x3a   : > { %3991 = vmatmul.msk.bf16.gmra.mxu0 %vm536_vm0, %v4140_v29  ;;  %v3274_v2 = vsel %vm3272_vm3, %v3262_v60, 2102212464  ;;  %v3277_v4 = vsel %vm3269_vm2, %v3256_v58, %v3259_v59  ;;  %v3281_v5 = vsel %vm3269_vm2, %v3259_v59, %v3262_v60  ;;  %v3273_v6 = vsel %vm3269_vm2, %v3253_v54, %v3256_v58  ;;  %v4141_v54 = vld [vmem:[%s4557_s19 + $0x10] sm:$0xff] }
  0x3b   : > { %v3278_v8 = vsel %vm3272_vm3, %v3265_v62, 920167782  ;;  %v3282_v10 = vsel %vm3272_vm3, %v3268_v63, 1326507024  ;;  %v3275_v12 = vsel %vm3271_vm5, %v3259_v59, %v3274_v2  ;;  %v4673_v29 = vsub.s32 32, %v4657_v15 }
  0x3c   : > { %v3279_v13 = vsel %vm3271_vm5, %v3262_v60, %v3278_v8  ;;  %v3283_v14 = vsel %vm3271_vm5, %v3265_v62, %v3282_v10  ;;  %v4670_v28 = vsel %vm3270_vm6, %v3273_v6, %v3275_v12  ;;  %v3106_v45 = vshll.u32 %v4420_v42, %v4657_v15 }
  0x3d   : > { %v3280_v18 = vsel %vm3270_vm6, %v3277_v4, %v3279_v13  ;;  %v3284_v19 = vsel %vm3270_vm6, %v3281_v5, %v3283_v14  ;;  %vm3115_vm7 = vcmp.lt.s32.totalorder %v4664_v20, 1  ;;  %v3104_v63 = vshrl.u32 %v4420_v42, %v4673_v29  ;;  %v3535_v4 = vld [vmem:[%s4567_s11 + $0x70] sm:$0xff]  ;;  %v3536_v14 = vld [vmem:[%s4567_s11 + $0x78] sm:$0xff]  ;;  %s6765_s11 = sand.u32 1, %s4390_s10  }
  0x3e   : > { %v3288_v22 = vand.u32 65535, %v3284_v19  ;;  %v3289_v23 = vshrl.u32 %v3284_v19, 16  ;;  %v3310_v26 = vand.u32 65535, %v3280_v18  ;;  %v3311_v27 = vshrl.u32 %v3280_v18, 16  ;;  %s3808_s12 = scalar_lea.sflag [#allocation3], %s6765_s11 }
  0x3f   : > { %3565 = vperm.xlu0 %4250, %v3530_v61   ;;  %v3101_v61 = vshrl.u32 %v4419_v40, %v4673_v29  ;;  %v3105_v12 = vor.u32 %v3104_v63, %v3103_v37  ;;  %v3107_v13 = vshrl.u32 %v4421_v44, %v4673_v29  ;;  %v3109_v18 = vshll.u32 %v4421_v44, %v4657_v15 }
  0x40   : > { %3568 = vperm.xlu1 %4251, %v3531_v1   ;;  %v3290_v34 = vmul.u32 %v3288_v22, %v3286_v48  ;;  %v3291_v35 = vmul.u32 %v3289_v23, %v3286_v48  ;;  %v3292_v36 = vmul.u32 %v3288_v22, %v4628_v49  ;;  %v3312_v39 = vmul.u32 %v3310_v26, %v3286_v48 }
  0x41   : > { %3571 = vperm.xlu2 %4252, %v3532_v17   ;;  %v3313_v41 = vmul.u32 %v3311_v27, %v3286_v48  ;;  %v3314_v43 = vmul.u32 %v3310_v26, %v4628_v49  ;;  %v3293_v50 = vmul.u32 %v3289_v23, %v4628_v49  ;;  %v3315_v53 = vmul.u32 %v3311_v27, %v4628_v49 }
  0x42   : > { %v3294_v51 = vshll.u32 %v3291_v35, 16  ;;  %v3296_v52 = vshll.u32 %v3292_v36, 16  ;;  %v3295_v55 = vshrl.u32 %v3291_v35, 16  ;;  %v3297_v57 = vshrl.u32 %v3292_v36, 16 }
  0x43   : > { %v3316_v58 = vshll.u32 %v3313_v41, 16  ;;  %v3318_v59 = vshll.u32 %v3314_v43, 16  ;;  %v3317_v60 = vshrl.u32 %v3313_v41, 16  ;;  %v3319_v1 = vshrl.u32 %v3314_v43, 16 }
  0x44   : > { %vm3298_vm8 = vc.u32 %v3290_v34, %v3294_v51  ;;  %v3300_v48 = vadd.s32 %v3294_v51, %v3290_v34  ;;  %v3102_v8 = vor.u32 %v3101_v61, %v3100_v30  ;;  %v3110_v19 = vshrl.u32 %v4422_v46, %v4673_v29 }
  0x45   : > { %v3299_v62 = vsel %vm3298_vm8, 1, %v4417_v3  ;;  %vm3320_vm9 = vc.u32 %v3312_v39, %v3316_v58  ;;  %v3322_v49 = vadd.s32 %v3316_v58, %v3312_v39  ;;  %v3112_v22 = vshll.u32 %v4422_v46, %v4657_v15 }
  0x46   : > { %v3301_v0 = vadd.s32 %v3299_v62, %v3293_v50  ;;  %vm3302_vm10 = vc.u32 %v3300_v48, %v3296_v52  ;;  %v3321_v2 = vsel %vm3320_vm9, 1, %v4417_v3  ;;  %v3108_v27 = vor.u32 %v3107_v13, %v3106_v45  ;;  %v4142_v62 = vld [vmem:[%s4557_s19 + $0x18] sm:$0xff] }
  0x47   : > { %3574 = vperm.xlu0 %4250, %v3533_v32   ;;  %v3303_v5 = vsel %vm3302_vm10, 1, %v4417_v3  ;;  %v3323_v6 = vadd.s32 %v3321_v2, %v3315_v53  ;;  %vm3324_vm11 = vc.u32 %v3322_v49, %v3318_v59  ;;  %v4710_v26 = vadd.s32 %v3322_v49, %v3318_v59 }
  0x48   : > { %3577 = vperm.xlu1 %4251, %v3534_v47   ;;  %v3305_v10 = vadd.s32 %v3303_v5, %v3301_v0  ;;  %v3325_v11 = vsel %vm3324_vm11, 1, %v4417_v3  ;;  %v3113_v30 = vshrl.u32 %v4423_v56, %v4673_v29  ;;  %v3111_v35 = vor.u32 %v3110_v19, %v3109_v18 }
  0x49   : > { %3580 = vperm.xlu2 %4252, %v3535_v4   ;;  %v3327_v17 = vadd.s32 %v3325_v11, %v3323_v6  ;;  %vm3117_vm12 = vcmp.lt.s32.totalorder %v4664_v20, 3  ;;  %vm3118_vm13 = vcmp.lt.s32.totalorder %v4664_v20, 4  ;;  %vm3116_vm14 = vcmp.lt.s32.totalorder %v4664_v20, 2 }
  0x4a   : > { %3992 = vmatmul.msk.bf16.gmra.mxu0 %vm536_vm0, %v4141_v54  ;;  %v3306_v23 = vadd.s32 %v3305_v10, %v3295_v55  ;;  %v3114_v37 = vor.u32 %v3113_v30, %v3112_v22  ;;  %v3123_v32 = vsel %vm3115_vm7, %v3102_v8, %v3105_v12  ;;  %v3124_v39 = vsel %vm3118_vm13, %v3111_v35, 920167782 }
  0x4b   : > { %v3328_v34 = vadd.s32 %v3327_v17, %v3317_v60  ;;  %v4082_v41 = vadd.s32 4294967169, %v4666_v21  ;;  %v3330_v43 = vmul.u32 %v4612_v31, %v4670_v28  ;;  %v3125_v45 = vsel %vm3117_vm12, %v3108_v27, %v3124_v39 }
  0x4c   : > { %v4716_v36 = vadd.s32 %v3306_v23, %v3297_v57  ;;  %v3132_v47 = vand.u32 65535, %v4677_v33  ;;  %v3126_v51 = vsel %vm3116_vm14, %v3123_v32, %v3125_v45  ;;  %v3127_v52 = vsel %vm3115_vm7, %v3105_v12, %v3108_v27 }
  0x4d   : > { %v3329_v15 = vadd.s32 %v3328_v34, %v3319_v1  ;;  %v3128_v21 = vsel %vm3118_vm13, %v3114_v37, 1326507024  ;;  %v3133_v28 = vshrl.u32 %v4677_v33, 16  ;;  %v3156_v53 = vand.u32 65535, %v3126_v51 }
  0x4e   : > { %vm3332_vm15 = vc.u32 %v4716_v36, %v4710_v26  ;;  %v3129_v31 = vsel %vm3117_vm12, %v3111_v35, %v3128_v21  ;;  %v3099_v55 = vshrl.u32 %v4418_v38, %v4673_v29  ;;  %v3157_v58 = vshrl.u32 %v3126_v51, 16 }
  0x4f   : > { %3583 = vperm.xlu0 %4250, %v3536_v14   ;;  %v3333_v50 = vadd.s32 1, %v3329_v15  ;;  %v3130_v57 = vsel %vm3116_vm14, %v3127_v52, %v3129_v31  ;;  %v3120_v48 = vsel %vm3118_vm13, %v3108_v27, 2102212464  ;;  %v3160_v63 = vmul.u32 %v3156_v53, %v3133_v28 }
  0x50   : > { %v3134_v60 = vand.u32 65535, %v3130_v57  ;;  %v3135_v61 = vshrl.u32 %v3130_v57, 16  ;;  %v3159_v49 = vmul.u32 %v3157_v58, %v3132_v47  ;;  %v2785_v0 = vadd.s32 1, %v4082_v41 }
  0x51   : > { %v3334_v54 = vsel %vm3332_vm15, %v3333_v50, %v3329_v15  ;;  %v3158_v5 = vmul.u32 %v3156_v53, %v3132_v47  ;;  %v3119_v29 = vsel %vm3115_vm7, %v3099_v55, %v3102_v8  ;;  %v3121_v6 = vsel %vm3117_vm12, %v3105_v12, %v3120_v48 }
  0x52   : > { %v3335_v59 = vadd.s32 %v3334_v54, %v3330_v43  ;;  %v3136_v2 = vmul.u32 %v3134_v60, %v3132_v47  ;;  %v3137_v4 = vmul.u32 %v3135_v61, %v3132_v47  ;;  %v3138_v10 = vmul.u32 %v3134_v60, %v3133_v28 }
  0x53   : > { %v3162_v11 = vshll.u32 %v3159_v49, 16  ;;  %v3139_v14 = vmul.u32 %v3135_v61, %v3133_v28  ;;  %v3161_v18 = vmul.u32 %v3157_v58, %v3133_v28  ;;  %v3163_v23 = vshrl.u32 %v3159_v49, 16  ;;  %v4143_v49 = vld [vmem:[%s4557_s19 + $0x20] sm:$0xff] }
  0x54   : > { %v3336_v1 = vadd.s32 536870912, %v3335_v59  ;;  %v3140_v17 = vshll.u32 %v3137_v4, 16  ;;  %v3141_v19 = vshrl.u32 %v3137_v4, 16  ;;  %v3142_v22 = vshll.u32 %v3138_v10, 16 }
  0x55   : > { %v3164_v27 = vshll.u32 %v3160_v63, 16  ;;  %vm3166_vm2 = vc.u32 %v3158_v5, %v3162_v11  ;;  %v3168_v35 = vadd.s32 %v3162_v11, %v3158_v5  ;;  %vm2786_vm3 = vcmp.gt.s32.totalorder %v2785_v0, 0 }
  0x56   : > { %v4751_v13 = vshrl.u32 %v3336_v1, 30  ;;  %vm3144_vm1 = vc.u32 %v3136_v2, %v3140_v17  ;;  %v3146_v8 = vadd.s32 %v3140_v17, %v3136_v2  ;;  %v3167_v34 = vsel %vm3166_vm2, 1, %v4417_v3 }
  0x57   : > { %v3145_v12 = vsel %vm3144_vm1, 1, %v4417_v3  ;;  %v3169_v32 = vadd.s32 %v3167_v34, %v3161_v18  ;;  %v3143_v39 = vshrl.u32 %v3138_v10, 16  ;;  %vm3170_vm5 = vc.u32 %v3168_v35, %v3164_v27 }
  0x58   : > { %v3338_v30 = vshll.u32 %v4751_v13, 30  ;;  %v3147_v15 = vadd.s32 %v3145_v12, %v3139_v14  ;;  %vm3148_vm4 = vc.u32 %v3146_v8, %v3142_v22  ;;  %v2787_v43 = vsel %vm2786_vm3, %v2785_v0, 0 }
  0x59   : > { %v3149_v41 = vsel %vm3148_vm4, 1, %v4417_v3  ;;  %v3171_v50 = vsel %vm3170_vm5, 1, %v4417_v3  ;;  %v3165_v51 = vshrl.u32 %v3160_v63, 16  ;;  %v2789_v21 = vand.u32 31, %v2787_v43 }
  0x5a   : > { %3993 = vmatmul.msk.bf16.gmra.mxu0 %vm536_vm0, %v4142_v62  ;;  %v3339_v37 = vsub.s32 %v3335_v59, %v3338_v30  ;;  %v3151_v47 = vadd.s32 %v3149_v41, %v3147_v15  ;;  %v3173_v52 = vadd.s32 %v3171_v50, %v3169_v32  ;;  %v4759_v53 = vadd.s32 %v3168_v35, %v3164_v27 }
  0x5b   : > { %v3122_v55 = vsel %vm3116_vm14, %v3119_v29, %v3121_v6  ;;  %v2775_v58 = vand.u32 2147483647, %v4607_v25  ;;  %v4766_v48 = vsub.s32 32, %v2789_v21  ;;  %v3331_v63 = vadd.s32 %v4710_v26, %v4716_v36 }
  0x5c   : > { %vm3340_vm6 = vcmp.lt.s32.totalorder %v3339_v37, 0  ;;  %v3341_v45 = vsub.s32 0, %v3339_v37  ;;  %v3152_v28 = vadd.s32 %v3151_v47, %v3141_v19  ;;  %v3174_v57 = vadd.s32 %v3173_v52, %v3163_v23 }
  0x5d   : > { %v3176_v62 = vmul.u32 %v4677_v33, %v3122_v55  ;;  %v2782_v0 = vand.u32 8388607, %v2775_v58  ;;  %v2792_v2 = vshll.u32 %v4418_v38, %v2789_v21  ;;  %v2793_v4 = vshrl.u32 %v4419_v40, %v4766_v48 }
  0x5e   : > { %v3342_v31 = vsel %vm3340_vm6, %v3341_v45, %v3339_v37  ;;  %v4764_v59 = vadd.s32 %v3152_v28, %v3143_v39  ;;  %v3175_v61 = vadd.s32 %v3174_v57, %v3165_v51  ;;  %v2795_v33 = vshll.u32 %v4419_v40, %v2789_v21 }
  0x5f   : > { %v3343_v54 = vclz %v3342_v31  ;;  %v2796_v26 = vshrl.u32 %v4420_v42, %v4766_v48  ;;  %v2798_v36 = vshll.u32 %v4420_v42, %v2789_v21  ;;  %v2799_v14 = vshrl.u32 %v4421_v44, %v4766_v48 }
  0x60   : > { %vm3178_vm7 = vc.u32 %v4764_v59, %v4759_v53  ;;  %v3179_v20 = vadd.s32 1, %v3175_v61  ;;  %v2783_v19 = vor.u32 8388608, %v2782_v0  ;;  %v4786_v22 = vshrl.u32 %v2787_v43, 5 }
  0x61   : > { %v4092_v60 = vadd.s32 4294967294, %v3343_v54  ;;  %v3361_v23 = vsub.s32 4, %v4751_v13  ;;  %v4789_v30 = vor.u32 %v2793_v4, %v2792_v2  ;;  %v2801_v8 = vshll.u32 %v4421_v44, %v2789_v21 }
  0x62   : > { %v3180_v10 = vsel %vm3178_vm7, %v3179_v20, %v3175_v61  ;;  %v2802_v35 = vshrl.u32 %v4422_v46, %v4766_v48  ;;  %v4797_v32 = vor.u32 %v2796_v26, %v2795_v33  ;;  %v2800_v39 = vor.u32 %v2799_v14, %v2798_v36 }
  0x63   : > { %vm4093_vm8 = vcmp.lt.s32.totalorder %v4092_v60, 0  ;;  %v3181_v11 = vadd.s32 %v3180_v10, %v3176_v62  ;;  %v2805_v41 = vshrl.u32 %v4423_v56, %v4766_v48  ;;  %vm2807_vm9 = vcmp.lt.s32.totalorder %v4786_v22, 1 }
  0x64   : > { %v3346_v1 = vsel %vm4093_vm8, 0, %v4092_v60  ;;  %v2803_v47 = vor.u32 %v2802_v35, %v2801_v8  ;;  %vm2809_vm10 = vcmp.lt.s32.totalorder %v4786_v22, 3  ;;  %vm2810_vm11 = vcmp.lt.s32.totalorder %v4786_v22, 4 }
  0x65   : > { %v3347_v5 = vsub.s32 32, %v3346_v1  ;;  %v3348_v29 = vshll.u32 %v3339_v37, %v3346_v1  ;;  %v3351_v6 = vsub.s32 4294967266, %v3346_v1  ;;  %v3182_v27 = vadd.s32 536870912, %v3181_v11 }
  0x66   : > { %v2804_v37 = vshll.u32 %v4422_v46, %v2789_v21  ;;  %vm3239_vm12 = vcmp.lt.s32.totalorder %v4590_v7, 0  ;;  %v2816_v21 = vsel %vm2810_vm11, %v2803_v47, 920167782  ;;  %v4808_v31 = vshll.u32 %v2783_v19, 8 }
  0x67   : > { %v3349_v17 = vshrl.u32 %v3331_v63, %v3347_v5  ;;  %v3352_v18 = vadd.s32 127, %v3351_v6  ;;  %v4795_v15 = vshrl.u32 %v3182_v27, 30  ;;  %v3362_v28 = vsel %vm3239_vm12, %v3361_v23, %v4751_v13 }
  0x68   : > { %v2806_v51 = vor.u32 %v2805_v41, %v2804_v37  ;;  %vm2808_vm13 = vcmp.lt.s32.totalorder %v4786_v22, 2  ;;  %v2815_v57 = vsel %vm2807_vm9, %v4789_v30, %v4797_v32  ;;  %v2817_v60 = vsel %vm2809_vm10, %v2800_v39, %v2816_v21 }
  0x69   : > { %v3350_v12 = vor.u32 %v3349_v17, %v3348_v29  ;;  %v3353_v34 = vshll.u32 %v3352_v18, 23  ;;  %v3184_v50 = vshll.u32 %v4795_v15, 30  ;;  %v2819_v61 = vsel %vm2807_vm9, %v4797_v32, %v2800_v39  ;;  %v4144_v29 = vld [vmem:[%s4557_s19 + $0x28] sm:$0xff] }
  0x6a   : > { %3994 = vmatmul.msk.bf16.gmra.mxu0 %vm536_vm0, %v4143_v49  ;;  %vm4827_vm14 = vcmp.le.f32.partialorder %v3237_v9, 0.7853982  ;;  %v2820_v49 = vsel %vm2810_vm11, %v2806_v51, 1326507024  ;;  %v2824_v1 = vand.u32 65535, %v4808_v31  ;;  %v908_v9 = vld [vmem:[%s4562_s25 + $0x68] sm:$0xff]  ;;  %v2818_v4 = vsel %vm2808_vm13, %v2815_v57, %v2817_v60 }
  0x6b   : > { %v3354_v43 = vor.u32 4788187, %v3353_v34  ;;  %v3357_v45 = vcvt.s32.f32 %v3350_v12  ;;  %v4813_v54 = vsub.s32 %v3181_v11, %v3184_v50  ;;  %v3364_v20 = vsel %vm4827_vm14, 0, %v3362_v28 }
  0x6c   : > { %v2821_v0 = vsel %vm2809_vm10, %v2803_v47, %v2820_v49  ;;  %v2825_v5 = vshrl.u32 %v4808_v31, 16  ;;  %v2848_v14 = vand.u32 65535, %v2818_v4  ;;  %v4855_v17 = vmul.f32 0.62831855, %v908_v9 }
  0x6d   : > { %v3355_v52 = vand.u32 2147483647, %v3354_v43  ;;  %vm3186_vm15 = vcmp.lt.s32.totalorder %v4813_v54, 0  ;;  %v3187_v62 = vsub.s32 0, %v4813_v54  ;;  %v2822_v33 = vsel %vm2808_vm13, %v2819_v61, %v2821_v0 }
  0x6e   : > { %v2826_v11 = vand.u32 65535, %v2822_v33  ;;  %v2827_v26 = vshrl.u32 %v2822_v33, 16  ;;  %v4861_v23 = vshrl.u32 %v4418_v38, %v4766_v48  ;;  %v4865_v8 = vand.u32 3, %v3364_v20 }
  0x6f   : > { %v3358_v55 = vmul.f32 %v3357_v45, %v3355_v52  ;;  %v3188_v2 = vsel %vm3186_vm15, %v3187_v62, %v4813_v54  ;;  %v4869_v12 = vsel %vm2810_vm11, %v2800_v39, 2102212464  ;;  %v2849_v35 = vshrl.u32 %v2818_v4, 16 }
  0x70   : > { %v3189_v10 = vclz %v3188_v2  ;;  %v4863_v27 = vmul.u32 %v2827_v26, %v2824_v1  ;;  %v4871_v34 = vmul.u32 %v2826_v11, %v2825_v5  ;;  %v3177_v43 = vadd.s32 %v4759_v53, %v4764_v59 }
  0x71   : > { %v3359_v63 = vxor.u32 2147483648, %v3358_v55  ;;  %v2828_v45 = vmul.u32 %v2826_v11, %v2824_v1  ;;  %v2850_v50 = vmul.u32 %v2848_v14, %v2824_v1  ;;  %vm3386_vm2 = vcmp.eq.s32.totalorder %v4865_v8, 2 }
  0x72   : > { %v4089_v19 = vadd.s32 4294967294, %v3189_v10  ;;  %v2832_v47 = vshll.u32 %v4863_v27, 16  ;;  %v2834_v57 = vshll.u32 %v4871_v34, 16  ;;  %v4880_v60 = vmul.u32 %v2849_v35, %v2824_v1 }
  0x73   : > { %v3360_v6 = vsel %vm3239_vm12, %v3359_v63, %v3358_v55  ;;  %v2831_v55 = vmul.u32 %v2827_v26, %v2825_v5  ;;  %v4882_v13 = vmul.u32 %v2848_v14, %v2825_v5  ;;  %vm3383_vm3 = vcmp.eq.s32.totalorder %v4865_v8, 0 }
  0x74   : > { %v4853_v36 = vsel %vm4827_vm14, %v4590_v7, %v3360_v6  ;;  %vm4090_vm1 = vcmp.lt.s32.totalorder %v4089_v19, 0  ;;  %vm2836_vm4 = vc.u32 %v2828_v45, %v2832_v47  ;;  %v2838_v49 = vadd.s32 %v2832_v47, %v2828_v45  ;;  %v4145_v45 = vld [vmem:[%s4557_s19 + $0x30] sm:$0xff] }
  0x75   : > { %v3365_v18 = vmul.f32 %v4853_v36, %v4853_v36  ;;  %v3192_v48 = vsel %vm4090_vm1, 0, %v4089_v19  ;;  %v2853_v63 = vmul.u32 %v2849_v35, %v2825_v5  ;;  %vm3382_vm5 = vcmp.lt.s32.totalorder %v4865_v8, 2 }
  0x76   : > { %v3193_v39 = vsub.s32 32, %v3192_v48  ;;  %v3194_v21 = vshll.u32 %v4813_v54, %v3192_v48  ;;  %v3197_v28 = vsub.s32 4294967266, %v3192_v48  ;;  %vm3085_vm6 = vcmp.lt.s32.totalorder %v4601_v16, 0 }
  0x77   : > { %v3366_v37 = vmul.f32 -0.001358992, %v3365_v18  ;;  %v3373_v41 = vmul.f32 -0.00019511016, %v3365_v18  ;;  %v2837_v1 = vsel %vm2836_vm4, 1, %v4417_v3  ;;  %vm3380_vm7 = vweird.f32 %v4590_v7 }
  0x78   : > { %v3195_v61 = vshrl.u32 %v3177_v43, %v3193_v39  ;;  %v3198_v62 = vadd.s32 127, %v3197_v28  ;;  %vm4891_vm8 = vcmp.le.f32.partialorder %v3083_v24, 0.7853982  ;;  %v2839_v4 = vadd.s32 %v2837_v1, %v2831_v55 }
  0x79   : > { %v3367_v51 = vadd.f32 0.041655596, %v3366_v37  ;;  %v3374_v52 = vadd.f32 0.008332121, %v3373_v41  ;;  %vm2840_vm11 = vc.u32 %v2838_v49, %v2834_v57  ;;  %v2854_v33 = vshll.u32 %v4880_v60, 16 }
  0x7a   : > { %3995 = vmatmul.msk.bf16.gmra.mxu0 %vm536_vm0, %v4144_v29  ;;  %v3196_v0 = vor.u32 %v3195_v61, %v3194_v21  ;;  %v3199_v2 = vshll.u32 %v3198_v62, 23  ;;  %v2833_v6 = vshrl.u32 %v4863_v27, 16  ;;  %v2841_v10 = vsel %vm2840_vm11, 1, %v4417_v3 }
  0x7b   : > { %v3368_v53 = vmul.f32 %v3367_v51, %v3365_v18  ;;  %v3375_v59 = vmul.f32 %v3374_v52, %v3365_v18  ;;  %v2843_v14 = vadd.s32 %v2841_v10, %v2839_v4  ;;  %v2856_v24 = vshll.u32 %v4882_v13, 16 }
  0x7c   : > { %v3200_v11 = vor.u32 4788187, %v3199_v2  ;;  %v3203_v26 = vcvt.s32.f32 %v3196_v0  ;;  %v3207_v37 = vsub.s32 4, %v4795_v15  ;;  %vm2858_vm12 = vc.u32 %v2850_v50, %v2854_v33 }
  0x7d   : > { %v3369_v54 = vadd.f32 -0.4999988, %v3368_v53  ;;  %v3376_v20 = vadd.f32 -0.16666654, %v3375_v59  ;;  %v2835_v43 = vshrl.u32 %v4871_v34, 16  ;;  %v2859_v48 = vsel %vm2858_vm12, 1, %v4417_v3 }
  0x7e   : > { %v3201_v41 = vand.u32 2147483647, %v3200_v11  ;;  %v2844_v51 = vadd.s32 %v2843_v14, %v2833_v6  ;;  %v2861_v52 = vadd.s32 %v2859_v48, %v2853_v63  ;;  %v2811_v21 = vsel %vm2807_vm9, %v4861_v23, %v4789_v30 }
  0x7f   : > { %v3370_v5 = vmul.f32 %v3369_v54, %v3365_v18  ;;  %v3377_v29 = vmul.f32 %v3376_v20, %v3365_v18  ;;  %v2860_v18 = vadd.s32 %v2854_v33, %v2850_v50  ;;  %v2855_v28 = vshrl.u32 %v4880_v60, 16  ;;  %v906_v33 = vld [vmem:[%s4562_s25 + $0x58] sm:$0xff] }
  0x80   : > { %v3204_v39 = vmul.f32 %v3203_v26, %v3201_v41  ;;  %v3208_v53 = vsel %vm3085_vm6, %v3207_v37, %v4795_v15  ;;  %v2857_v30 = vshrl.u32 %v4882_v13, 16  ;;  %v2845_v59 = vadd.s32 %v2844_v51, %v2835_v43 }
  0x81   : > { %v3371_v19 = vadd.f32 1.0, %v3370_v5  ;;  %v3378_v35 = vadd.f32 1.0, %v3377_v29  ;;  %vm2862_vm14 = vc.u32 %v2860_v18, %v2856_v24  ;;  %v2864_v61 = vadd.s32 %v2860_v18, %v2856_v24 }
  0x82   : > { %v2863_v50 = vsel %vm2862_vm14, 1, %v4417_v3  ;;  %v3205_v57 = vxor.u32 2147483648, %v3204_v39  ;;  %v2932_v62 = vand.u32 2139095040, %v4855_v17  ;;  %v3210_v8 = vsel %vm4891_vm8, 0, %v3208_v53 }
  0x83   : > { %v3379_v27 = vmul.f32 %v3378_v35, %v4853_v36  ;;  %v3387_v47 = vxor.u32 2147483648, %v3371_v19  ;;  %v2813_v36 = vsel %vm2809_vm10, %v4797_v32, %v4869_v12  ;;  %v2865_v23 = vadd.s32 %v2863_v50, %v2861_v52 }
  0x84   : > { %v3206_v12 = vsel %vm3085_vm6, %v3205_v57, %v3204_v39  ;;  %v2814_v15 = vsel %vm2808_vm13, %v2811_v21, %v2813_v36  ;;  %v2933_v54 = vshrl.u32 %v2932_v62, 23  ;;  %vm2870_vm9 = vc.u32 %v2845_v59, %v2864_v61 }
  0x85   : > { %v3384_v55 = vxor.u32 2147483648, %v3379_v27  ;;  %v3388_v34 = vsel %vm3386_vm2, %v3387_v47, %v3379_v27  ;;  %v2866_v13 = vadd.s32 %v2865_v23, %v2855_v28  ;;  %v3209_v63 = vsel %vm4891_vm8, %v4601_v16, %v3206_v12 }
  0x86   : > { %v3211_v0 = vmul.f32 %v3209_v63, %v3209_v63  ;;  %v2868_v2 = vmul.u32 %v4808_v31, %v2814_v15  ;;  %v2929_v22 = vand.u32 2147483647, %v4855_v17  ;;  %v4085_v4 = vadd.s32 4294967169, %v2933_v54 }
  0x87   : > { %v3385_v60 = vsel %vm3383_vm3, %v3371_v19, %v3384_v55  ;;  %v2867_v1 = vadd.s32 %v2866_v13, %v2857_v30  ;;  %v3227_v14 = vand.u32 3, %v3210_v8  ;;  %v4942_v31 = vmul.f32 0.62831855, %v906_v33 }
  0x88   : > { %v3389_v32 = vsel %vm3382_vm5, %v3385_v60, %v3388_v34  ;;  %v3212_v5 = vmul.f32 -0.001358992, %v3211_v0  ;;  %v3219_v29 = vmul.f32 -0.00019511016, %v3211_v0  ;;  %v2939_v10 = vadd.s32 1, %v4085_v4 }
  0x89   : > { %v3390_v49 = vsel %vm3380_vm7, nan, %v3389_v32  ;;  %v2871_v6 = vadd.s32 1, %v2867_v1  ;;  %v2936_v19 = vand.u32 8388607, %v2929_v22  ;;  %vm3228_vm13 = vcmp.lt.s32.totalorder %v3227_v14, 2 }
  0x8a   : > { %3996 = vmatmul.msk.bf16.gmra.mxu0 %vm536_vm0, %v4145_v45  ;;  %v3406_v20 = vadd.f32 1.0, %v3390_v49  ;;  %v3213_v11 = vadd.f32 0.041655596, %v3212_v5  ;;  %v3220_v26 = vadd.f32 0.008332121, %v3219_v29  ;;  %vm2940_vm10 = vcmp.gt.s32.totalorder %v2939_v10, 0 }
  0x8b   : > { %v2872_v9 = vsel %vm2870_vm9, %v2871_v6, %v2867_v1  ;;  %v2941_v41 = vsel %vm2940_vm10, %v2939_v10, 0  ;;  %vm3229_vm15 = vcmp.eq.s32.totalorder %v3227_v14, 0  ;;  %vm3232_vm1 = vcmp.eq.s32.totalorder %v3227_v14, 2 }
  0x8c   : > { %v3422_v7 = vmul.f32 0.5, %v3406_v20  ;;  %v2873_v24 = vadd.s32 %v2872_v9, %v2868_v2  ;;  %v3214_v35 = vmul.f32 %v3213_v11, %v3211_v0  ;;  %v3221_v37 = vmul.f32 %v3220_v26, %v3211_v0 }
  0x8d   : > { %v2943_v48 = vand.u32 31, %v2941_v41  ;;  %vm3226_vm2 = vweird.f32 %v4601_v16  ;;  %v2937_v47 = vor.u32 8388608, %v2936_v19  ;;  %v2624_v52 = vand.u32 2139095040, %v4942_v31 }
  0x8e   : > { %3500 = vperm.xlu2 %4252, %v3422_v7   ;;  %v2874_v43 = vadd.s32 536870912, %v2873_v24  ;;  %v3215_v18 = vadd.f32 -0.4999988, %v3214_v35  ;;  %v3222_v45 = vadd.f32 -0.16666654, %v3221_v37  ;;  %v2869_v62 = vadd.s32 %v2864_v61, %v2845_v59 }
  0x8f   : > { %v2944_v51 = vsub.s32 32, %v2943_v48  ;;  %v2946_v28 = vshll.u32 %v4418_v38, %v2943_v48  ;;  %v2949_v55 = vshll.u32 %v4419_v40, %v2943_v48  ;;  %v2952_v50 = vshll.u32 %v4420_v42, %v2943_v48 }
  0x90   : > { %v4945_v27 = vshrl.u32 %v2874_v43, 30  ;;  %v3216_v39 = vmul.f32 %v3215_v18, %v3211_v0  ;;  %v3223_v21 = vmul.f32 %v3222_v45, %v3211_v0  ;;  %v2955_v57 = vshll.u32 %v4421_v44, %v2943_v48 }
  0x91   : > { %v2947_v36 = vshrl.u32 %v4419_v40, %v2944_v51  ;;  %v2950_v23 = vshrl.u32 %v4420_v42, %v2944_v51  ;;  %v2953_v60 = vshrl.u32 %v4421_v44, %v2944_v51  ;;  %v4958_v12 = vshrl.u32 %v2941_v41, 5 }
  0x92   : > { %v2876_v34 = vshll.u32 %v4945_v27, 30  ;;  %v3217_v53 = vadd.f32 1.0, %v3216_v39  ;;  %v3224_v30 = vadd.f32 1.0, %v3223_v21  ;;  %v2956_v15 = vshrl.u32 %v4422_v46, %v2944_v51 }
  0x93   : > { %v4961_v54 = vshll.u32 %v2937_v47, 8  ;;  %v2625_v20 = vshrl.u32 %v2624_v52, 23  ;;  %v2948_v0 = vor.u32 %v2947_v36, %v2946_v28  ;;  %v2951_v1 = vor.u32 %v2950_v23, %v2949_v55 }
  0x94   : > { %v4956_v32 = vsub.s32 %v2873_v24, %v2876_v34  ;;  %v3225_v13 = vmul.f32 %v3224_v30, %v3209_v63  ;;  %v3233_v49 = vxor.u32 2147483648, %v3217_v53  ;;  %v2954_v61 = vor.u32 %v2953_v60, %v2952_v50 }
  0x95   : > { %v2957_v4 = vor.u32 %v2956_v15, %v2955_v57  ;;  %v2958_v7 = vshll.u32 %v4422_v46, %v2943_v48  ;;  %v2959_v63 = vshrl.u32 %v4423_v56, %v2944_v51  ;;  %vm2961_vm4 = vcmp.lt.s32.totalorder %v4958_v12, 1 }
  0x96   : > { %vm2878_vm3 = vcmp.lt.s32.totalorder %v4956_v32, 0  ;;  %v2879_v8 = vsub.s32 0, %v4956_v32  ;;  %v3230_v2 = vxor.u32 2147483648, %v3225_v13  ;;  %v3234_v59 = vsel %vm3232_vm1, %v3233_v49, %v3225_v13 }
  0x97   : > { %vm2963_vm5 = vcmp.lt.s32.totalorder %v4958_v12, 3  ;;  %vm2964_vm6 = vcmp.lt.s32.totalorder %v4958_v12, 4  ;;  %vm2962_vm7 = vcmp.lt.s32.totalorder %v4958_v12, 2  ;;  %v2978_v10 = vand.u32 65535, %v4961_v54 }
  0x98   : > { %v2880_v33 = vsel %vm2878_vm3, %v2879_v8, %v4956_v32  ;;  %v3231_v5 = vsel %vm3229_vm15, %v3217_v53, %v3230_v2  ;;  %v2621_v11 = vand.u32 2147483647, %v4942_v31  ;;  %vm2777_vm8 = vcmp.lt.s32.totalorder %v4607_v25, 0 }
  0x99   : > { %v2881_v29 = vclz %v2880_v33  ;;  %v3235_v6 = vsel %vm3228_vm13, %v3231_v5, %v3234_v59  ;;  %v2969_v24 = vsel %vm2961_vm4, %v2948_v0, %v2951_v1  ;;  %v2970_v19 = vsel %vm2964_vm6, %v2957_v4, 920167782 }
  0x9a   : > { %v3236_v26 = vsel %vm3226_vm2, nan, %v3235_v6  ;;  %v2945_v35 = vshrl.u32 %v4418_v38, %v2944_v51  ;;  %v2960_v37 = vor.u32 %v2959_v63, %v2958_v7  ;;  %v2971_v41 = vsel %vm2963_vm5, %v2954_v61, %v2970_v19 }
  0x9b   : > { %v4083_v9 = vadd.s32 4294967294, %v2881_v29  ;;  %v3405_v14 = vadd.f32 1.0, %v3236_v26  ;;  %v2966_v16 = vsel %vm2964_vm6, %v2954_v61, 2102212464  ;;  %v2979_v43 = vshrl.u32 %v4961_v54, 16 }
  0x9c   : > { %v4079_v48 = vadd.s32 4294967169, %v2625_v20  ;;  %v2899_v47 = vsub.s32 4, %v4945_v27  ;;  %v2972_v52 = vsel %vm2962_vm7, %v2969_v24, %v2971_v41  ;;  %v2973_v28 = vsel %vm2961_vm4, %v2951_v1, %v2954_v61 }
  0x9d   : > { %vm4084_vm11 = vcmp.lt.s32.totalorder %v4083_v9, 0  ;;  %v3421_v18 = vmul.f32 0.5, %v3405_v14  ;;  %v2965_v55 = vsel %vm2961_vm4, %v2945_v35, %v2948_v0  ;;  %v2967_v34 = vsel %vm2963_vm5, %v2951_v1, %v2966_v16 }
  0x9e   : > { %v2884_v45 = vsel %vm4084_vm11, 0, %v4083_v9  ;;  %v2974_v36 = vsel %vm2964_vm6, %v2960_v37, 1326507024  ;;  %v3002_v50 = vand.u32 65535, %v2972_v52  ;;  %v3003_v23 = vshrl.u32 %v2972_v52, 16 }
  0x9f   : > { %v2885_v39 = vsub.s32 32, %v2884_v45  ;;  %v2886_v51 = vshll.u32 %v4956_v32, %v2884_v45  ;;  %v2889_v21 = vsub.s32 4294967266, %v2884_v45  ;;  %3495 = vperm.xlu1 %4251, %v3421_v18   ;;  %v2975_v30 = vsel %vm2963_vm5, %v2957_v4, %v2974_v36 }
  0xa0   : > { %v2976_v60 = vsel %vm2962_vm7, %v2973_v28, %v2975_v30  ;;  %v3006_v32 = vmul.u32 %v3002_v50, %v2979_v43  ;;  %v5008_v15 = vand.u32 8388607, %v2621_v11  ;;  %v2631_v13 = vadd.s32 1, %v4079_v48 }
  0xa1   : > { %v2887_v57 = vshrl.u32 %v2869_v62, %v2885_v39  ;;  %v2890_v53 = vadd.s32 127, %v2889_v21  ;;  %vm5012_vm12 = vcmp.le.f32.partialorder %v2775_v58, 0.7853982  ;;  %v2980_v8 = vand.u32 65535, %v2976_v60 }
  0xa2   : > { %v2981_v0 = vshrl.u32 %v2976_v60, 16  ;;  %v5019_v1 = vsel %vm2777_vm8, %v2899_v47, %v4945_v27  ;;  %v5023_v2 = vsel %vm2962_vm7, %v2965_v55, %v2967_v34  ;;  %v3004_v59 = vmul.u32 %v3002_v50, %v2978_v10 }
  0xa3   : > { %v2888_v62 = vor.u32 %v2887_v57, %v2886_v51  ;;  %v2891_v20 = vshll.u32 %v2890_v53, 23  ;;  %v3005_v61 = vmul.u32 %v3003_v23, %v2978_v10  ;;  %v2982_v33 = vmul.u32 %v2980_v8, %v2978_v10 }
  0xa4   : > { %v2983_v7 = vmul.u32 %v2981_v0, %v2978_v10  ;;  %v2984_v63 = vmul.u32 %v2980_v8, %v2979_v43  ;;  %v3007_v5 = vmul.u32 %v3003_v23, %v2979_v43  ;;  %v3010_v6 = vshll.u32 %v3006_v32, 16 }
  0xa5   : > { %v2892_v4 = vor.u32 4788187, %v2891_v20  ;;  %v2895_v58 = vcvt.s32.f32 %v2888_v62  ;;  %v3008_v29 = vshll.u32 %v3005_v61, 16  ;;  %v2985_v9 = vmul.u32 %v2981_v0, %v2979_v43 }
  0xa6   : > { %v2986_v24 = vshll.u32 %v2983_v7, 16  ;;  %v3009_v19 = vshrl.u32 %v3005_v61, 16  ;;  %v2988_v27 = vshll.u32 %v2984_v63, 16  ;;  %vm2632_vm9 = vcmp.gt.s32.totalorder %v2631_v13, 0 }
  0xa7   : > { %v2893_v26 = vand.u32 2147483647, %v2892_v4  ;;  %vm3012_vm14 = vc.u32 %v3004_v59, %v3008_v29  ;;  %v3014_v14 = vadd.s32 %v3008_v29, %v3004_v59  ;;  %v2987_v41 = vshrl.u32 %v2983_v7, 16 }
  0xa8   : > { %vm2990_vm10 = vc.u32 %v2982_v33, %v2986_v24  ;;  %v2992_v35 = vadd.s32 %v2986_v24, %v2982_v33  ;;  %v3013_v37 = vsel %vm3012_vm14, 1, %v4417_v3  ;;  %v3011_v47 = vshrl.u32 %v3006_v32, 16 }
  0xa9   : > { %v2896_v12 = vmul.f32 %v2895_v58, %v2893_v26  ;;  %v2991_v10 = vsel %vm2990_vm10, 1, %v4417_v3  ;;  %v3015_v16 = vadd.s32 %v3013_v37, %v3007_v5  ;;  %vm3016_vm13 = vc.u32 %v3014_v14, %v3010_v6 }
  0xaa   : > { %v2993_v18 = vadd.s32 %v2991_v10, %v2985_v9  ;;  %vm2994_vm15 = vc.u32 %v2992_v35, %v2988_v27  ;;  %v3017_v43 = vsel %vm3016_vm13, 1, %v4417_v3  ;;  %v2633_v39 = vsel %vm2632_vm9, %v2631_v13, 0 }
  0xab   : > { %v2897_v48 = vxor.u32 2147483648, %v2896_v12  ;;  %v2995_v45 = vsel %vm2994_vm15, 1, %v4417_v3  ;;  %v3019_v52 = vadd.s32 %v3017_v43, %v3015_v16  ;;  %v2989_v21 = vshrl.u32 %v2984_v63, 16 }
  0xac   : > { %v2997_v28 = vadd.s32 %v2995_v45, %v2993_v18  ;;  %v2635_v55 = vand.u32 31, %v2633_v39  ;;  %v2629_v50 = vor.u32 8388608, %v5008_v15  ;;  %v5036_v30 = vadd.s32 %v3014_v14, %v3010_v6 }
  0xad   : > { %v2898_v51 = vsel %vm2777_vm8, %v2897_v48, %v2896_v12  ;;  %v3020_v36 = vadd.s32 %v3019_v52, %v3009_v19  ;;  %v2902_v60 = vsel %vm5012_vm12, 0, %v5019_v1  ;;  %v3022_v13 = vmul.u32 %v4961_v54, %v5023_v2 }
  0xae   : > { %v2901_v34 = vsel %vm5012_vm12, %v4607_v25, %v2898_v51  ;;  %v2998_v53 = vadd.s32 %v2997_v28, %v2987_v41  ;;  %v5038_v23 = vsub.s32 32, %v2635_v55  ;;  %v2638_v62 = vshll.u32 %v4418_v38, %v2635_v55 }
  0xaf   : > { %v2903_v57 = vmul.f32 %v2901_v34, %v2901_v34  ;;  %v3021_v32 = vadd.s32 %v3020_v36, %v3011_v47  ;;  %v2641_v15 = vshll.u32 %v4419_v40, %v2635_v55  ;;  %v2644_v1 = vshll.u32 %v4420_v42, %v2635_v55 }
  0xb0   : > { %v5046_v0 = vadd.s32 %v2998_v53, %v2989_v21  ;;  %v2639_v61 = vshrl.u32 %v4419_v40, %v5038_v23  ;;  %v2642_v49 = vshrl.u32 %v4420_v42, %v5038_v23  ;;  %v2645_v54 = vshrl.u32 %v4421_v44, %v5038_v23 }
  0xb1   : > { %v2904_v20 = vmul.f32 -0.001358992, %v2903_v57  ;;  %v2911_v8 = vmul.f32 -0.00019511016, %v2903_v57  ;;  %v3025_v59 = vadd.s32 1, %v3021_v32  ;;  %v2919_v2 = vand.u32 3, %v2902_v60 }
  0xb2   : > { %vm3024_vm1 = vc.u32 %v5046_v0, %v5036_v30  ;;  %v5058_v7 = vshrl.u32 %v2633_v39, 5  ;;  %v2647_v63 = vshll.u32 %v4421_v44, %v2635_v55  ;;  %v5061_v26 = vor.u32 %v2639_v61, %v2638_v62 }
  0xb3   : > { %v2905_v4 = vadd.f32 0.041655596, %v2904_v20  ;;  %v2912_v58 = vadd.f32 0.008332121, %v2911_v8  ;;  %v3026_v33 = vsel %vm3024_vm1, %v3025_v59, %v3021_v32  ;;  %v5063_v9 = vor.u32 %v2642_v49, %v2641_v15 }
  0xb4   : > { %v3027_v6 = vadd.s32 %v3026_v33, %v3022_v13  ;;  %v2648_v24 = vshrl.u32 %v4422_v46, %v5038_v23  ;;  %v2650_v19 = vshll.u32 %v4422_v46, %v2635_v55  ;;  %v2651_v27 = vshrl.u32 %v4423_v56, %v5038_v23 }
  0xb5   : > { %v2906_v5 = vmul.f32 %v2905_v4, %v2903_v57  ;;  %v2913_v29 = vmul.f32 %v2912_v58, %v2903_v57  ;;  %v5070_v37 = vor.u32 %v2645_v54, %v2644_v1  ;;  %vm2653_vm2 = vcmp.lt.s32.totalorder %v5058_v7, 1 }
  0xb6   : > { %v3028_v35 = vadd.s32 536870912, %v3027_v6  ;;  %v2649_v41 = vor.u32 %v2648_v24, %v2647_v63  ;;  %v2652_v10 = vor.u32 %v2651_v27, %v2650_v19  ;;  %vm2655_vm3 = vcmp.lt.s32.totalorder %v5058_v7, 3 }
  0xb7   : > { %v2907_v14 = vadd.f32 -0.4999988, %v2906_v5  ;;  %v2914_v12 = vadd.f32 -0.16666654, %v2913_v29  ;;  %vm2656_vm4 = vcmp.lt.s32.totalorder %v5058_v7, 4  ;;  %vm2920_vm5 = vcmp.lt.s32.totalorder %v2919_v2, 2 }
  0xb8   : > { %v5074_v18 = vshrl.u32 %v3028_v35, 30  ;;  %vm2654_vm6 = vcmp.lt.s32.totalorder %v5058_v7, 2  ;;  %v2662_v43 = vsel %vm2656_vm4, %v2649_v41, 920167782  ;;  %v5080_v45 = vshll.u32 %v2629_v50, 8 }
  0xb9   : > { %v2908_v16 = vmul.f32 %v2907_v14, %v2903_v57  ;;  %v2915_v48 = vmul.f32 %v2914_v12, %v2903_v57  ;;  %v2661_v51 = vsel %vm2653_vm2, %v5061_v26, %v5063_v9  ;;  %vm2921_vm7 = vcmp.eq.s32.totalorder %v2919_v2, 0 }
  0xba   : > { %v3030_v39 = vshll.u32 %v5074_v18, 30  ;;  %vm2924_vm8 = vcmp.eq.s32.totalorder %v2919_v2, 2  ;;  %v2663_v21 = vsel %vm2655_vm3, %v5070_v37, %v2662_v43  ;;  %v2666_v28 = vsel %vm2656_vm4, %v2652_v10, 1326507024 }
  0xbb   : > { %v2909_v47 = vadd.f32 1.0, %v2908_v16  ;;  %v2916_v52 = vadd.f32 1.0, %v2915_v48  ;;  %v2665_v57 = vsel %vm2653_vm2, %v5063_v9, %v5070_v37  ;;  %v2664_v53 = vsel %vm2654_vm6, %v2661_v51, %v2663_v21 }
  0xbc   : > { %v3031_v50 = vsub.s32 %v3027_v6, %v3030_v39  ;;  %v2667_v60 = vsel %vm2655_vm3, %v2649_v41, %v2666_v28  ;;  %v2670_v32 = vand.u32 65535, %v5080_v45  ;;  %v2671_v13 = vshrl.u32 %v5080_v45, 16  ;;  %v905_v39 = vld [vmem:[%s4562_s25 + $0x50] sm:$0xff] }
  0xbd   : > { %v2917_v55 = vmul.f32 %v2916_v52, %v2901_v34  ;;  %v2925_v36 = vxor.u32 2147483648, %v2909_v47  ;;  %vm2918_vm12 = vweird.f32 %v4607_v25  ;;  %v2668_v8 = vsel %vm2654_vm6, %v2665_v57, %v2667_v60 }
  0xbe   : > { %vm3032_vm11 = vcmp.lt.s32.totalorder %v3031_v50, 0  ;;  %v3033_v34 = vsub.s32 0, %v3031_v50  ;;  %v2672_v61 = vand.u32 65535, %v2668_v8  ;;  %v2673_v49 = vshrl.u32 %v2668_v8, 16 }
  0xbf   : > { %v2922_v62 = vxor.u32 2147483648, %v2917_v55  ;;  %v2926_v20 = vsel %vm2924_vm8, %v2925_v36, %v2917_v55  ;;  %v2694_v58 = vand.u32 65535, %v2664_v53  ;;  %v2695_v54 = vshrl.u32 %v2664_v53, 16 }
  0xc0   : > { %v3034_v59 = vsel %vm3032_vm11, %v3033_v34, %v3031_v50  ;;  %v2674_v63 = vmul.u32 %v2672_v61, %v2670_v32  ;;  %v2675_v5 = vmul.u32 %v2673_v49, %v2670_v32  ;;  %v2676_v29 = vmul.u32 %v2672_v61, %v2671_v13 }
  0xc1   : > { %v2923_v15 = vsel %vm2921_vm7, %v2909_v47, %v2922_v62  ;;  %v3035_v4 = vclz %v3034_v59  ;;  %v3023_v25 = vadd.s32 %v5036_v30, %v5046_v0  ;;  %v2677_v12 = vmul.u32 %v2673_v49, %v2671_v13 }
  0xc2   : > { %v2927_v1 = vsel %vm2920_vm5, %v2923_v15, %v2926_v20  ;;  %v2678_v19 = vshll.u32 %v2675_v5, 16  ;;  %v2680_v27 = vshll.u32 %v2676_v29, 16  ;;  %v2697_v2 = vmul.u32 %v2695_v54, %v2670_v32 }
  0xc3   : > { %v2928_v33 = vsel %vm2918_vm12, nan, %v2927_v1  ;;  %v4086_v24 = vadd.s32 4294967294, %v3035_v4  ;;  %v2698_v10 = vmul.u32 %v2694_v58, %v2671_v13  ;;  %vm2931_vm10 = vcmp.lt.s32.totalorder %v4855_v17, 0 }
  0xc4   : > { %v3403_v6 = vadd.f32 1.0, %v2928_v33  ;;  %vm2682_vm9 = vc.u32 %v2674_v63, %v2678_v19  ;;  %v2684_v41 = vadd.s32 %v2678_v19, %v2674_v63  ;;  %v2637_v30 = vshrl.u32 %v4418_v38, %v5038_v23 }
  0xc5   : > { %vm4087_vm14 = vcmp.lt.s32.totalorder %v4086_v24, 0  ;;  %v2679_v0 = vshrl.u32 %v2675_v5, 16  ;;  %v2683_v47 = vsel %vm2682_vm9, 1, %v4417_v3  ;;  %v2696_v52 = vmul.u32 %v2694_v58, %v2670_v32 }
  0xc6   : > { %v3419_v14 = vmul.f32 0.5, %v3403_v6  ;;  %v3038_v35 = vsel %vm4087_vm14, 0, %v4086_v24  ;;  %vm2686_vm13 = vc.u32 %v2684_v41, %v2680_v27  ;;  %v2685_v28 = vadd.s32 %v2683_v47, %v2677_v12 }
  0xc7   : > { %v3039_v16 = vsub.s32 32, %v3038_v35  ;;  %v3040_v48 = vshll.u32 %v3031_v50, %v3038_v35  ;;  %v3043_v43 = vsub.s32 4294967266, %v3038_v35  ;;  %v2687_v55 = vsel %vm2686_vm13, 1, %v4417_v3 }
  0xc8   : > { %3485 = vperm.xlu0 %4250, %v3419_v14   ;;  %v2658_v36 = vsel %vm2656_vm4, %v5070_v37, 2102212464  ;;  %v2699_v50 = vmul.u32 %v2695_v54, %v2671_v13  ;;  %v2700_v57 = vshll.u32 %v2697_v2, 16  ;;  %v2702_v53 = vshll.u32 %v2698_v10, 16 }
  0xc9   : > { %v3041_v51 = vshrl.u32 %v3023_v25, %v3039_v16  ;;  %v3044_v21 = vadd.s32 127, %v3043_v43  ;;  %v2689_v62 = vadd.s32 %v2687_v55, %v2685_v28  ;;  %v5118_v20 = vmul.f32 0.62831855, %v905_v39 }
  0xca   : > { %v3053_v32 = vsub.s32 4, %v5074_v18  ;;  %v2681_v34 = vshrl.u32 %v2676_v29, 16  ;;  %vm2704_vm15 = vc.u32 %v2696_v52, %v2700_v57  ;;  %v2706_v8 = vadd.s32 %v2700_v57, %v2696_v52 }
  0xcb   : > { %v3042_v60 = vor.u32 %v3041_v51, %v3040_v48  ;;  %v3045_v23 = vshll.u32 %v3044_v21, 23  ;;  %v2690_v61 = vadd.s32 %v2689_v62, %v2679_v0  ;;  %v2705_v49 = vsel %vm2704_vm15, 1, %v4417_v3 }
  0xcc   : > { %v2657_v37 = vsel %vm2653_vm2, %v2637_v30, %v5061_v26  ;;  %v2701_v13 = vshrl.u32 %v2697_v2, 16  ;;  %v2707_v1 = vadd.s32 %v2705_v49, %v2699_v50  ;;  %vm2708_vm1 = vc.u32 %v2706_v8, %v2702_v53  ;;  %v904_v2 = vld [vmem:[%s4562_s25 + $0x48] sm:$0xff] }
  0xcd   : > { %v3046_v15 = vor.u32 4788187, %v3045_v23  ;;  %v3049_v59 = vcvt.s32.f32 %v3042_v60  ;;  %v2659_v58 = vsel %vm2655_vm3, %v5063_v9, %v2658_v36  ;;  %v2709_v54 = vsel %vm2708_vm1, 1, %v4417_v3 }
  0xce   : > { %v2470_v33 = vand.u32 2139095040, %v5118_v20  ;;  %v3054_v63 = vsel %vm2931_vm10, %v3053_v32, %v5074_v18  ;;  %v2703_v5 = vshrl.u32 %v2698_v10, 16  ;;  %v2711_v29 = vadd.s32 %v2709_v54, %v2707_v1 }
  0xcf   : > { %v3047_v4 = vand.u32 2147483647, %v3046_v15  ;;  %v5133_v6 = vadd.s32 %v2690_v61, %v2681_v34  ;;  %v5135_v24 = vadd.s32 %v2706_v8, %v2702_v53  ;;  %vm5139_vm2 = vcmp.le.f32.partialorder %v2929_v22, 0.7853982 }
  0xd0   : > { %v2471_v25 = vshrl.u32 %v2470_v33, 23  ;;  %v2660_v19 = vsel %vm2654_vm6, %v2657_v37, %v2659_v58  ;;  %v2712_v27 = vadd.s32 %v2711_v29, %v2701_v13  ;;  %v2467_v18 = vand.u32 2147483647, %v5118_v20 }
  0xd1   : > { %v3050_v26 = vmul.f32 %v3049_v59, %v3047_v4  ;;  %v3056_v35 = vsel %vm5139_vm2, 0, %v3054_v63  ;;  %v2714_v22 = vmul.u32 %v5080_v45, %v2660_v19  ;;  %vm2716_vm3 = vc.u32 %v5133_v6, %v5135_v24 }
  0xd2   : > { %v4076_v12 = vadd.s32 4294967169, %v2471_v25  ;;  %v2713_v41 = vadd.s32 %v2712_v27, %v2703_v5  ;;  %v5157_v43 = vmul.f32 0.62831855, %v904_v2  ;;  %v2474_v0 = vand.u32 8388607, %v2467_v18 }
  0xd3   : > { %v3051_v14 = vxor.u32 2147483648, %v3050_v26  ;;  %v5161_v47 = vand.u32 3, %v3056_v35  ;;  %vm3072_vm7 = vweird.f32 %v4855_v17  ;;  %vm2623_vm13 = vcmp.lt.s32.totalorder %v4942_v31, 0 }
  0xd4   : > { %v2477_v7 = vadd.s32 1, %v4076_v12  ;;  %v2717_v48 = vadd.s32 1, %v2713_v41  ;;  %v2316_v55 = vand.u32 2139095040, %v5157_v43  ;;  %v2475_v53 = vor.u32 8388608, %v2474_v0 }
  0xd5   : > { %v3052_v10 = vsel %vm2931_vm10, %v3051_v14, %v3050_v26  ;;  %vm3078_vm5 = vcmp.eq.s32.totalorder %v5161_v47, 2  ;;  %vm3074_vm6 = vcmp.lt.s32.totalorder %v5161_v47, 2  ;;  %vm3075_vm10 = vcmp.eq.s32.totalorder %v5161_v47, 0 }
  0xd6   : > { %v3055_v16 = vsel %vm5139_vm2, %v4855_v17, %v3052_v10  ;;  %vm2478_vm4 = vcmp.gt.s32.totalorder %v2477_v7, 0  ;;  %v2718_v52 = vsel %vm2716_vm3, %v2717_v48, %v2713_v41  ;;  %v2317_v54 = vshrl.u32 %v2316_v55, 23 }
  0xd7   : > { %v3057_v30 = vmul.f32 %v3055_v16, %v3055_v16  ;;  %v2479_v45 = vsel %vm2478_vm4, %v2477_v7, 0  ;;  %v2719_v21 = vadd.s32 %v2718_v52, %v2714_v22  ;;  %v5189_v5 = vshll.u32 %v2475_v53, 8 }
  0xd8   : > { %v2481_v28 = vand.u32 31, %v2479_v45  ;;  %v5165_v60 = vshrl.u32 %v2479_v45, 5  ;;  %v4073_v22 = vadd.s32 4294967169, %v2317_v54  ;;  %v2313_v54 = vand.u32 2147483647, %v5157_v43 }
  0xd9   : > { %v3058_v39 = vmul.f32 -0.001358992, %v3057_v30  ;;  %v3065_v51 = vmul.f32 -0.00019511016, %v3057_v30  ;;  %v2720_v57 = vadd.s32 536870912, %v2719_v21 }
  0xda   : > { %v5167_v23 = vsub.s32 32, %v2481_v28  ;;  %v2484_v62 = vshll.u32 %v4418_v38, %v2481_v28  ;;  %v2487_v32 = vshll.u32 %v4419_v40, %v2481_v28  ;;  %v2490_v59 = vshll.u32 %v4420_v42, %v2481_v28 }
  0xdb   : > { %v3059_v36 = vadd.f32 0.041655596, %v3058_v39  ;;  %v3066_v50 = vadd.f32 0.008332121, %v3065_v51  ;;  %v5171_v15 = vshrl.u32 %v2720_v57, 30  ;;  %v2493_v13 = vshll.u32 %v4421_v44, %v2481_v28 }
  0xdc   : > { %v2485_v61 = vshrl.u32 %v4419_v40, %v5167_v23  ;;  %v2488_v49 = vshrl.u32 %v4420_v42, %v5167_v23  ;;  %v2491_v37 = vshrl.u32 %v4421_v44, %v5167_v23  ;;  %v2494_v63 = vshrl.u32 %v4422_v46, %v5167_v23 }
  0xdd   : > { %v3060_v34 = vmul.f32 %v3059_v36, %v3057_v30  ;;  %v3067_v8 = vmul.f32 %v3066_v50, %v3057_v30  ;;  %v2722_v58 = vshll.u32 %v5171_v15, 30  ;;  %vm2499_vm8 = vcmp.lt.s32.totalorder %v5165_v60, 1 }
  0xde   : > { %v5184_v33 = vor.u32 %v2485_v61, %v2484_v62  ;;  %v5191_v9 = vor.u32 %v2488_v49, %v2487_v32  ;;  %v5193_v19 = vor.u32 %v2491_v37, %v2490_v59  ;;  %v2495_v27 = vor.u32 %v2494_v63, %v2493_v13 }
  0xdf   : > { %v3061_v1 = vadd.f32 -0.4999988, %v3060_v34  ;;  %v3068_v4 = vadd.f32 -0.16666654, %v3067_v8  ;;  %v2723_v25 = vsub.s32 %v2719_v21, %v2722_v58  ;;  %v2496_v14 = vshll.u32 %v4422_v46, %v2481_v28 }
  0xe0   : > { %v2497_v12 = vshrl.u32 %v4423_v56, %v5167_v23  ;;  %vm2501_vm12 = vcmp.lt.s32.totalorder %v5165_v60, 3  ;;  %vm2502_vm14 = vcmp.lt.s32.totalorder %v5165_v60, 4  ;;  %vm2500_vm9 = vcmp.lt.s32.totalorder %v5165_v60, 2 }
  0xe1   : > { %v3062_v29 = vmul.f32 %v3061_v1, %v3057_v30  ;;  %v3069_v26 = vmul.f32 %v3068_v4, %v3057_v30  ;;  %vm2724_vm11 = vcmp.lt.s32.totalorder %v2723_v25, 0  ;;  %v2725_v41 = vsub.s32 0, %v2723_v25 }
  0xe2   : > { %v2498_v10 = vor.u32 %v2497_v12, %v2496_v14  ;;  %v2507_v52 = vsel %vm2499_vm8, %v5184_v33, %v5191_v9  ;;  %v2508_v45 = vsel %vm2502_vm14, %v2495_v27, 920167782  ;;  %v2715_v51 = vadd.s32 %v5135_v24, %v5133_v6 }
  0xe3   : > { %v3063_v2 = vadd.f32 1.0, %v3062_v29  ;;  %v3070_v35 = vadd.f32 1.0, %v3069_v26  ;;  %v2726_v30 = vsel %vm2724_vm11, %v2725_v41, %v2723_v25  ;;  %v2509_v21 = vsel %vm2501_vm12, %v5193_v19, %v2508_v45 }
  0xe4   : > { %v2727_v0 = vclz %v2726_v30  ;;  %v2510_v55 = vsel %vm2500_vm9, %v2507_v52, %v2509_v21  ;;  %v2516_v36 = vand.u32 65535, %v5189_v5  ;;  %v2517_v50 = vshrl.u32 %v5189_v5, 16 }
  0xe5   : > { %v3071_v7 = vmul.f32 %v3070_v35, %v3055_v16  ;;  %v3079_v48 = vxor.u32 2147483648, %v3063_v2  ;;  %v2745_v53 = vsub.s32 4, %v5171_v15  ;;  %v2512_v62 = vsel %vm2502_vm14, %v2498_v10, 1326507024 }
  0xe6   : > { %v4080_v28 = vadd.s32 4294967294, %v2727_v0  ;;  %v2323_v32 = vadd.s32 1, %v4073_v22  ;;  %v2511_v24 = vsel %vm2499_vm8, %v5191_v9, %v5193_v19  ;;  %v2540_v34 = vand.u32 65535, %v2510_v55 }
  0xe7   : > { %v3076_v39 = vxor.u32 2147483648, %v3071_v7  ;;  %v3080_v16 = vsel %vm3078_vm5, %v3079_v48, %v3071_v7  ;;  %v2513_v61 = vsel %vm2501_vm12, %v2495_v27, %v2512_v62  ;;  %v2541_v49 = vshrl.u32 %v2510_v55, 16 }
  0xe8   : > { %vm4081_vm15 = vcmp.lt.s32.totalorder %v4080_v28, 0  ;;  %v2483_v4 = vshrl.u32 %v4418_v38, %v5167_v23  ;;  %v2514_v58 = vsel %vm2500_vm9, %v2511_v24, %v2513_v61  ;;  %vm2324_vm1 = vcmp.gt.s32.totalorder %v2323_v32, 0 }
  0xe9   : > { %v3077_v57 = vsel %vm3075_vm10, %v3063_v2, %v3076_v39  ;;  %v2730_v59 = vsel %vm4081_vm15, 0, %v4080_v28  ;;  %v2518_v26 = vand.u32 65535, %v2514_v58  ;;  %v5241_v27 = vsel %vm2623_vm13, %v2745_v53, %v5171_v15 }
  0xea   : > { %v3081_v6 = vsel %vm3074_vm6, %v3077_v57, %v3080_v16  ;;  %v2731_v13 = vsub.s32 32, %v2730_v59  ;;  %v2732_v1 = vshll.u32 %v2723_v25, %v2730_v59  ;;  %v2735_v47 = vsub.s32 4294967266, %v2730_v59 }
  0xeb   : > { %v3082_v8 = vsel %vm3072_vm7, nan, %v3081_v6  ;;  %v2519_v25 = vshrl.u32 %v2514_v58, 16  ;;  %v2543_v14 = vmul.u32 %v2541_v49, %v2516_v36  ;;  %v2544_v12 = vmul.u32 %v2540_v34, %v2517_v50 }
  0xec   : > { %v3404_v37 = vadd.f32 1.0, %v3082_v8  ;;  %v2733_v63 = vshrl.u32 %v2715_v51, %v2731_v13  ;;  %v2736_v29 = vadd.s32 127, %v2735_v47  ;;  %vm5245_vm2 = vcmp.le.f32.partialorder %v2621_v11, 0.7853982 }
  0xed   : > { %v2522_v41 = vmul.u32 %v2518_v26, %v2517_v50  ;;  %v2542_v10 = vmul.u32 %v2540_v34, %v2516_v36  ;;  %v2504_v22 = vsel %vm2502_vm14, %v5193_v19, 2102212464  ;;  %v2520_v15 = vmul.u32 %v2518_v26, %v2516_v36 }
  0xee   : > { %v3420_v17 = vmul.f32 0.5, %v3404_v37  ;;  %v2734_v2 = vor.u32 %v2733_v63, %v2732_v1  ;;  %v2737_v35 = vshll.u32 %v2736_v29, 23  ;;  %v2521_v7 = vmul.u32 %v2519_v25, %v2516_v36 }
  0xef   : > { %v2546_v48 = vshll.u32 %v2543_v14, 16  ;;  %v2503_v11 = vsel %vm2499_vm8, %v2483_v4, %v5184_v33  ;;  %v2545_v52 = vmul.u32 %v2541_v49, %v2517_v50  ;;  %v2523_v45 = vmul.u32 %v2519_v25, %v2517_v50 }
  0xf0   : > { %3490 = vperm.xlu1 %4251, %v3420_v17   ;;  %v2738_v30 = vor.u32 4788187, %v2737_v35  ;;  %v2741_v0 = vcvt.s32.f32 %v2734_v2  ;;  %v2524_v39 = vshll.u32 %v2521_v7, 16  ;;  %v2526_v16 = vshll.u32 %v2522_v41, 16 }
  0xf1   : > { %v2548_v51 = vshll.u32 %v2544_v12, 16  ;;  %v2505_v28 = vsel %vm2501_vm12, %v5191_v9, %v2504_v22  ;;  %vm2550_vm3 = vc.u32 %v2542_v10, %v2546_v48  ;;  %v2552_v19 = vadd.s32 %v2546_v48, %v2542_v10 }
  0xf2   : > { %v2739_v21 = vand.u32 2147483647, %v2738_v30  ;;  %v2525_v55 = vshrl.u32 %v2521_v7, 16  ;;  %vm2528_vm4 = vc.u32 %v2520_v15, %v2524_v39  ;;  %v2530_v36 = vadd.s32 %v2524_v39, %v2520_v15 }
  0xf3   : > { %v2547_v57 = vshrl.u32 %v2543_v14, 16  ;;  %v2529_v62 = vsel %vm2528_vm4, 1, %v4417_v3  ;;  %v2551_v33 = vsel %vm2550_vm3, 1, %v4417_v3  ;;  %vm2554_vm5 = vc.u32 %v2552_v19, %v2548_v51 }
  0xf4   : > { %v2742_v53 = vmul.f32 %v2741_v0, %v2739_v21  ;;  %v2531_v50 = vadd.s32 %v2529_v62, %v2523_v45  ;;  %vm2532_vm6 = vc.u32 %v2530_v36, %v2526_v16  ;;  %v2553_v6 = vadd.s32 %v2551_v33, %v2545_v52 }
  0xf5   : > { %v2555_v24 = vsel %vm2554_vm5, 1, %v4417_v3  ;;  %v2527_v8 = vshrl.u32 %v2522_v41, 16  ;;  %v2533_v9 = vsel %vm2532_vm6, 1, %v4417_v3  ;;  %v2325_v59 = vsel %vm2324_vm1, %v2323_v32, 0 }
  0xf6   : > { %v2743_v34 = vxor.u32 2147483648, %v2742_v53  ;;  %v2535_v61 = vadd.s32 %v2533_v9, %v2531_v50  ;;  %v2549_v49 = vshrl.u32 %v2544_v12, 16  ;;  %v2557_v37 = vadd.s32 %v2555_v24, %v2553_v6 }
  0xf7   : > { %v2327_v13 = vand.u32 31, %v2325_v59  ;;  %v2506_v47 = vsel %vm2500_vm9, %v2503_v11, %v2505_v28  ;;  %v5267_v4 = vadd.s32 %v2552_v19, %v2548_v51  ;;  %v2748_v32 = vsel %vm5245_vm2, 0, %v5241_v27 }
  0xf8   : > { %v2744_v1 = vsel %vm2623_vm13, %v2743_v34, %v2742_v53  ;;  %v2536_v17 = vadd.s32 %v2535_v61, %v2525_v55  ;;  %v2558_v63 = vadd.s32 %v2557_v37, %v2547_v57  ;;  %v2320_v25 = vand.u32 8388607, %v2313_v54 }
  0xf9   : > { %v2747_v58 = vsel %vm5245_vm2, %v4942_v31, %v2744_v1  ;;  %v5272_v29 = vsub.s32 32, %v2327_v13  ;;  %v2560_v12 = vmul.u32 %v5189_v5, %v2506_v47  ;;  %v5282_v2 = vshrl.u32 %v2325_v59, 5 }
  0xfa   : > { %v2749_v26 = vmul.f32 %v2747_v58, %v2747_v58  ;;  %v5279_v60 = vadd.s32 %v2536_v17, %v2527_v8  ;;  %v2559_v14 = vadd.s32 %v2558_v63, %v2549_v49  ;;  %v2330_v10 = vshll.u32 %v4418_v38, %v2327_v13 }
  0xfb   : > { %v2333_v22 = vshll.u32 %v4419_v40, %v2327_v13  ;;  %v2331_v23 = vshrl.u32 %v4419_v40, %v5272_v29  ;;  %v2334_v15 = vshrl.u32 %v4420_v42, %v5272_v29  ;;  %v2336_v48 = vshll.u32 %v4420_v42, %v2327_v13 }
  0xfc   : > { %v2750_v35 = vmul.f32 -0.001358992, %v2749_v26  ;;  %v2757_v41 = vmul.f32 -0.00019511016, %v2749_v26  ;;  %vm2562_vm7 = vc.u32 %v5279_v60, %v5267_v4  ;;  %v2563_v27 = vadd.s32 1, %v2559_v14 }
  0xfd   : > { %v2337_v30 = vshrl.u32 %v4421_v44, %v5272_v29  ;;  %v2339_v11 = vshll.u32 %v4421_v44, %v2327_v13  ;;  %v2340_v52 = vshrl.u32 %v4422_v46, %v5272_v29  ;;  %v2342_v45 = vshll.u32 %v4422_v46, %v2327_v13 }
  0xfe   : > { %v2751_v7 = vadd.f32 0.041655596, %v2750_v35  ;;  %v2758_v5 = vadd.f32 0.008332121, %v2757_v41  ;;  %v2564_v0 = vsel %vm2562_vm7, %v2563_v27, %v2559_v14  ;;  %v2343_v21 = vshrl.u32 %v4423_v56, %v5272_v29 }
  0xff   : > { %v2565_v51 = vadd.s32 %v2564_v0, %v2560_v12  ;;  %v2321_v28 = vor.u32 8388608, %v2320_v25  ;;  %v2332_v19 = vor.u32 %v2331_v23, %v2330_v10  ;;  %v5301_v55 = vor.u32 %v2334_v15, %v2333_v22 }
 0x100   : > { %v2752_v39 = vmul.f32 %v2751_v7, %v2749_v26  ;;  %v2759_v16 = vmul.f32 %v2758_v5, %v2749_v26  ;;  %v2341_v36 = vor.u32 %v2340_v52, %v2339_v11  ;;  %v2344_v33 = vor.u32 %v2343_v21, %v2342_v45 }
 0x101   : > { %v2566_v62 = vadd.s32 536870912, %v2565_v51  ;;  %v2765_v50 = vand.u32 3, %v2748_v32  ;;  %v5303_v6 = vor.u32 %v2337_v30, %v2336_v48  ;;  %vm2345_vm8 = vcmp.lt.s32.totalorder %v5282_v2, 1  ;;  %v903_v48 = vld [vmem:[%s4562_s25 + $0x40] sm:$0xff] }
 0x102   : > { %v2753_v57 = vadd.f32 -0.4999988, %v2752_v39  ;;  %v2760_v53 = vadd.f32 -0.16666654, %v2759_v16  ;;  %vm2348_vm11 = vcmp.lt.s32.totalorder %v5282_v2, 4  ;;  %vm2347_vm12 = vcmp.lt.s32.totalorder %v5282_v2, 3 }
 0x103   : > { %v5307_v8 = vshrl.u32 %v2566_v62, 30  ;;  %vm2346_vm14 = vcmp.lt.s32.totalorder %v5282_v2, 2  ;;  %v2354_v9 = vsel %vm2348_vm11, %v2341_v36, 920167782  ;;  %v2358_v59 = vsel %vm2348_vm11, %v2344_v33, 1326507024 }
 0x104   : > { %v2754_v24 = vmul.f32 %v2753_v57, %v2749_v26  ;;  %v2761_v34 = vmul.f32 %v2760_v53, %v2749_v26  ;;  %v5315_v61 = vshll.u32 %v2321_v28, 8  ;;  %v2353_v1 = vsel %vm2345_vm8, %v2332_v19, %v5301_v55 }
 0x105   : > { %v2568_v13 = vshll.u32 %v5307_v8, 30  ;;  %vm2766_vm9 = vcmp.lt.s32.totalorder %v2765_v50, 2  ;;  %vm2770_vm10 = vcmp.eq.s32.totalorder %v2765_v50, 2  ;;  %v2355_v47 = vsel %vm2347_vm12, %v5303_v6, %v2354_v9 }
 0x106   : > { %v2755_v49 = vadd.f32 1.0, %v2754_v24  ;;  %v2762_v37 = vadd.f32 1.0, %v2761_v34  ;;  %v2357_v17 = vsel %vm2345_vm8, %v5301_v55, %v5303_v6  ;;  %v2359_v25 = vsel %vm2347_vm12, %v2341_v36, %v2358_v59 }
 0x107   : > { %v2569_v26 = vsub.s32 %v2565_v51, %v2568_v13  ;;  %vm2767_vm13 = vcmp.eq.s32.totalorder %v2765_v50, 0  ;;  %v2356_v14 = vsel %vm2346_vm14, %v2353_v1, %v2355_v47  ;;  %v2362_v12 = vand.u32 65535, %v5315_v61 }
 0x108   : > { %v2763_v63 = vmul.f32 %v2762_v37, %v2747_v58  ;;  %v2771_v32 = vxor.u32 2147483648, %v2755_v49  ;;  %v2363_v35 = vshrl.u32 %v5315_v61, 16  ;;  %vm2764_vm1 = vweird.f32 %v4942_v31 }
 0x109   : > { %vm2570_vm15 = vcmp.lt.s32.totalorder %v2569_v26, 0  ;;  %v2571_v22 = vsub.s32 0, %v2569_v26  ;;  %v2329_v58 = vshrl.u32 %v4418_v38, %v5272_v29  ;;  %v2360_v27 = vsel %vm2346_vm14, %v2357_v17, %v2359_v25 }
 0x10a   : > { %v2768_v41 = vxor.u32 2147483648, %v2763_v63  ;;  %v2772_v10 = vsel %vm2770_vm10, %v2771_v32, %v2763_v63  ;;  %v2364_v7 = vand.u32 65535, %v2360_v27  ;;  %v2365_v5 = vshrl.u32 %v2360_v27, 16 }
 0x10b   : > { %v2572_v15 = vsel %vm2570_vm15, %v2571_v22, %v2569_v26  ;;  %v2386_v11 = vand.u32 65535, %v2356_v14  ;;  %v2387_v52 = vshrl.u32 %v2356_v14, 16  ;;  %v5341_v29 = vmul.f32 0.62831855, %v903_v48 }
 0x10c   : > { %v2769_v23 = vsel %vm2767_vm13, %v2755_v49, %v2768_v41  ;;  %v2573_v0 = vclz %v2572_v15  ;;  %v2366_v39 = vmul.u32 %v2364_v7, %v2362_v12  ;;  %v2367_v16 = vmul.u32 %v2365_v5, %v2362_v12 }
 0x10d   : > { %v2773_v30 = vsel %vm2766_vm9, %v2769_v23, %v2772_v10  ;;  %v2368_v31 = vmul.u32 %v2364_v7, %v2363_v35  ;;  %v2561_v28 = vadd.s32 %v5267_v4, %v5279_v60  ;;  %v2349_v36 = vsel %vm2345_vm8, %v2329_v58, %v2332_v19 }
 0x10e   : > { %v2774_v45 = vsel %vm2764_vm1, nan, %v2773_v30  ;;  %v4077_v21 = vadd.s32 4294967294, %v2573_v0  ;;  %v2370_v57 = vshll.u32 %v2367_v16, 16  ;;  %v2369_v33 = vmul.u32 %v2365_v5, %v2363_v35 }
 0x10f   : > { %v3402_v51 = vadd.f32 1.0, %v2774_v45  ;;  %v2372_v53 = vshll.u32 %v2368_v31, 16  ;;  %v2389_v50 = vmul.u32 %v2387_v52, %v2362_v12  ;;  %v2390_v9 = vmul.u32 %v2386_v11, %v2363_v35 }
 0x110   : > { %vm4078_vm2 = vcmp.lt.s32.totalorder %v4077_v21, 0  ;;  %vm2374_vm3 = vc.u32 %v2366_v39, %v2370_v57  ;;  %v2376_v34 = vadd.s32 %v2370_v57, %v2366_v39  ;;  %v2350_v4 = vsel %vm2348_vm11, %v5303_v6, 2102212464 }
 0x111   : > { %v3418_v62 = vmul.f32 0.5, %v3402_v51  ;;  %v2576_v24 = vsel %vm4078_vm2, 0, %v4077_v21  ;;  %v2371_v60 = vshrl.u32 %v2367_v16, 16  ;;  %v2375_v19 = vsel %vm2374_vm3, 1, %v4417_v3 }
 0x112   : > { %v2577_v59 = vsub.s32 32, %v2576_v24  ;;  %v2578_v49 = vshll.u32 %v2569_v26, %v2576_v24  ;;  %v2581_v37 = vsub.s32 4294967266, %v2576_v24  ;;  %vm2378_vm4 = vc.u32 %v2376_v34, %v2372_v53  ;;  %v901_v34 = vld [vmem:[%s4562_s25 + $0x30] sm:$0xff] }
 0x113   : > { %3480 = vperm.xlu0 %4250, %v3418_v62   ;;  %v2388_v13 = vmul.u32 %v2386_v11, %v2362_v12  ;;  %v2377_v17 = vadd.s32 %v2375_v19, %v2369_v33  ;;  %v2379_v63 = vsel %vm2378_vm4, 1, %v4417_v3  ;;  %v2351_v32 = vsel %vm2347_vm12, %v5301_v55, %v2350_v4  ;;  %v4146_v11 = vld [vmem:[%s4557_s19 + $0x38] sm:$0xff] }
 0x114   : > { %v2579_v1 = vshrl.u32 %v2561_v28, %v2577_v59  ;;  %v2582_v47 = vadd.s32 127, %v2581_v37  ;;  %v2391_v26 = vmul.u32 %v2387_v52, %v2363_v35  ;;  %v2392_v25 = vshll.u32 %v2389_v50, 16  ;;  %3997 = vmatmul.msk.bf16.gmra.mxu0 %vm536_vm0, %v4146_v11 }
 0x115   : > { %v2394_v14 = vshll.u32 %v2390_v9, 16  ;;  %v2591_v6 = vsub.s32 4, %v5307_v8  ;;  %v2381_v22 = vadd.s32 %v2379_v63, %v2377_v17  ;;  %v2373_v58 = vshrl.u32 %v2368_v31, 16 }
 0x116   : > { %v2580_v41 = vor.u32 %v2579_v1, %v2578_v49  ;;  %v2583_v10 = vshll.u32 %v2582_v47, 23  ;;  %vm2396_vm5 = vc.u32 %v2388_v13, %v2392_v25  ;;  %v2398_v12 = vadd.s32 %v2392_v25, %v2388_v13 }
 0x117   : > { %v2162_v27 = vand.u32 2139095040, %v5341_v29  ;;  %v2382_v7 = vadd.s32 %v2381_v22, %v2371_v60  ;;  %v2397_v5 = vsel %vm2396_vm5, 1, %v4417_v3  ;;  %v2393_v55 = vshrl.u32 %v2389_v50, 16 }
 0x118   : > { %v2584_v23 = vor.u32 4788187, %v2583_v10  ;;  %v2587_v15 = vcvt.s32.f32 %v2580_v41  ;;  %v2399_v35 = vadd.s32 %v2397_v5, %v2391_v26  ;;  %vm2400_vm6 = vc.u32 %v2398_v12, %v2394_v14 }
 0x119   : > { %v2163_v48 = vshrl.u32 %v2162_v27, 23  ;;  %vm2469_vm7 = vcmp.lt.s32.totalorder %v5118_v20, 0  ;;  %v2401_v0 = vsel %vm2400_vm6, 1, %v4417_v3  ;;  %v2352_v52 = vsel %vm2346_vm14, %v2349_v36, %v2351_v32 }
 0x11a   : > { %v2585_v30 = vand.u32 2147483647, %v2584_v23  ;;  %v2395_v45 = vshrl.u32 %v2390_v9, 16  ;;  %v2403_v39 = vadd.s32 %v2401_v0, %v2399_v35  ;;  %v2592_v51 = vsel %vm2469_vm7, %v2591_v6, %v5307_v8 }
 0x11b   : > { %v4070_v16 = vadd.s32 4294967169, %v2163_v48  ;;  %v2383_v21 = vadd.s32 %v2382_v7, %v2373_v58  ;;  %v2402_v28 = vadd.s32 %v2398_v12, %v2394_v14  ;;  %vm2468_vm8 = vcmp.le.f32.partialorder %v2467_v18, 0.7853982 }
 0x11c   : > { %v2588_v31 = vmul.f32 %v2587_v15, %v2585_v30  ;;  %v2404_v57 = vadd.s32 %v2403_v39, %v2393_v55  ;;  %v2594_v36 = vsel %vm2468_vm8, 0, %v2592_v51  ;;  %v2406_v33 = vmul.u32 %v5315_v61, %v2352_v52 }
 0x11d   : > { %v2169_v53 = vadd.s32 1, %v4070_v16  ;;  %vm2408_vm12 = vc.u32 %v2383_v21, %v2402_v28  ;;  %v2159_v8 = vand.u32 2147483647, %v5341_v29  ;;  %v5375_v18 = vand.u32 3, %v2594_v36 }
 0x11e   : > { %v2589_v2 = vxor.u32 2147483648, %v2588_v31  ;;  %v2405_v62 = vadd.s32 %v2404_v57, %v2395_v45  ;;  %v5379_v61 = vmul.f32 0.62831855, %v901_v34  ;;  %v5402_v5 = vadd.s32 %v2402_v28, %v2383_v21 }
 0x11f   : > { %vm2170_vm11 = vcmp.gt.s32.totalorder %v2169_v53, 0  ;;  %v2166_v47 = vand.u32 8388607, %v2159_v8  ;;  %vm2616_vm0 = vcmp.eq.s32.totalorder %v5375_v18, 2  ;;  %vm2613_vm14 = vcmp.eq.s32.totalorder %v5375_v18, 0 }
 0x120   : > { %v2590_v50 = vsel %vm2469_vm7, %v2589_v2, %v2588_v31  ;;  %v2171_v24 = vsel %vm2170_vm11, %v2169_v53, 0  ;;  %v2409_v59 = vadd.s32 1, %v2405_v62  ;;  %vm2612_vm9 = vcmp.lt.s32.totalorder %v5375_v18, 2 }
 0x121   : > { %v2593_v9 = vsel %vm2468_vm8, %v5118_v20, %v2590_v50  ;;  %v2173_v49 = vand.u32 31, %v2171_v24  ;;  %v5383_v17 = vshrl.u32 %v2171_v24, 5  ;;  %v2167_v55 = vor.u32 8388608, %v2166_v47 }
 0x122   : > { %v2595_v37 = vmul.f32 %v2593_v9, %v2593_v9  ;;  %v2410_v4 = vsel %vm2408_vm12, %v2409_v59, %v2405_v62  ;;  %vm2610_vm10 = vweird.f32 %v5118_v20  ;;  %v1854_v53 = vand.u32 2139095040, %v5379_v61 }
 0x123   : > { %v5377_v60 = vsub.s32 32, %v2173_v49  ;;  %v2411_v1 = vadd.s32 %v2410_v4, %v2406_v33  ;;  %v2176_v63 = vshll.u32 %v4418_v38, %v2173_v49  ;;  %v2179_v26 = vshll.u32 %v4419_v40, %v2173_v49 }
 0x124   : > { %v2596_v19 = vmul.f32 -0.001358992, %v2595_v37  ;;  %v2603_v13 = vmul.f32 -0.00019511016, %v2595_v37  ;;  %v2185_v10 = vshll.u32 %v4421_v44, %v2173_v49  ;;  %v2182_v22 = vshll.u32 %v4420_v42, %v2173_v49 }
 0x125   : > { %v2177_v32 = vshrl.u32 %v4419_v40, %v5377_v60  ;;  %v2412_v41 = vadd.s32 536870912, %v2411_v1  ;;  %v2180_v6 = vshrl.u32 %v4420_v42, %v5377_v60  ;;  %v2183_v58 = vshrl.u32 %v4421_v44, %v5377_v60 }
 0x126   : > { %v2597_v25 = vadd.f32 0.041655596, %v2596_v19  ;;  %v2604_v14 = vadd.f32 0.008332121, %v2603_v13  ;;  %v2186_v12 = vshrl.u32 %v4422_v46, %v5377_v60  ;;  %v2188_v7 = vshll.u32 %v4422_v46, %v2173_v49 }
 0x127   : > { %v5398_v15 = vshrl.u32 %v2412_v41, 30  ;;  %v2189_v48 = vshrl.u32 %v4423_v56, %v5377_v60  ;;  %v2178_v52 = vor.u32 %v2177_v32, %v2176_v63  ;;  %v2181_v45 = vor.u32 %v2180_v6, %v2179_v26 }
 0x128   : > { %v2598_v27 = vmul.f32 %v2597_v25, %v2595_v37  ;;  %v2605_v23 = vmul.f32 %v2604_v14, %v2595_v37  ;;  %v2187_v35 = vor.u32 %v2186_v12, %v2185_v10  ;;  %v2184_v39 = vor.u32 %v2183_v58, %v2182_v22 }
 0x129   : > { %v2414_v11 = vshll.u32 %v5398_v15, 30  ;;  %v2190_v16 = vor.u32 %v2189_v48, %v2188_v7  ;;  %vm2194_vm13 = vcmp.lt.s32.totalorder %v5383_v17, 4  ;;  %vm2191_vm15 = vcmp.lt.s32.totalorder %v5383_v17, 1 }
 0x12a   : > { %v2599_v30 = vadd.f32 -0.4999988, %v2598_v27  ;;  %v2606_v0 = vadd.f32 -0.16666654, %v2605_v23  ;;  %vm2193_vm1 = vcmp.lt.s32.totalorder %v5383_v17, 3  ;;  %v5414_v57 = vshll.u32 %v2167_v55, 8 }
 0x12b   : > { %v2415_v21 = vsub.s32 %v2411_v1, %v2414_v11  ;;  %v2200_v28 = vsel %vm2194_vm13, %v2187_v35, 920167782  ;;  %vm2315_vm3 = vcmp.lt.s32.totalorder %v5157_v43, 0  ;;  %vm2192_vm4 = vcmp.lt.s32.totalorder %v5383_v17, 2 }
 0x12c   : > { %v2600_v31 = vmul.f32 %v2599_v30, %v2595_v37  ;;  %v2607_v51 = vmul.f32 %v2606_v0, %v2595_v37  ;;  %v2199_v33 = vsel %vm2191_vm15, %v2178_v52, %v2181_v45  ;;  %v2203_v50 = vsel %vm2191_vm15, %v2181_v45, %v2184_v39 }
 0x12d   : > { %vm2416_vm2 = vcmp.lt.s32.totalorder %v2415_v21, 0  ;;  %v2417_v62 = vsub.s32 0, %v2415_v21  ;;  %v2204_v24 = vsel %vm2194_vm13, %v2190_v16, 1326507024  ;;  %v2201_v37 = vsel %vm2193_vm1, %v2184_v39, %v2200_v28 }
 0x12e   : > { %v2601_v2 = vadd.f32 1.0, %v2600_v31  ;;  %v2608_v36 = vadd.f32 1.0, %v2607_v51  ;;  %v2205_v19 = vsel %vm2193_vm1, %v2187_v35, %v2204_v24  ;;  %v2208_v13 = vand.u32 65535, %v5414_v57 }
 0x12f   : > { %v2418_v49 = vsel %vm2416_vm2, %v2417_v62, %v2415_v21  ;;  %v1851_v1 = vand.u32 2147483647, %v5379_v61  ;;  %v2209_v32 = vshrl.u32 %v5414_v57, 16  ;;  %v2202_v25 = vsel %vm2192_vm4, %v2199_v33, %v2201_v37 }
 0x130   : > { %v2609_v34 = vmul.f32 %v2608_v36, %v2593_v9  ;;  %v2617_v59 = vxor.u32 2147483648, %v2601_v2  ;;  %v2419_v4 = vclz %v2418_v49  ;;  %v2206_v9 = vsel %vm2192_vm4, %v2203_v50, %v2205_v19 }
 0x131   : > { %v2211_v14 = vshrl.u32 %v2206_v9, 16  ;;  %v1855_v41 = vshrl.u32 %v1854_v53, 23  ;;  %v2437_v6 = vsub.s32 4, %v5398_v15  ;;  %v2175_v22 = vshrl.u32 %v4418_v38, %v5377_v60 }
 0x132   : > { %v2614_v47 = vxor.u32 2147483648, %v2609_v34  ;;  %v2618_v63 = vsel %vm2616_vm0, %v2617_v59, %v2609_v34  ;;  %v4074_v26 = vadd.s32 4294967294, %v2419_v4  ;;  %v2210_v58 = vand.u32 65535, %v2206_v9 }
 0x133   : > { %v2196_v27 = vsel %vm2194_vm13, %v2184_v39, 2102212464  ;;  %v2232_v23 = vand.u32 65535, %v2202_v25  ;;  %v2213_v35 = vmul.u32 %v2211_v14, %v2208_v13  ;;  %v2233_v48 = vshrl.u32 %v2202_v25, 16 }
 0x134   : > { %v2615_v10 = vsel %vm2613_vm14, %v2601_v2, %v2614_v47  ;;  %vm4075_vm5 = vcmp.lt.s32.totalorder %v4074_v26, 0  ;;  %vm5451_vm6 = vcmp.le.f32.partialorder %v2313_v54, 0.7853982  ;;  %v2438_v60 = vsel %vm2315_vm3, %v2437_v6, %v5398_v15 }
 0x135   : > { %v2619_v12 = vsel %vm2612_vm9, %v2615_v10, %v2618_v63  ;;  %v2422_v55 = vsel %vm4075_vm5, 0, %v4074_v26  ;;  %v2195_v20 = vsel %vm2191_vm15, %v2175_v22, %v2178_v52  ;;  %v2212_v39 = vmul.u32 %v2210_v58, %v2208_v13 }
 0x136   : > { %v2620_v7 = vsel %vm2610_vm10, nan, %v2619_v12  ;;  %v2423_v0 = vsub.s32 32, %v2422_v55  ;;  %v2424_v11 = vshll.u32 %v2415_v21, %v2422_v55  ;;  %v2427_v16 = vsub.s32 4294967266, %v2422_v55 }
 0x137   : > { %v3401_v30 = vadd.f32 1.0, %v2620_v7  ;;  %v2214_v31 = vmul.u32 %v2210_v58, %v2209_v32  ;;  %v2197_v53 = vsel %vm2193_vm1, %v2181_v45, %v2196_v27  ;;  %v2215_v54 = vmul.u32 %v2211_v14, %v2209_v32 }
 0x138   : > { %v2425_v28 = vshrl.u32 %v5402_v5, %v2423_v0  ;;  %v2428_v21 = vadd.s32 127, %v2427_v16  ;;  %v2216_v2 = vshll.u32 %v2213_v35, 16  ;;  %v4064_v62 = vadd.s32 4294967169, %v1855_v41 }
 0x139   : > { %v3417_v51 = vmul.f32 0.5, %v3401_v30  ;;  %v2218_v36 = vshll.u32 %v2214_v31, 16  ;;  %v2234_v15 = vmul.u32 %v2232_v23, %v2208_v13  ;;  %v2235_v24 = vmul.u32 %v2233_v48, %v2208_v13 }
 0x13a   : > { %v2426_v33 = vor.u32 %v2425_v28, %v2424_v11  ;;  %v2429_v50 = vshll.u32 %v2428_v21, 23  ;;  %vm2220_vm7 = vc.u32 %v2212_v39, %v2216_v2  ;;  %v2222_v52 = vadd.s32 %v2216_v2, %v2212_v39 }
 0x13b   : > { %3475 = vperm.xlu2 %4252, %v3417_v51   ;;  %v2236_v34 = vmul.u32 %v2232_v23, %v2209_v32  ;;  %v2237_v59 = vmul.u32 %v2233_v48, %v2209_v32  ;;  %v2221_v5 = vsel %vm2220_vm7, 1, %v4417_v3  ;;  %v2238_v4 = vshll.u32 %v2235_v24, 16 }
 0x13c   : > { %v2430_v49 = vor.u32 4788187, %v2429_v50  ;;  %v2433_v37 = vcvt.s32.f32 %v2426_v33  ;;  %v2217_v19 = vshrl.u32 %v2213_v35, 16  ;;  %v2223_v45 = vadd.s32 %v2221_v5, %v2215_v54 }
 0x13d   : > { %vm2224_vm8 = vc.u32 %v2222_v52, %v2218_v36  ;;  %v2240_v47 = vshll.u32 %v2236_v34, 16  ;;  %v2219_v9 = vshrl.u32 %v2214_v31, 16  ;;  %vm2242_vm11 = vc.u32 %v2234_v15, %v2238_v4 }
 0x13e   : > { %v2431_v63 = vand.u32 2147483647, %v2430_v49  ;;  %v2225_v26 = vsel %vm2224_vm8, 1, %v4417_v3  ;;  %v2243_v13 = vsel %vm2242_vm11, 1, %v4417_v3  ;;  %v2244_v14 = vadd.s32 %v2238_v4, %v2234_v15 }
 0x13f   : > { %v2227_v25 = vadd.s32 %v2225_v26, %v2223_v45  ;;  %v1861_v41 = vadd.s32 1, %v4064_v62  ;;  %v2440_v10 = vsel %vm5451_vm6, 0, %v2438_v60  ;;  %v2198_v6 = vsel %vm2192_vm4, %v2195_v20, %v2197_v53 }
 0x140   : > { %v2434_v32 = vmul.f32 %v2433_v37, %v2431_v63  ;;  %v2245_v22 = vadd.s32 %v2243_v13, %v2237_v59  ;;  %v2239_v12 = vshrl.u32 %v2235_v24, 16  ;;  %vm2246_vm12 = vc.u32 %v2244_v14, %v2240_v47  ;;  %v902_v63 = vld [vmem:[%s4562_s25 + $0x38] sm:$0xff] }
 0x141   : > { %v2228_v58 = vadd.s32 %v2227_v25, %v2217_v19  ;;  %vm1862_vm0 = vcmp.gt.s32.totalorder %v1861_v41, 0  ;;  %v2247_v23 = vsel %vm2246_vm12, 1, %v4417_v3  ;;  %v5471_v7 = vadd.s32 %v2244_v14, %v2240_v47 }
 0x142   : > { %v2435_v27 = vxor.u32 2147483648, %v2434_v32  ;;  %v1863_v55 = vsel %vm1862_vm0, %v1861_v41, 0  ;;  %v2241_v48 = vshrl.u32 %v2236_v34, 16  ;;  %v2249_v30 = vadd.s32 %v2247_v23, %v2245_v22 }
 0x143   : > { %v5473_v35 = vadd.s32 %v2228_v58, %v2219_v9  ;;  %v1865_v0 = vand.u32 31, %v1863_v55  ;;  %v1858_v11 = vand.u32 8388607, %v1851_v1  ;;  %v5482_v60 = vand.u32 3, %v2440_v10 }
 0x144   : > { %v2436_v17 = vsel %vm2315_vm3, %v2435_v27, %v2434_v32  ;;  %v2250_v20 = vadd.s32 %v2249_v30, %v2239_v12  ;;  %v2252_v39 = vmul.u32 %v5414_v57, %v2198_v6  ;;  %v5502_v59 = vshrl.u32 %v1863_v55, 5 }
 0x145   : > { %v2439_v16 = vsel %vm5451_vm6, %v5157_v43, %v2436_v17  ;;  %vm2254_vm14 = vc.u32 %v5473_v35, %v5471_v7  ;;  %v5487_v51 = vsub.s32 32, %v1865_v0  ;;  %v1868_v28 = vshll.u32 %v4418_v38, %v1865_v0 }
 0x146   : > { %v2441_v31 = vmul.f32 %v2439_v16, %v2439_v16  ;;  %v2251_v21 = vadd.s32 %v2250_v20, %v2241_v48  ;;  %v1871_v53 = vshll.u32 %v4419_v40, %v1865_v0  ;;  %v1874_v54 = vshll.u32 %v4420_v42, %v1865_v0 }
 0x147   : > { %v1877_v18 = vshll.u32 %v4421_v44, %v1865_v0  ;;  %v1869_v57 = vshrl.u32 %v4419_v40, %v5487_v51  ;;  %v1880_v62 = vshll.u32 %v4422_v46, %v1865_v0  ;;  %v1872_v50 = vshrl.u32 %v4420_v42, %v5487_v51 }
 0x148   : > { %v2442_v2 = vmul.f32 -0.001358992, %v2441_v31  ;;  %v2449_v36 = vmul.f32 -0.00019511016, %v2441_v31  ;;  %v2255_v33 = vadd.s32 1, %v2251_v21  ;;  %v1875_v15 = vshrl.u32 %v4421_v44, %v5487_v51 }
 0x149   : > { %v1878_v24 = vshrl.u32 %v4422_v46, %v5487_v51  ;;  %v1881_v49 = vshrl.u32 %v4423_v56, %v5487_v51  ;;  %v1859_v5 = vor.u32 8388608, %v1858_v11  ;;  %v5509_v47 = vor.u32 %v1869_v57, %v1868_v28 }
 0x14a   : > { %v2443_v52 = vadd.f32 0.041655596, %v2442_v2  ;;  %v2450_v34 = vadd.f32 0.008332121, %v2449_v36  ;;  %v2256_v37 = vsel %vm2254_vm14, %v2255_v33, %v2251_v21  ;;  %v5512_v9 = vor.u32 %v1872_v50, %v1871_v53 }
 0x14b   : > { %v2257_v45 = vadd.s32 %v2256_v37, %v2252_v39  ;;  %v1876_v26 = vor.u32 %v1875_v15, %v1874_v54  ;;  %v1879_v25 = vor.u32 %v1878_v24, %v1877_v18  ;;  %v1882_v13 = vor.u32 %v1881_v49, %v1880_v62 }
 0x14c   : > { %v2444_v4 = vmul.f32 %v2443_v52, %v2441_v31  ;;  %v2451_v19 = vmul.f32 %v2450_v34, %v2441_v31  ;;  %vm2458_vm9 = vcmp.lt.s32.totalorder %v5482_v60, 2  ;;  %vm1883_vm10 = vcmp.lt.s32.totalorder %v5502_v59, 1 }
 0x14d   : > { %v2258_v32 = vadd.s32 536870912, %v2257_v45  ;;  %vm2456_vm13 = vweird.f32 %v5157_v43  ;;  %vm2459_vm15 = vcmp.eq.s32.totalorder %v5482_v60, 0  ;;  %vm1886_vm1 = vcmp.lt.s32.totalorder %v5502_v59, 4 }
 0x14e   : > { %v2445_v14 = vadd.f32 -0.4999988, %v2444_v4  ;;  %v2452_v41 = vadd.f32 -0.16666654, %v2451_v19  ;;  %v5519_v10 = vshll.u32 %v1859_v5, 8  ;;  %vm1885_vm2 = vcmp.lt.s32.totalorder %v5502_v59, 3 }
 0x14f   : > { %v5521_v6 = vmul.f32 0.62831855, %v902_v63  ;;  %v5523_v12 = vshrl.u32 %v2258_v32, 30  ;;  %vm1884_vm3 = vcmp.lt.s32.totalorder %v5502_v59, 2  ;;  %v1891_v27 = vsel %vm1883_vm10, %v5509_v47, %v5512_v9 }
 0x150   : > { %v2446_v22 = vmul.f32 %v2445_v14, %v2441_v31  ;;  %v2453_v58 = vmul.f32 %v2452_v41, %v2441_v31  ;;  %v1892_v23 = vsel %vm1886_vm1, %v1879_v25, 920167782  ;;  %v1896_v55 = vsel %vm1886_vm1, %v1882_v13, 1326507024 }
 0x151   : > { %v2260_v0 = vshll.u32 %v5523_v12, 30  ;;  %v1895_v17 = vsel %vm1883_vm10, %v5512_v9, %v1876_v26  ;;  %vm2462_vm4 = vcmp.eq.s32.totalorder %v5482_v60, 2  ;;  %v1893_v11 = vsel %vm1885_vm2, %v1876_v26, %v1892_v23 }
 0x152   : > { %v2447_v48 = vadd.f32 1.0, %v2446_v22  ;;  %v2454_v30 = vadd.f32 1.0, %v2453_v58  ;;  %v1897_v20 = vsel %vm1885_vm2, %v1879_v25, %v1896_v55  ;;  %v2008_v39 = vand.u32 2139095040, %v5521_v6 }
 0x153   : > { %v2261_v21 = vsub.s32 %v2257_v45, %v2260_v0  ;;  %v1900_v53 = vand.u32 65535, %v5519_v10  ;;  %v1894_v54 = vsel %vm1884_vm3, %v1891_v27, %v1893_v11  ;;  %v1898_v18 = vsel %vm1884_vm3, %v1895_v17, %v1897_v20 }
 0x154   : > { %v2455_v31 = vmul.f32 %v2454_v30, %v2439_v16  ;;  %v2463_v28 = vxor.u32 2147483648, %v2447_v48  ;;  %v1901_v2 = vshrl.u32 %v5519_v10, 16  ;;  %v2005_v36 = vand.u32 2147483647, %v5521_v6 }
 0x155   : > { %vm2262_vm5 = vcmp.lt.s32.totalorder %v2261_v21, 0  ;;  %v2263_v33 = vsub.s32 0, %v2261_v21  ;;  %v2253_v16 = vadd.s32 %v5471_v7, %v5473_v35  ;;  %v1902_v50 = vand.u32 65535, %v1898_v18 }
 0x156   : > { %v2460_v57 = vxor.u32 2147483648, %v2455_v31  ;;  %v2464_v62 = vsel %vm2462_vm4, %v2463_v28, %v2455_v31  ;;  %v1903_v15 = vshrl.u32 %v1898_v18, 16  ;;  %v2009_v24 = vshrl.u32 %v2008_v39, 23 }
 0x157   : > { %v2264_v34 = vsel %vm2262_vm5, %v2263_v33, %v2261_v21  ;;  %v1867_v49 = vshrl.u32 %v4418_v38, %v5487_v51  ;;  %v1888_v37 = vsel %vm1886_vm1, %v1876_v26, 2102212464  ;;  %v1925_v45 = vshrl.u32 %v1894_v54, 16 }
 0x158   : > { %v2461_v52 = vsel %vm2459_vm15, %v2447_v48, %v2460_v57  ;;  %v2265_v4 = vclz %v2264_v34  ;;  %v1905_v19 = vmul.u32 %v1903_v15, %v1900_v53  ;;  %v1904_v35 = vmul.u32 %v1902_v50, %v1900_v53 }
 0x159   : > { %v2465_v5 = vsel %vm2458_vm9, %v2461_v52, %v2464_v62  ;;  %v1906_v63 = vmul.u32 %v1902_v50, %v1901_v2  ;;  %v1924_v25 = vand.u32 65535, %v1894_v54  ;;  %v4067_v32 = vadd.s32 4294967169, %v2009_v24 }
 0x15a   : > { %v2466_v7 = vsel %vm2456_vm13, nan, %v2465_v5  ;;  %v4071_v14 = vadd.s32 4294967294, %v2265_v4  ;;  %v1908_v41 = vshll.u32 %v1905_v19, 16  ;;  %v2283_v51 = vsub.s32 4, %v5523_v12 }
 0x15b   : > { %v3400_v13 = vadd.f32 1.0, %v2466_v7  ;;  %v1887_v60 = vsel %vm1883_vm10, %v1867_v49, %v5509_v47  ;;  %v1889_v26 = vsel %vm1885_vm2, %v5512_v9, %v1888_v37  ;;  %v1910_v22 = vshll.u32 %v1906_v63, 16 }
 0x15c   : > { %vm4072_vm6 = vcmp.lt.s32.totalorder %v4071_v14, 0  ;;  %v1907_v58 = vmul.u32 %v1903_v15, %v1901_v2  ;;  %v1927_v27 = vmul.u32 %v1925_v45, %v1900_v53  ;;  %vm1912_vm7 = vc.u32 %v1904_v35, %v1908_v41 }
 0x15d   : > { %v3416_v43 = vmul.f32 0.5, %v3400_v13  ;;  %v2268_v23 = vsel %vm4072_vm6, 0, %v4071_v14  ;;  %v1914_v55 = vadd.s32 %v1908_v41, %v1904_v35  ;;  %v1928_v48 = vmul.u32 %v1924_v25, %v1901_v2 }
 0x15e   : > { %vm2161_vm8 = vcmp.lt.s32.totalorder %v5341_v29, 0  ;;  %v2269_v30 = vsub.s32 32, %v2268_v23  ;;  %v2270_v0 = vshll.u32 %v2261_v21, %v2268_v23  ;;  %v2273_v17 = vsub.s32 4294967266, %v2268_v23 }
 0x15f   : > { %3470 = vperm.xlu2 %4252, %v3416_v43   ;;  %v2015_v47 = vadd.s32 1, %v4067_v32  ;;  %v1909_v11 = vshrl.u32 %v1905_v19, 16  ;;  %v1913_v20 = vsel %vm1912_vm7, 1, %v4417_v3  ;;  %vm1916_vm11 = vc.u32 %v1914_v55, %v1910_v22 }
 0x160   : > { %v1926_v9 = vmul.u32 %v1924_v25, %v1900_v53  ;;  %v2271_v39 = vshrl.u32 %v2253_v16, %v2269_v30  ;;  %v2274_v31 = vadd.s32 127, %v2273_v17  ;;  %v1915_v28 = vadd.s32 %v1913_v20, %v1907_v58 }
 0x161   : > { %v1917_v54 = vsel %vm1916_vm11, 1, %v4417_v3  ;;  %v5576_v18 = vsel %vm1884_vm3, %v1887_v60, %v1889_v26  ;;  %v1929_v57 = vmul.u32 %v1925_v45, %v1901_v2  ;;  %v1930_v62 = vshll.u32 %v1927_v27, 16 }
 0x162   : > { %v1932_v33 = vshll.u32 %v1928_v48, 16  ;;  %vm5580_vm12 = vcmp.le.f32.partialorder %v2159_v8, 0.7853982  ;;  %v2272_v50 = vor.u32 %v2271_v39, %v2270_v0  ;;  %v2275_v53 = vshll.u32 %v2274_v31, 23 }
 0x163   : > { %v1911_v16 = vshrl.u32 %v1906_v63, 16  ;;  %v1919_v15 = vadd.s32 %v1917_v54, %v1915_v28  ;;  %vm1934_vm0 = vc.u32 %v1926_v9, %v1930_v62  ;;  %v1936_v24 = vadd.s32 %v1930_v62, %v1926_v9 }
 0x164   : > { %v2012_v59 = vand.u32 8388607, %v2005_v36  ;;  %vm2016_vm14 = vcmp.gt.s32.totalorder %v2015_v47, 0  ;;  %v2276_v52 = vor.u32 4788187, %v2275_v53  ;;  %v2279_v2 = vcvt.s32.f32 %v2272_v50 }
 0x165   : > { %v1920_v34 = vadd.s32 %v1919_v15, %v1909_v11  ;;  %v1935_v49 = vsel %vm1934_vm0, 1, %v4417_v3  ;;  %v1931_v37 = vshrl.u32 %v1927_v27, 16  ;;  %vm1938_vm9 = vc.u32 %v1936_v24, %v1932_v33 }
 0x166   : > { %v1937_v8 = vadd.s32 %v1935_v49, %v1929_v57  ;;  %v2017_v5 = vsel %vm2016_vm14, %v2015_v47, 0  ;;  %v2277_v4 = vand.u32 2147483647, %v2276_v52  ;;  %v1939_v45 = vsel %vm1938_vm9, 1, %v4417_v3 }
 0x167   : > { %v5587_v19 = vadd.s32 %v1920_v34, %v1911_v16  ;;  %v5590_v7 = vadd.s32 %v1936_v24, %v1932_v33  ;;  %v2284_v35 = vsel %vm2161_vm8, %v2283_v51, %v5523_v12  ;;  %v1933_v63 = vshrl.u32 %v1928_v48, 16 }
 0x168   : > { %v1941_v25 = vadd.s32 %v1939_v45, %v1937_v8  ;;  %v2019_v13 = vand.u32 31, %v2017_v5  ;;  %v2280_v14 = vmul.f32 %v2279_v2, %v2277_v4  ;;  %v1944_v41 = vmul.u32 %v5519_v10, %v5576_v18 }
 0x169   : > { %v2013_v32 = vor.u32 8388608, %v2012_v59  ;;  %v5597_v60 = vshrl.u32 %v2017_v5, 5  ;;  %vm1946_vm10 = vc.u32 %v5587_v19, %v5590_v7  ;;  %v2286_v31 = vsel %vm5580_vm12, 0, %v2284_v35 }
 0x16a   : > { %v1942_v26 = vadd.s32 %v1941_v25, %v1931_v37  ;;  %v5599_v22 = vsub.s32 32, %v2019_v13  ;;  %v2022_v43 = vshll.u32 %v4418_v38, %v2019_v13  ;;  %v2025_v58 = vshll.u32 %v4419_v40, %v2019_v13 }
 0x16b   : > { %v2281_v27 = vxor.u32 2147483648, %v2280_v14  ;;  %v2028_v12 = vshll.u32 %v4420_v42, %v2019_v13  ;;  %v2031_v51 = vshll.u32 %v4421_v44, %v2019_v13  ;;  %v2034_v48 = vshll.u32 %v4422_v46, %v2019_v13  ;;  %v900_v13 = vld [vmem:[%s4562_s25 + $0x28] sm:$0xff] }
 0x16c   : > { %v1943_v23 = vadd.s32 %v1942_v26, %v1933_v63  ;;  %v2023_v10 = vshrl.u32 %v4419_v40, %v5599_v22  ;;  %v2026_v55 = vshrl.u32 %v4420_v42, %v5599_v22  ;;  %v2029_v0 = vshrl.u32 %v4421_v44, %v5599_v22 }
 0x16d   : > { %v2282_v30 = vsel %vm2161_vm8, %v2281_v27, %v2280_v14  ;;  %v2032_v17 = vshrl.u32 %v4422_v46, %v5599_v22  ;;  %v2035_v47 = vshrl.u32 %v4423_v56, %v5599_v22  ;;  %vm2037_vm13 = vcmp.lt.s32.totalorder %v5597_v60, 1 }
 0x16e   : > { %v2285_v11 = vsel %vm5580_vm12, %v5341_v29, %v2282_v30  ;;  %v1947_v20 = vadd.s32 1, %v1943_v23  ;;  %v5623_v9 = vor.u32 %v2023_v10, %v2022_v43  ;;  %v5625_v39 = vor.u32 %v2026_v55, %v2025_v58 }
 0x16f   : > { %v2287_v28 = vmul.f32 %v2285_v11, %v2285_v11  ;;  %v2033_v54 = vor.u32 %v2032_v17, %v2031_v51  ;;  %v5633_v57 = vor.u32 %v2029_v0, %v2028_v12  ;;  %v2036_v62 = vor.u32 %v2035_v47, %v2034_v48 }
 0x170   : > { %v1948_v18 = vsel %vm1946_vm10, %v1947_v20, %v1943_v23  ;;  %vm2040_vm15 = vcmp.lt.s32.totalorder %v5597_v60, 4  ;;  %vm2039_vm1 = vcmp.lt.s32.totalorder %v5597_v60, 3  ;;  %vm2038_vm2 = vcmp.lt.s32.totalorder %v5597_v60, 2  ;;  %v899_v60 = vld [vmem:[%s4562_s25 + $0x20] sm:$0xff] }
 0x171   : > { %v2288_v33 = vmul.f32 -0.001358992, %v2287_v28  ;;  %v2295_v50 = vmul.f32 -0.00019511016, %v2287_v28  ;;  %v1949_v53 = vadd.s32 %v1948_v18, %v1944_v41  ;;  %v2045_v21 = vsel %vm2037_vm13, %v5623_v9, %v5625_v39 }
 0x172   : > { %v2046_v16 = vsel %vm2040_vm15, %v2033_v54, 920167782  ;;  %v5644_v15 = vshll.u32 %v2013_v32, 8  ;;  %v2303_v52 = vand.u32 3, %v2286_v31  ;;  %v2050_v49 = vsel %vm2040_vm15, %v2036_v62, 1326507024 }
 0x173   : > { %v2289_v24 = vadd.f32 0.041655596, %v2288_v33  ;;  %v2296_v59 = vadd.f32 0.008332121, %v2295_v50  ;;  %v1950_v2 = vadd.s32 536870912, %v1949_v53  ;;  %v2047_v34 = vsel %vm2039_vm1, %v5633_v57, %v2046_v16 }
 0x174   : > { %v2048_v4 = vsel %vm2038_vm2, %v2045_v21, %v2047_v34  ;;  %v2049_v45 = vsel %vm2037_vm13, %v5625_v39, %v5633_v57  ;;  %v2051_v35 = vsel %vm2039_vm1, %v2033_v54, %v2050_v49  ;;  %v2054_v63 = vand.u32 65535, %v5644_v15 }
 0x175   : > { %v2290_v37 = vmul.f32 %v2289_v24, %v2287_v28  ;;  %v2297_v8 = vmul.f32 %v2296_v59, %v2287_v28  ;;  %v5651_v5 = vshrl.u32 %v1950_v2, 30  ;;  %v2079_v25 = vshrl.u32 %v2048_v4, 16 }
 0x176   : > { %vm2304_vm3 = vcmp.lt.s32.totalorder %v2303_v52, 2  ;;  %vm2302_vm4 = vweird.f32 %v5341_v29  ;;  %vm2305_vm5 = vcmp.eq.s32.totalorder %v2303_v52, 0  ;;  %vm2308_vm6 = vcmp.eq.s32.totalorder %v2303_v52, 2 }
 0x177   : > { %v2291_v14 = vadd.f32 -0.4999988, %v2290_v37  ;;  %v2298_v41 = vadd.f32 -0.16666654, %v2297_v8  ;;  %v1952_v32 = vshll.u32 %v5651_v5, 30  ;;  %v2055_v26 = vshrl.u32 %v5644_v15, 16 }
 0x178   : > { %v2078_v43 = vand.u32 65535, %v2048_v4  ;;  %v2052_v51 = vsel %vm2038_vm2, %v2049_v45, %v2051_v35  ;;  %v2021_v23 = vshrl.u32 %v4418_v38, %v5599_v22  ;;  %v5670_v55 = vmul.u32 %v2079_v25, %v2054_v63 }
 0x179   : > { %v2292_v58 = vmul.f32 %v2291_v14, %v2287_v28  ;;  %v2299_v27 = vmul.f32 %v2298_v41, %v2287_v28  ;;  %v1953_v12 = vsub.s32 %v1949_v53, %v1952_v32  ;;  %v2056_v10 = vand.u32 65535, %v2052_v51 }
 0x17a   : > { %v5672_v48 = vmul.f32 0.62831855, %v900_v13  ;;  %v1945_v47 = vadd.s32 %v5590_v7, %v5587_v19  ;;  %v2057_v20 = vshrl.u32 %v2052_v51, 16  ;;  %v5676_v31 = vmul.u32 %v2078_v43, %v2055_v26 }
 0x17b   : > { %v2293_v30 = vadd.f32 1.0, %v2292_v58  ;;  %v2300_v0 = vadd.f32 1.0, %v2299_v27  ;;  %vm1954_vm7 = vcmp.lt.s32.totalorder %v1953_v12, 0  ;;  %v1955_v17 = vsub.s32 0, %v1953_v12 }
 0x17c   : > { %v1697_v28 = vand.u32 2147483647, %v5672_v48  ;;  %v5679_v62 = vmul.u32 %v2056_v10, %v2055_v26  ;;  %v2059_v50 = vmul.u32 %v2057_v20, %v2054_v63  ;;  %v2080_v53 = vmul.u32 %v2078_v43, %v2054_v63 }
 0x17d   : > { %v2301_v54 = vmul.f32 %v2300_v0, %v2285_v11  ;;  %v2309_v18 = vxor.u32 2147483648, %v2293_v30  ;;  %v1956_v22 = vsel %vm1954_vm7, %v1955_v17, %v1953_v12  ;;  %v2084_v21 = vshll.u32 %v5670_v55, 16 }
 0x17e   : > { %v1957_v33 = vclz %v1956_v22  ;;  %v2041_v19 = vsel %vm2037_vm13, %v2021_v23, %v5623_v9  ;;  %v2058_v7 = vmul.u32 %v2056_v10, %v2054_v63  ;;  %v2042_v11 = vsel %vm2040_vm15, %v5633_v57, 2102212464 }
 0x17f   : > { %v2306_v16 = vxor.u32 2147483648, %v2301_v54  ;;  %v2310_v24 = vsel %vm2308_vm6, %v2309_v18, %v2301_v54  ;;  %v2062_v2 = vshll.u32 %v2059_v50, 16  ;;  %v2083_v34 = vmul.u32 %v2079_v25, %v2055_v26 }
 0x180   : > { %v4065_v59 = vadd.s32 4294967294, %v1957_v33  ;;  %v2061_v37 = vmul.u32 %v2057_v20, %v2055_v26  ;;  %v2064_v8 = vshll.u32 %v5679_v62, 16  ;;  %v2086_v4 = vshll.u32 %v5676_v31, 16 }
 0x181   : > { %v2307_v49 = vsel %vm2305_vm5, %v2293_v30, %v2306_v16  ;;  %vm5693_vm11 = vc.u32 %v2080_v53, %v2084_v21  ;;  %v2090_v35 = vadd.s32 %v2084_v21, %v2080_v53  ;;  %vm2066_vm12 = vc.u32 %v2058_v7, %v2062_v2 }
 0x182   : > { %v2311_v45 = vsel %vm2304_vm3, %v2307_v49, %v2310_v24  ;;  %vm4066_vm8 = vcmp.lt.s32.totalorder %v4065_v59, 0  ;;  %v2068_v25 = vadd.s32 %v2062_v2, %v2058_v7  ;;  %v1975_v26 = vsub.s32 4, %v5651_v5 }
 0x183   : > { %v2312_v57 = vsel %vm2302_vm4, nan, %v2311_v45  ;;  %v1960_v63 = vsel %vm4066_vm8, 0, %v4065_v59  ;;  %v2043_v52 = vsel %vm2039_vm1, %v5625_v39, %v2042_v11  ;;  %v2067_v43 = vsel %vm2066_vm12, 1, %v4417_v3 }
 0x184   : > { %v3399_v13 = vadd.f32 1.0, %v2312_v57  ;;  %v1961_v14 = vsub.s32 32, %v1960_v63  ;;  %v1962_v41 = vshll.u32 %v1953_v12, %v1960_v63  ;;  %v1965_v32 = vsub.s32 4294967266, %v1960_v63 }
 0x185   : > { %v2085_v58 = vshrl.u32 %v5670_v55, 16  ;;  %v2069_v23 = vadd.s32 %v2067_v43, %v2061_v37  ;;  %v2063_v10 = vshrl.u32 %v2059_v50, 16  ;;  %vm2070_vm0 = vc.u32 %v2068_v25, %v2064_v8 }
 0x186   : > { %v3415_v27 = vmul.f32 0.5, %v3399_v13  ;;  %v1963_v29 = vshrl.u32 %v1945_v47, %v1961_v14  ;;  %v1966_v51 = vadd.s32 127, %v1965_v32  ;;  %v2089_v12 = vsel %vm5693_vm11, 1, %v4417_v3 }
 0x187   : > { %vm2092_vm14 = vc.u32 %v2090_v35, %v2086_v4  ;;  %v2071_v39 = vsel %vm2070_vm0, 1, %v4417_v3  ;;  %v2091_v17 = vadd.s32 %v2089_v12, %v2083_v34  ;;  %v2065_v20 = vshrl.u32 %v5679_v62, 16  ;;  %v4157_v62 = vld [vmem:[%s6705_s0 + $0x8] sm:$0xff] }
 0x188   : > { %3465 = vperm.xlu1 %4251, %v3415_v27   ;;  %v1964_v30 = vor.u32 %v1963_v29, %v1962_v41  ;;  %v1967_v0 = vshll.u32 %v1966_v51, 23  ;;  %v2073_v55 = vadd.s32 %v2071_v39, %v2069_v23  ;;  %v2093_v47 = vsel %vm2092_vm14, 1, %v4417_v3  ;;  %3688 = vmatpush.bf16.msra.mxu2 %v4157_v62 }
 0x189   : > { %v1700_v54 = vand.u32 2139095040, %v5672_v48  ;;  %v2087_v33 = vshrl.u32 %v5676_v31, 16  ;;  %v2095_v50 = vadd.s32 %v2093_v47, %v2091_v17  ;;  %v2094_v21 = vadd.s32 %v2090_v35, %v2086_v4 }
 0x18a   : > { %v1968_v18 = vor.u32 4788187, %v1967_v0  ;;  %v1971_v22 = vcvt.s32.f32 %v1964_v30  ;;  %v2074_v53 = vadd.s32 %v2073_v55, %v2063_v10  ;;  %v2044_v7 = vsel %vm2038_vm2, %v2041_v19, %v2043_v52  ;;  %v4156_v19 = vld [vmem:[%s6705_s0] sm:$0xff] }
 0x18b   : > { %v1701_v16 = vshrl.u32 %v1700_v54, 23  ;;  %v2096_v59 = vadd.s32 %v2095_v50, %v2085_v58  ;;  %vm1853_vm9 = vcmp.lt.s32.totalorder %v5379_v61, 0  ;;  %v1704_v37 = vand.u32 8388607, %v1697_v28 }
 0x18c   : > { %v1969_v24 = vand.u32 2147483647, %v1968_v18  ;;  %v2075_v11 = vadd.s32 %v2074_v53, %v2065_v20  ;;  %v1976_v31 = vsel %vm1853_vm9, %v1975_v26, %v5651_v5  ;;  %v2098_v8 = vmul.u32 %v5644_v15, %v2044_v7  ;;  %3689 = vmatpush.bf16.msra.mxu2 %v4156_v19 }
 0x18d   : > { %v4061_v2 = vadd.s32 4294967169, %v1701_v16  ;;  %v2097_v49 = vadd.s32 %v2096_v59, %v2087_v33  ;;  %vm1852_vm13 = vcmp.le.f32.partialorder %v1851_v1, 0.7853982  ;;  %v5731_v35 = vmul.f32 0.62831855, %v899_v60 }
 0x18e   : > { %v1972_v34 = vmul.f32 %v1971_v22, %v1969_v24  ;;  %vm2100_vm10 = vc.u32 %v2075_v11, %v2094_v21  ;;  %v1978_v5 = vsel %vm1852_vm13, 0, %v1976_v31  ;;  %v1705_v25 = vor.u32 8388608, %v1704_v37 }
 0x18f   : > { %v1707_v4 = vadd.s32 1, %v4061_v2  ;;  %v2101_v9 = vadd.s32 1, %v2097_v49  ;;  %v5736_v26 = vand.u32 3, %v1978_v5  ;;  %v1543_v52 = vand.u32 2147483647, %v5731_v35 }
 0x190   : > { %v1973_v45 = vxor.u32 2147483648, %v1972_v34  ;;  %v1546_v43 = vand.u32 2139095040, %v5731_v35  ;;  %v5740_v51 = vshll.u32 %v1705_v25, 8  ;;  %v5750_v55 = vadd.s32 %v2094_v21, %v2075_v11 }
 0x191   : > { %vm1708_vm15 = vcmp.gt.s32.totalorder %v1707_v4, 0  ;;  %v2102_v63 = vsel %vm2100_vm10, %v2101_v9, %v2097_v49  ;;  %vm2000_vm1 = vcmp.eq.s32.totalorder %v5736_v26, 2  ;;  %vm1997_vm2 = vcmp.eq.s32.totalorder %v5736_v26, 0 }
 0x192   : > { %v1974_v57 = vsel %vm1853_vm9, %v1973_v45, %v1972_v34  ;;  %v1709_v13 = vsel %vm1708_vm15, %v1707_v4, 0  ;;  %v2103_v15 = vadd.s32 %v2102_v63, %v2098_v8  ;;  %v5762_v21 = vand.u32 65535, %v5740_v51 }
 0x193   : > { %v1977_v14 = vsel %vm1852_vm13, %v5379_v61, %v1974_v57  ;;  %v1711_v32 = vand.u32 31, %v1709_v13  ;;  %v5755_v50 = vshrl.u32 %v1709_v13, 5  ;;  %vm1996_vm3 = vcmp.lt.s32.totalorder %v5736_v26, 2 }
 0x194   : > { %v1979_v41 = vmul.f32 %v1977_v14, %v1977_v14  ;;  %v2104_v1 = vadd.s32 536870912, %v2103_v15  ;;  %vm1994_vm4 = vweird.f32 %v5379_v61  ;;  %v1547_v4 = vshrl.u32 %v1546_v43, 23 }
 0x195   : > { %v1712_v29 = vsub.s32 32, %v1711_v32  ;;  %v1714_v10 = vshll.u32 %v4418_v38, %v1711_v32  ;;  %v1717_v12 = vshll.u32 %v4419_v40, %v1711_v32  ;;  %v1720_v30 = vshll.u32 %v4420_v42, %v1711_v32 }
 0x196   : > { %v1980_v58 = vmul.f32 -0.001358992, %v1979_v41  ;;  %v1987_v27 = vmul.f32 -0.00019511016, %v1979_v41  ;;  %v5742_v23 = vshrl.u32 %v2104_v1, 30  ;;  %v1723_v20 = vshll.u32 %v4421_v44, %v1711_v32 }
 0x197   : > { %v1715_v17 = vshrl.u32 %v4419_v40, %v1712_v29  ;;  %v1718_v54 = vshrl.u32 %v4420_v42, %v1712_v29  ;;  %v1721_v18 = vshrl.u32 %v4421_v44, %v1712_v29  ;;  %v1724_v53 = vshrl.u32 %v4422_v46, %v1712_v29 }
 0x198   : > { %v1981_v0 = vadd.f32 0.041655596, %v1980_v58  ;;  %v1988_v39 = vadd.f32 0.008332121, %v1987_v27  ;;  %v2106_v47 = vshll.u32 %v5742_v23, 30  ;;  %v1726_v31 = vshll.u32 %v4422_v46, %v1711_v32 }
 0x199   : > { %v1716_v24 = vor.u32 %v1715_v17, %v1714_v10  ;;  %v1719_v7 = vor.u32 %v1718_v54, %v1717_v12  ;;  %v1722_v11 = vor.u32 %v1721_v18, %v1720_v30  ;;  %v1725_v2 = vor.u32 %v1724_v53, %v1723_v20 }
 0x19a   : > { %v1982_v22 = vmul.f32 %v1981_v0, %v1979_v41  ;;  %v1989_v33 = vmul.f32 %v1988_v39, %v1979_v41  ;;  %v5759_v16 = vsub.s32 %v2103_v15, %v2106_v47  ;;  %v1727_v49 = vshrl.u32 %v4423_v56, %v1712_v29 }
 0x19b   : > { %vm1729_vm6 = vcmp.lt.s32.totalorder %v5755_v50, 1  ;;  %vm1732_vm7 = vcmp.lt.s32.totalorder %v5755_v50, 4  ;;  %vm1731_vm8 = vcmp.lt.s32.totalorder %v5755_v50, 3  ;;  %vm2007_vm11 = vcmp.lt.s32.totalorder %v5521_v6, 0 }
 0x19c   : > { %v1983_v59 = vadd.f32 -0.4999988, %v1982_v22  ;;  %v1990_v62 = vadd.f32 -0.16666654, %v1989_v33  ;;  %vm2108_vm5 = vcmp.lt.s32.totalorder %v5759_v16, 0  ;;  %v2109_v34 = vsub.s32 0, %v5759_v16 }
 0x19d   : > { %v1728_v8 = vor.u32 %v1727_v49, %v1726_v31  ;;  %vm1730_vm12 = vcmp.lt.s32.totalorder %v5755_v50, 2  ;;  %v1737_v57 = vsel %vm1729_vm6, %v1716_v24, %v1719_v7  ;;  %v1738_v63 = vsel %vm1732_vm7, %v1725_v2, 920167782 }
 0x19e   : > { %v1984_v37 = vmul.f32 %v1983_v59, %v1979_v41  ;;  %v1991_v60 = vmul.f32 %v1990_v62, %v1979_v41  ;;  %v2110_v19 = vsel %vm2108_vm5, %v2109_v34, %v5759_v16  ;;  %v1741_v25 = vsel %vm1729_vm6, %v1719_v7, %v1722_v11 }
 0x19f   : > { %v2111_v5 = vclz %v2110_v19  ;;  %v1742_v13 = vsel %vm1732_vm7, %v1728_v8, 1326507024  ;;  %v1739_v1 = vsel %vm1731_vm8, %v1722_v11, %v1738_v63  ;;  %v1713_v43 = vshrl.u32 %v4418_v38, %v1712_v29 }
 0x1a0   : > { %v1985_v45 = vadd.f32 1.0, %v1984_v37  ;;  %v1992_v9 = vadd.f32 1.0, %v1991_v60  ;;  %v1743_v58 = vsel %vm1731_vm8, %v1725_v2, %v1742_v13  ;;  %v1747_v27 = vshrl.u32 %v5740_v51, 16 }
 0x1a1   : > { %v4068_v32 = vadd.s32 4294967294, %v2111_v5  ;;  %v4058_v10 = vadd.s32 4294967169, %v1547_v4  ;;  %v2129_v39 = vsub.s32 4, %v5742_v23  ;;  %v1740_v29 = vsel %vm1730_vm12, %v1737_v57, %v1739_v1 }
 0x1a2   : > { %v1993_v15 = vmul.f32 %v1992_v9, %v1977_v14  ;;  %v2001_v41 = vxor.u32 2147483648, %v1985_v45  ;;  %v1734_v14 = vsel %vm1732_vm7, %v1722_v11, 2102212464  ;;  %v1744_v17 = vsel %vm1730_vm12, %v1741_v25, %v1743_v58 }
 0x1a3   : > { %vm4069_vm0 = vcmp.lt.s32.totalorder %v4068_v32, 0  ;;  %v1733_v33 = vsel %vm1729_vm6, %v1713_v43, %v1716_v24  ;;  %v1735_v53 = vsel %vm1731_vm8, %v1719_v7, %v1734_v14  ;;  %v1770_v59 = vand.u32 65535, %v1740_v29 }
 0x1a4   : > { %v1998_v12 = vxor.u32 2147483648, %v1993_v15  ;;  %v2002_v30 = vsel %vm2000_vm1, %v2001_v41, %v1993_v15  ;;  %v2114_v0 = vsel %vm4069_vm0, 0, %v4068_v32  ;;  %v1748_v34 = vand.u32 65535, %v1744_v17 }
 0x1a5   : > { %v2115_v47 = vsub.s32 32, %v2114_v0  ;;  %v2116_v54 = vshll.u32 %v5759_v16, %v2114_v0  ;;  %v2119_v18 = vsub.s32 4294967266, %v2114_v0  ;;  %v5814_v26 = vsel %vm2007_vm11, %v2129_v39, %v5742_v23 }
 0x1a6   : > { %v1999_v20 = vsel %vm1997_vm2, %v1985_v45, %v1998_v12  ;;  %v1749_v16 = vshrl.u32 %v1744_v17, 16  ;;  %v1771_v49 = vshrl.u32 %v1740_v29, 16  ;;  %vm5818_vm14 = vcmp.le.f32.partialorder %v2005_v36, 0.7853982 }
 0x1a7   : > { %v2003_v22 = vsel %vm1996_vm3, %v1999_v20, %v2002_v30  ;;  %v2117_v11 = vshrl.u32 %v5750_v55, %v2115_v47  ;;  %v2120_v2 = vadd.s32 127, %v2119_v18  ;;  %v5824_v55 = vsel %vm1730_vm12, %v1733_v33, %v1735_v53 }
 0x1a8   : > { %v2004_v62 = vsel %vm1994_vm4, nan, %v2003_v22  ;;  %v1752_v37 = vmul.u32 %v1748_v34, %v1747_v27  ;;  %v1750_v19 = vmul.u32 %v1748_v34, %v5762_v21  ;;  %v1751_v23 = vmul.u32 %v1749_v16, %v5762_v21 }
 0x1a9   : > { %v3397_v31 = vadd.f32 1.0, %v2004_v62  ;;  %v2118_v61 = vor.u32 %v2117_v11, %v2116_v54  ;;  %v2121_v7 = vshll.u32 %v2120_v2, 23  ;;  %v1773_v8 = vmul.u32 %v1771_v49, %v5762_v21 }
 0x1aa   : > { %v1753_v36 = vmul.u32 %v1749_v16, %v1747_v27  ;;  %v1772_v9 = vmul.u32 %v1770_v59, %v5762_v21  ;;  %v1754_v5 = vshll.u32 %v1751_v23, 16  ;;  %v1755_v57 = vshrl.u32 %v1751_v23, 16 }
 0x1ab   : > { %v3413_v60 = vmul.f32 0.5, %v3397_v31  ;;  %v2122_v4 = vor.u32 4788187, %v2121_v7  ;;  %v2125_v45 = vcvt.s32.f32 %v2118_v61  ;;  %v1756_v63 = vshll.u32 %v1752_v37, 16 }
 0x1ac   : > { %v1774_v50 = vmul.u32 %v1770_v59, %v1747_v27  ;;  %v1775_v13 = vmul.u32 %v1771_v49, %v1747_v27  ;;  %v1776_v15 = vshll.u32 %v1773_v8, 16  ;;  %v1553_v41 = vadd.s32 1, %v4058_v10 }
 0x1ad   : > { %3455 = vperm.xlu0 %4250, %v3413_v60   ;;  %v2123_v25 = vand.u32 2147483647, %v2122_v4  ;;  %vm1758_vm9 = vc.u32 %v1750_v19, %v1754_v5  ;;  %v1760_v32 = vadd.s32 %v1754_v5, %v1750_v19  ;;  %v1777_v1 = vshrl.u32 %v1773_v8, 16 }
 0x1ae   : > { %v1778_v43 = vshll.u32 %v1774_v50, 16  ;;  %v1759_v12 = vsel %vm1758_vm9, 1, %v4417_v3  ;;  %vm1780_vm10 = vc.u32 %v1772_v9, %v1776_v15  ;;  %v1782_v30 = vadd.s32 %v1776_v15, %v1772_v9 }
 0x1af   : > { %v2126_v58 = vmul.f32 %v2125_v45, %v2123_v25  ;;  %v1761_v14 = vadd.s32 %v1759_v12, %v1753_v36  ;;  %vm1762_vm13 = vc.u32 %v1760_v32, %v1756_v63  ;;  %v1781_v21 = vsel %vm1780_vm10, 1, %v4417_v3 }
 0x1b0   : > { %vm1554_vm15 = vcmp.gt.s32.totalorder %v1553_v41, 0  ;;  %v1763_v39 = vsel %vm1762_vm13, 1, %v4417_v3  ;;  %v1783_v27 = vadd.s32 %v1781_v21, %v1775_v13  ;;  %vm1784_vm1 = vc.u32 %v1782_v30, %v1778_v43 }
 0x1b1   : > { %v2127_v0 = vxor.u32 2147483648, %v2126_v58  ;;  %v1757_v10 = vshrl.u32 %v1752_v37, 16  ;;  %v1765_v29 = vadd.s32 %v1763_v39, %v1761_v14  ;;  %v1785_v17 = vsel %vm1784_vm1, 1, %v4417_v3 }
 0x1b2   : > { %v1555_v20 = vsel %vm1554_vm15, %v1553_v41, 0  ;;  %v1779_v54 = vshrl.u32 %v1774_v50, 16  ;;  %v1787_v18 = vadd.s32 %v1785_v17, %v1783_v27  ;;  %v5839_v59 = vadd.s32 %v1782_v30, %v1778_v43 }
 0x1b3   : > { %v2128_v47 = vsel %vm2007_vm11, %v2127_v0, %v2126_v58  ;;  %v1557_v22 = vand.u32 31, %v1555_v20  ;;  %v1766_v53 = vadd.s32 %v1765_v29, %v1755_v57  ;;  %v2132_v34 = vsel %vm5818_vm14, 0, %v5814_v26 }
 0x1b4   : > { %v2131_v33 = vsel %vm5818_vm14, %v5521_v6, %v2128_v47  ;;  %v1788_v11 = vadd.s32 %v1787_v18, %v1777_v1  ;;  %v1790_v16 = vmul.u32 %v5740_v51, %v5824_v55  ;;  %v1550_v49 = vand.u32 8388607, %v1543_v52 }
 0x1b5   : > { %v2133_v62 = vmul.f32 %v2131_v33, %v2131_v33  ;;  %v5841_v2 = vsub.s32 32, %v1557_v22  ;;  %v5846_v31 = vadd.s32 %v1766_v53, %v1757_v10  ;;  %v1560_v60 = vshll.u32 %v4418_v38, %v1557_v22 }
 0x1b6   : > { %v1789_v37 = vadd.s32 %v1788_v11, %v1779_v54  ;;  %v1563_v26 = vshll.u32 %v4419_v40, %v1557_v22  ;;  %v1569_v19 = vshll.u32 %v4421_v44, %v1557_v22  ;;  %v5861_v4 = vshrl.u32 %v1555_v20, 5 }
 0x1b7   : > { %v2134_v61 = vmul.f32 -0.001358992, %v2133_v62  ;;  %v2141_v7 = vmul.f32 -0.00019511016, %v2133_v62  ;;  %vm1792_vm2 = vc.u32 %v5846_v31, %v5839_v59  ;;  %v1561_v24 = vshrl.u32 %v4419_v40, %v5841_v2 }
 0x1b8   : > { %v1793_v55 = vadd.s32 1, %v1789_v37  ;;  %v1564_v8 = vshrl.u32 %v4420_v42, %v5841_v2  ;;  %v1566_v45 = vshll.u32 %v4420_v42, %v1557_v22  ;;  %v1567_v36 = vshrl.u32 %v4421_v44, %v5841_v2 }
 0x1b9   : > { %v2135_v23 = vadd.f32 0.041655596, %v2134_v61  ;;  %v2142_v51 = vadd.f32 0.008332121, %v2141_v7  ;;  %v1570_v9 = vshrl.u32 %v4422_v46, %v5841_v2  ;;  %v1551_v50 = vor.u32 8388608, %v1550_v49 }
 0x1ba   : > { %v1794_v63 = vsel %vm1792_vm2, %v1793_v55, %v1789_v37  ;;  %v5868_v13 = vor.u32 %v1561_v24, %v1560_v60  ;;  %v1572_v15 = vshll.u32 %v4422_v46, %v1557_v22  ;;  %v1573_v41 = vshrl.u32 %v4423_v56, %v5841_v2 }
 0x1bb   : > { %v2136_v5 = vmul.f32 %v2135_v23, %v2133_v62  ;;  %v2143_v57 = vmul.f32 %v2142_v51, %v2133_v62  ;;  %v1795_v25 = vadd.s32 %v1794_v63, %v1790_v16  ;;  %v5873_v43 = vor.u32 %v1564_v8, %v1563_v26 }
 0x1bc   : > { %v1571_v58 = vor.u32 %v1570_v9, %v1569_v19  ;;  %v2149_v12 = vand.u32 3, %v2132_v34  ;;  %v5875_v14 = vor.u32 %v1567_v36, %v1566_v45  ;;  %vm1575_vm3 = vcmp.lt.s32.totalorder %v5861_v4, 1  ;;  %v898_v9 = vld [vmem:[%s4562_s25 + $0x18] sm:$0xff] }
 0x1bd   : > { %v2137_v32 = vadd.f32 -0.4999988, %v2136_v5  ;;  %v2144_v1 = vadd.f32 -0.16666654, %v2143_v57  ;;  %v1796_v30 = vadd.s32 536870912, %v1795_v25  ;;  %vm1577_vm4 = vcmp.lt.s32.totalorder %v5861_v4, 3 }
 0x1be   : > { %vm1578_vm5 = vcmp.lt.s32.totalorder %v5861_v4, 4  ;;  %v1574_v27 = vor.u32 %v1573_v41, %v1572_v15  ;;  %vm1576_vm6 = vcmp.lt.s32.totalorder %v5861_v4, 2  ;;  %v5883_v10 = vshll.u32 %v1551_v50, 8 }
 0x1bf   : > { %v2138_v21 = vmul.f32 %v2137_v32, %v2133_v62  ;;  %v2145_v0 = vmul.f32 %v2144_v1, %v2133_v62  ;;  %v5880_v39 = vshrl.u32 %v1796_v30, 30  ;;  %v1583_v20 = vsel %vm1575_vm3, %v5868_v13, %v5873_v43 }
 0x1c0   : > { %v1584_v47 = vsel %vm1578_vm5, %v1571_v58, 920167782  ;;  %vm2148_vm7 = vweird.f32 %v5521_v6  ;;  %vm2154_vm8 = vcmp.eq.s32.totalorder %v2149_v12, 2  ;;  %vm2150_vm11 = vcmp.lt.s32.totalorder %v2149_v12, 2 }
 0x1c1   : > { %v2139_v29 = vadd.f32 1.0, %v2138_v21  ;;  %v2146_v17 = vadd.f32 1.0, %v2145_v0  ;;  %v1798_v54 = vshll.u32 %v5880_v39, 30  ;;  %v1585_v18 = vsel %vm1577_vm4, %v5875_v14, %v1584_v47 }
 0x1c2   : > { %v1587_v62 = vsel %vm1575_vm3, %v5873_v43, %v5875_v14  ;;  %vm2151_vm12 = vcmp.eq.s32.totalorder %v2149_v12, 0  ;;  %v1586_v34 = vsel %vm1576_vm6, %v1583_v20, %v1585_v18  ;;  %v1588_v16 = vsel %vm1578_vm5, %v1574_v27, 1326507024 }
 0x1c3   : > { %v2147_v22 = vmul.f32 %v2146_v17, %v2131_v33  ;;  %v2155_v53 = vxor.u32 2147483648, %v2139_v29  ;;  %v1799_v11 = vsub.s32 %v1795_v25, %v1798_v54  ;;  %v1589_v33 = vsel %vm1577_vm4, %v1571_v58, %v1588_v16 }
 0x1c4   : > { %v1592_v7 = vand.u32 65535, %v5883_v10  ;;  %v1590_v60 = vsel %vm1576_vm6, %v1587_v62, %v1589_v33  ;;  %v1593_v24 = vshrl.u32 %v5883_v10, 16  ;;  %v3519_v26 = vlaneseq }
 0x1c5   : > { %v2152_v49 = vxor.u32 2147483648, %v2147_v22  ;;  %v2156_v61 = vsel %vm2154_vm8, %v2155_v53, %v2147_v22  ;;  %vm1800_vm0 = vcmp.lt.s32.totalorder %v1799_v11, 0  ;;  %v1801_v37 = vsub.s32 0, %v1799_v11 }
 0x1c6   : > { %v1594_v23 = vand.u32 65535, %v1590_v60  ;;  %v1595_v51 = vshrl.u32 %v1590_v60, 16  ;;  %v1559_v45 = vshrl.u32 %v4418_v38, %v5841_v2  ;;  %v1617_v36 = vshrl.u32 %v1586_v34, 16 }
 0x1c7   : > { %v2153_v19 = vsel %vm2151_vm12, %v2139_v29, %v2152_v49  ;;  %v1802_v8 = vsel %vm1800_vm0, %v1801_v37, %v1799_v11  ;;  %v1616_v41 = vand.u32 65535, %v1586_v34  ;;  %v5917_v32 = vand.u32 127, %v3519_v26  ;;  %v5926_v29 = vpop.permute.xlu0 %3538 }
 0x1c8   : > { %v2157_v55 = vsel %vm2150_vm11, %v2153_v19, %v2156_v61  ;;  %v1803_v57 = vclz %v1802_v8  ;;  %v1596_v63 = vmul.u32 %v1594_v23, %v1592_v7  ;;  %v1597_v50 = vmul.u32 %v1595_v51, %v1592_v7 }
 0x1c9   : > { %v2158_v5 = vsel %vm2148_vm7, nan, %v2157_v55  ;;  %v1598_v15 = vmul.u32 %v1594_v23, %v1593_v24  ;;  %v5919_v12 = vmul.f32 0.62831855, %v898_v9  ;;  %v1791_v2 = vadd.s32 %v5839_v59, %v5846_v31 }
 0x1ca   : > { %v3398_v25 = vadd.f32 1.0, %v2158_v5  ;;  %v4062_v1 = vadd.s32 4294967294, %v1803_v57  ;;  %v1600_v58 = vshll.u32 %v1597_v50, 16  ;;  %v1599_v21 = vmul.u32 %v1595_v51, %v1593_v24 }
 0x1cb   : > { %v1602_v6 = vshll.u32 %v1598_v15, 16  ;;  %v1579_v0 = vsel %vm1575_vm3, %v1559_v45, %v5868_v13  ;;  %v1619_v27 = vmul.u32 %v1617_v36, %v1592_v7  ;;  %v1620_v54 = vmul.u32 %v1616_v41, %v1593_v24 }
 0x1cc   : > { %v3414_v30 = vmul.f32 0.5, %v3398_v25  ;;  %vm4063_vm14 = vcmp.lt.s32.totalorder %v4062_v1, 0  ;;  %vm1604_vm9 = vc.u32 %v1596_v63, %v1600_v58  ;;  %v1606_v47 = vadd.s32 %v1600_v58, %v1596_v63 }
 0x1cd   : > { %v1806_v17 = vsel %vm4063_vm14, 0, %v4062_v1  ;;  %v1605_v20 = vsel %vm1604_vm9, 1, %v4417_v3  ;;  %v1618_v31 = vmul.u32 %v1616_v41, %v1592_v7  ;;  %v1601_v53 = vshrl.u32 %v1597_v50, 16 }
 0x1ce   : > { %3460 = vperm.xlu1 %4251, %v3414_v30   ;;  %v1807_v18 = vsub.s32 32, %v1806_v17  ;;  %v1808_v22 = vshll.u32 %v1799_v11, %v1806_v17  ;;  %v1811_v59 = vsub.s32 4294967266, %v1806_v17  ;;  %v1607_v62 = vadd.s32 %v1605_v20, %v1599_v21 }
 0x1cf   : > { %vm1608_vm10 = vc.u32 %v1606_v47, %v1602_v6  ;;  %v1621_v34 = vmul.u32 %v1617_v36, %v1593_v24  ;;  %v1622_v61 = vshll.u32 %v1619_v27, 16  ;;  %v1580_v33 = vsel %vm1578_vm5, %v5875_v14, 2102212464  ;;  %v3542_v41 = vpop.permute.xlu0 %3541 }
 0x1d0   : > { %v1809_v16 = vshrl.u32 %v1791_v2, %v1807_v18  ;;  %v1812_v13 = vadd.s32 127, %v1811_v59  ;;  %v1609_v49 = vsel %vm1608_vm10, 1, %v4417_v3  ;;  %v1603_v37 = vshrl.u32 %v1598_v15, 16 }
 0x1d1   : > { %v1611_v60 = vadd.s32 %v1609_v49, %v1607_v62  ;;  %v1624_v19 = vshll.u32 %v1620_v54, 16  ;;  %vm1626_vm13 = vc.u32 %v1618_v31, %v1622_v61  ;;  %v1628_v7 = vadd.s32 %v1622_v61, %v1618_v31 }
 0x1d2   : > { %v1810_v23 = vor.u32 %v1809_v16, %v1808_v22  ;;  %v1813_v11 = vshll.u32 %v1812_v13, 23  ;;  %v1623_v55 = vshrl.u32 %v1619_v27, 16  ;;  %v1627_v24 = vsel %vm1626_vm13, 1, %v4417_v3 }
 0x1d3   : > { %v1612_v51 = vadd.s32 %v1611_v60, %v1601_v53  ;;  %v1392_v8 = vand.u32 2139095040, %v5919_v12  ;;  %v1629_v9 = vadd.s32 %v1627_v24, %v1621_v34  ;;  %vm1630_vm15 = vc.u32 %v1628_v7, %v1624_v19 }
 0x1d4   : > { %v1814_v45 = vor.u32 4788187, %v1813_v11  ;;  %v1817_v36 = vcvt.s32.f32 %v1810_v23  ;;  %v1821_v5 = vsub.s32 4, %v5880_v39  ;;  %v1581_v14 = vsel %vm1577_vm4, %v5873_v43, %v1580_v33 }
 0x1d5   : > { %v1631_v57 = vsel %vm1630_vm15, 1, %v4417_v3  ;;  %v1393_v63 = vshrl.u32 %v1392_v8, 23  ;;  %v1625_v25 = vshrl.u32 %v1620_v54, 16  ;;  %v5940_v1 = vadd.s32 %v1612_v51, %v1603_v37  ;;  %v897_v51 = vld [vmem:[%s4562_s25 + $0x10] sm:$0xff] }
 0x1d6   : > { %v1815_v50 = vand.u32 2147483647, %v1814_v45  ;;  %v1633_v15 = vadd.s32 %v1631_v57, %v1629_v9  ;;  %v5942_v58 = vadd.s32 %v1628_v7, %v1624_v19  ;;  %vm1699_vm1 = vcmp.lt.s32.totalorder %v5672_v48, 0 }
 0x1d7   : > { %v4055_v30 = vadd.s32 4294967169, %v1393_v63  ;;  %v1582_v21 = vsel %vm1576_vm6, %v1579_v0, %v1581_v14  ;;  %vm3585_vm2 = vcmp.eq.s32.totalorder %v5917_v32, %v5926_v29  ;;  %v1822_v43 = vsel %vm1699_vm1, %v1821_v5, %v5880_v39 }
 0x1d8   : > { %v1818_v2 = vmul.f32 %v1817_v36, %v1815_v50  ;;  %v1634_v6 = vadd.s32 %v1633_v15, %v1623_v55  ;;  %vm3586_vm3 = vcmp.eq.s32.totalorder %v5917_v32, %v3542_v41  ;;  %vm5953_vm4 = vcmp.le.f32.partialorder %v1697_v28, 0.7853982 }
 0x1d9   : > { %v1399_v27 = vadd.s32 1, %v4055_v30  ;;  %v1636_v4 = vmul.u32 %v5883_v10, %v1582_v21  ;;  %vm1638_vm5 = vc.u32 %v5940_v1, %v5942_v58  ;;  %v1389_v0 = vand.u32 2147483647, %v5919_v12 }
 0x1da   : > { %v1819_v20 = vxor.u32 2147483648, %v1818_v2  ;;  %v1635_v47 = vadd.s32 %v1634_v6, %v1625_v25  ;;  %v1824_v54 = vsel %vm5953_vm4, 0, %v1822_v43  ;;  %v4424_v31 = vmov 0.0  }
 0x1db   : > { %vm1400_vm6 = vcmp.gt.s32.totalorder %v1399_v27, 0  ;;  %v5970_v10 = vsel %vm3585_vm2, 1.0, %v4424_v31  ;;  %v5975_v53 = vsel %vm3586_vm3, 1.0, %v4424_v31  ;;  %v5977_v16 = vand.u32 3, %v1824_v54 }
 0x1dc   : > { %v1820_v39 = vsel %vm1699_vm1, %v1819_v20, %v1818_v2  ;;  %v1639_v18 = vadd.s32 1, %v1635_v47  ;;  %v1401_v22 = vsel %vm1400_vm6, %v1399_v27, 0  ;;  %v1396_v49 = vand.u32 8388607, %v1389_v0 }
 0x1dd   : > { %v1823_v28 = vsel %vm5953_vm4, %v5672_v48, %v1820_v39  ;;  %v1403_v59 = vand.u32 31, %v1401_v22  ;;  %v5983_v37 = vshrl.u32 %v1401_v22, 5  ;;  %v6002_v25 = vmul.f32 0.62831855, %v897_v51 }
 0x1de   : > { %v1825_v62 = vmul.f32 %v1823_v28, %v1823_v28  ;;  %v1640_v34 = vsel %vm1638_vm5, %v1639_v18, %v1635_v47  ;;  %v1397_v9 = vor.u32 8388608, %v1396_v49  ;;  %vm1842_vm14 = vcmp.lt.s32.totalorder %v5977_v16, 2 }
 0x1df   : > { %v1641_v13 = vadd.s32 %v1640_v34, %v1636_v4  ;;  %v5981_v61 = vsub.s32 32, %v1403_v59  ;;  %v1406_v60 = vshll.u32 %v4418_v38, %v1403_v59  ;;  %v1409_v11 = vshll.u32 %v4419_v40, %v1403_v59 }
 0x1e0   : > { %v1826_v33 = vmul.f32 -0.001358992, %v1825_v62  ;;  %v1833_v29 = vmul.f32 -0.00019511016, %v1825_v62  ;;  %v1415_v8 = vshll.u32 %v4421_v44, %v1403_v59  ;;  %v1412_v5 = vshll.u32 %v4420_v42, %v1403_v59 }
 0x1e1   : > { %v1642_v19 = vadd.s32 536870912, %v1641_v13  ;;  %v1407_v23 = vshrl.u32 %v4419_v40, %v5981_v61  ;;  %v1410_v7 = vshrl.u32 %v4420_v42, %v5981_v61  ;;  %v1416_v45 = vshrl.u32 %v4422_v46, %v5981_v61 }
 0x1e2   : > { %v1827_v55 = vadd.f32 0.041655596, %v1826_v33  ;;  %v1834_v24 = vadd.f32 0.008332121, %v1833_v29  ;;  %v1413_v14 = vshrl.u32 %v4421_v44, %v5981_v61  ;;  %v1418_v30 = vshll.u32 %v4422_v46, %v1403_v59 }
 0x1e3   : > { %v5995_v36 = vshrl.u32 %v1642_v19, 30  ;;  %v6000_v50 = vor.u32 %v1407_v23, %v1406_v60  ;;  %v6005_v41 = vor.u32 %v1410_v7, %v1409_v11  ;;  %v1419_v2 = vshrl.u32 %v4423_v56, %v5981_v61 }
 0x1e4   : > { %v1828_v57 = vmul.f32 %v1827_v55, %v1825_v62  ;;  %v1835_v63 = vmul.f32 %v1834_v24, %v1825_v62  ;;  %v1417_v43 = vor.u32 %v1416_v45, %v1415_v8  ;;  %vm1421_vm7 = vcmp.lt.s32.totalorder %v5983_v37, 1 }
 0x1e5   : > { %v1644_v15 = vshll.u32 %v5995_v36, 30  ;;  %v6011_v17 = vor.u32 %v1413_v14, %v1412_v5  ;;  %vm1424_vm8 = vcmp.lt.s32.totalorder %v5983_v37, 4  ;;  %v6014_v20 = vshll.u32 %v1397_v9, 8 }
 0x1e6   : > { %v1829_v21 = vadd.f32 -0.4999988, %v1828_v57  ;;  %v1836_v6 = vadd.f32 -0.16666654, %v1835_v63  ;;  %vm1422_vm11 = vcmp.lt.s32.totalorder %v5983_v37, 2  ;;  %vm1423_vm12 = vcmp.lt.s32.totalorder %v5983_v37, 3 }
 0x1e7   : > { %v1645_v27 = vsub.s32 %v1641_v13, %v1644_v15  ;;  %v1420_v54 = vor.u32 %v1419_v2, %v1418_v30  ;;  %v1429_v18 = vsel %vm1421_vm7, %v6000_v50, %v6005_v41  ;;  %v1430_v34 = vsel %vm1424_vm8, %v1417_v43, 920167782 }
 0x1e8   : > { %v1830_v47 = vmul.f32 %v1829_v21, %v1825_v62  ;;  %v1837_v4 = vmul.f32 %v1836_v6, %v1825_v62  ;;  %vm1846_vm9 = vcmp.eq.s32.totalorder %v5977_v16, 2  ;;  %v1431_v13 = vsel %vm1423_vm12, %v6011_v17, %v1430_v34 }
 0x1e9   : > { %vm1646_vm0 = vcmp.lt.s32.totalorder %v1645_v27, 0  ;;  %v1647_v39 = vsub.s32 0, %v1645_v27  ;;  %v1238_v49 = vand.u32 2139095040, %v6002_v25  ;;  %v1432_v19 = vsel %vm1422_vm11, %v1429_v18, %v1431_v13 }
 0x1ea   : > { %v1831_v22 = vadd.f32 1.0, %v1830_v47  ;;  %v1838_v59 = vadd.f32 1.0, %v1837_v4  ;;  %vm1843_vm10 = vcmp.eq.s32.totalorder %v5977_v16, 0  ;;  %v1434_v23 = vsel %vm1424_vm8, %v1420_v54, 1326507024 }
 0x1eb   : > { %v1648_v62 = vsel %vm1646_vm0, %v1647_v39, %v1645_v27  ;;  %v1438_v11 = vand.u32 65535, %v6014_v20  ;;  %v1463_v7 = vshrl.u32 %v1432_v19, 16  ;;  %vm1840_vm13 = vweird.f32 %v5672_v48 }
 0x1ec   : > { %v1839_v33 = vmul.f32 %v1838_v59, %v1823_v28  ;;  %v1847_v29 = vxor.u32 2147483648, %v1831_v22  ;;  %v1649_v60 = vclz %v1648_v62  ;;  %v1433_v28 = vsel %vm1421_vm7, %v6005_v41, %v6011_v17 }
 0x1ed   : > { %v1435_v8 = vsel %vm1423_vm12, %v1417_v43, %v1434_v23  ;;  %v1439_v45 = vshrl.u32 %v6014_v20, 16  ;;  %v1462_v9 = vand.u32 65535, %v1432_v19  ;;  %v1637_v14 = vadd.s32 %v5942_v58, %v5940_v1 }
 0x1ee   : > { %v1844_v51 = vxor.u32 2147483648, %v1839_v33  ;;  %v1848_v55 = vsel %vm1846_vm9, %v1847_v29, %v1839_v33  ;;  %v4059_v24 = vadd.s32 4294967294, %v1649_v60  ;;  %v1239_v57 = vshrl.u32 %v1238_v49, 23 }
 0x1ef   : > { %v1436_v30 = vsel %vm1422_vm11, %v1433_v28, %v1435_v8  ;;  %v6050_v48 = vmul.u32 %v1463_v7, %v1438_v11  ;;  %v3633_v47 = vpack.c.bf16 %v5975_v53, %v5970_v10  ;;  %v6054_v1 = vmul.u32 %v1462_v9, %v1439_v45 }
 0x1f0   : > { %v1845_v5 = vsel %vm1843_vm10, %v1831_v22, %v1844_v51  ;;  %vm4060_vm15 = vcmp.lt.s32.totalorder %v4059_v24, 0  ;;  %v1440_v16 = vand.u32 65535, %v1436_v30  ;;  %v1441_v54 = vshrl.u32 %v1436_v30, 16 }
 0x1f1   : > { %v1849_v63 = vsel %vm1842_vm14, %v1845_v5, %v1848_v55  ;;  %v1652_v15 = vsel %vm4060_vm15, 0, %v4059_v24  ;;  %vm1545_vm1 = vcmp.lt.s32.totalorder %v5731_v35, 0  ;;  %v1464_v22 = vmul.u32 %v1462_v9, %v1438_v11 }
 0x1f2   : > { %v1850_v2 = vsel %vm1840_vm13, nan, %v1849_v63  ;;  %v1653_v21 = vsub.s32 32, %v1652_v15  ;;  %v1654_v6 = vshll.u32 %v1645_v27, %v1652_v15  ;;  %v1657_v43 = vsub.s32 4294967266, %v1652_v15 }
 0x1f3   : > { %v3396_v4 = vadd.f32 1.0, %v1850_v2  ;;  %v1468_v59 = vshll.u32 %v6050_v48, 16  ;;  %v4052_v34 = vadd.s32 4294967169, %v1239_v57  ;;  %vm6060_vm2 = vcmp.le.f32.partialorder %v1543_v52, 0.7853982 }
 0x1f4   : > { %v1655_v58 = vshrl.u32 %v1637_v14, %v1653_v21  ;;  %v1658_v39 = vadd.s32 127, %v1657_v43  ;;  %v1442_v62 = vmul.u32 %v1440_v16, %v1438_v11  ;;  %v1443_v13 = vmul.u32 %v1441_v54, %v1438_v11 }
 0x1f5   : > { %v3412_v18 = vmul.f32 0.5, %v3396_v4  ;;  %v1405_v49 = vshrl.u32 %v4418_v38, %v5981_v61  ;;  %v1444_v33 = vmul.u32 %v1440_v16, %v1439_v45  ;;  %v1467_v29 = vmul.u32 %v1463_v7, %v1439_v45 }
 0x1f6   : > { %v1656_v10 = vor.u32 %v1655_v58, %v1654_v6  ;;  %v1659_v53 = vshll.u32 %v1658_v39, 23  ;;  %v1470_v60 = vshll.u32 %v6054_v1, 16  ;;  %v1445_v51 = vmul.u32 %v1441_v54, %v1439_v45 }
 0x1f7   : > { %3450 = vperm.xlu0 %4250, %v3412_v18   ;;  %v1446_v55 = vshll.u32 %v1443_v13, 16  ;;  %v1426_v52 = vsel %vm1424_vm8, %v6011_v17, 2102212464  ;;  %v1448_v24 = vshll.u32 %v1444_v33, 16  ;;  %vm1472_vm3 = vc.u32 %v1464_v22, %v1468_v59 }
 0x1f8   : > { %v1660_v19 = vor.u32 4788187, %v1659_v53  ;;  %v1663_v23 = vcvt.s32.f32 %v1656_v10  ;;  %v1474_v28 = vadd.s32 %v1468_v59, %v1464_v22  ;;  %v1473_v61 = vsel %vm1472_vm3, 1, %v4417_v3 }
 0x1f9   : > { %vm1450_vm4 = vc.u32 %v1442_v62, %v1446_v55  ;;  %v1452_v8 = vadd.s32 %v1446_v55, %v1442_v62  ;;  %vm3657_vm5 = vcmask 261120   ;;  %v1475_v9 = vadd.s32 %v1473_v61, %v1467_v29 }
 0x1fa   : > { %v1661_v11 = vand.u32 2147483647, %v1660_v19  ;;  %v1451_v7 = vsel %vm1450_vm4, 1, %v4417_v3  ;;  %vm1476_vm6 = vc.u32 %v1474_v28, %v1470_v60  ;;  %v1667_v45 = vsub.s32 4, %v5995_v36  ;;  %4118 = vmatmul.msk.bf16.vlgmr.msra.gmra.mxu2 %vm3657_vm5, %v3633_v47 }
 0x1fb   : > { %v1425_v17 = vsel %vm1421_vm7, %v1405_v49, %v6000_v50  ;;  %v1453_v14 = vadd.s32 %v1451_v7, %v1445_v51  ;;  %v1427_v57 = vsel %vm1423_vm12, %v6005_v41, %v1426_v52  ;;  %v1447_v63 = vshrl.u32 %v1443_v13, 16 }
 0x1fc   : > { %v1664_v5 = vmul.f32 %v1663_v23, %v1661_v11  ;;  %vm1454_vm8 = vc.u32 %v1452_v8, %v1448_v24  ;;  %v1469_v15 = vshrl.u32 %v6050_v48, 16  ;;  %v1477_v21 = vsel %vm1476_vm6, 1, %v4417_v3 }
 0x1fd   : > { %v1455_v2 = vsel %vm1454_vm8, 1, %v4417_v3  ;;  %v1235_v6 = vand.u32 2147483647, %v6002_v25  ;;  %v1449_v43 = vshrl.u32 %v1444_v33, 16  ;;  %v1471_v50 = vshrl.u32 %v6054_v1, 16 }
 0x1fe   : > { %v1665_v30 = vxor.u32 2147483648, %v1664_v5  ;;  %v1457_v47 = vadd.s32 %v1455_v2, %v1453_v14  ;;  %v1479_v4 = vadd.s32 %v1477_v21, %v1475_v9  ;;  %v1668_v41 = vsel %vm1545_vm1, %v1667_v45, %v5995_v36 }
 0x1ff   : > { %v1428_v48 = vsel %vm1422_vm11, %v1425_v17, %v1427_v57  ;;  %v1245_v39 = vadd.s32 1, %v4052_v34  ;;  %v6095_v18 = vadd.s32 %v1474_v28, %v1470_v60  ;;  %v1242_v59 = vand.u32 8388607, %v1235_v6 }
 0x200   : > { %v1666_v58 = vsel %vm1545_vm1, %v1665_v30, %v1664_v5  ;;  %v1458_v54 = vadd.s32 %v1457_v47, %v1447_v63  ;;  %v1480_v1 = vadd.s32 %v1479_v4, %v1469_v15  ;;  %v1670_v36 = vsel %vm6060_vm2, 0, %v1668_v41 }
 0x201   : > { %v1669_v16 = vsel %vm6060_vm2, %v5731_v35, %v1666_v58  ;;  %vm1246_vm7 = vcmp.gt.s32.totalorder %v1245_v39, 0  ;;  %v1482_v13 = vmul.u32 %v6014_v20, %v1428_v48  ;;  %v1687_v19 = vand.u32 3, %v1670_v36 }
 0x202   : > { %v1671_v22 = vmul.f32 %v1669_v16, %v1669_v16  ;;  %v6101_v10 = vadd.s32 %v1458_v54, %v1449_v43  ;;  %v1481_v37 = vadd.s32 %v1480_v1, %v1471_v50  ;;  %v1247_v34 = vsel %vm1246_vm7, %v1245_v39, 0 }
 0x203   : > { %v1249_v49 = vand.u32 31, %v1247_v34  ;;  %v1243_v24 = vor.u32 8388608, %v1242_v59  ;;  %vm1688_vm12 = vcmp.lt.s32.totalorder %v1687_v19, 2  ;;  %v6114_v5 = vshrl.u32 %v1247_v34, 5 }
 0x204   : > { %v1672_v53 = vmul.f32 -0.001358992, %v1671_v22  ;;  %v1679_v62 = vmul.f32 -0.00019511016, %v1671_v22  ;;  %vm1484_vm11 = vc.u32 %v6101_v10, %v6095_v18  ;;  %v1485_v33 = vadd.s32 1, %v1481_v37 }
 0x205   : > { %v6106_v23 = vsub.s32 32, %v1249_v49  ;;  %v1252_v28 = vshll.u32 %v4418_v38, %v1249_v49  ;;  %v1255_v11 = vshll.u32 %v4419_v40, %v1249_v49  ;;  %v1258_v45 = vshll.u32 %v4420_v42, %v1249_v49 }
 0x206   : > { %v1673_v29 = vadd.f32 0.041655596, %v1672_v53  ;;  %v1680_v60 = vadd.f32 0.008332121, %v1679_v62  ;;  %v1486_v27 = vsel %vm1484_vm11, %v1485_v33, %v1481_v37  ;;  %v1261_v14 = vshll.u32 %v4421_v44, %v1249_v49 }
 0x207   : > { %v1487_v52 = vadd.s32 %v1486_v27, %v1482_v13  ;;  %v1253_v20 = vshrl.u32 %v4419_v40, %v6106_v23  ;;  %v1256_v8 = vshrl.u32 %v4420_v42, %v6106_v23  ;;  %v1259_v17 = vshrl.u32 %v4421_v44, %v6106_v23 }
 0x208   : > { %v1674_v51 = vmul.f32 %v1673_v29, %v1671_v22  ;;  %v1681_v55 = vmul.f32 %v1680_v60, %v1671_v22  ;;  %v1262_v57 = vshrl.u32 %v4422_v46, %v6106_v23  ;;  %vm1689_vm0 = vcmp.eq.s32.totalorder %v1687_v19, 0 }
 0x209   : > { %v1488_v9 = vadd.s32 536870912, %v1487_v52  ;;  %v6124_v2 = vor.u32 %v1253_v20, %v1252_v28  ;;  %v6126_v21 = vor.u32 %v1256_v8, %v1255_v11  ;;  %v1264_v43 = vshll.u32 %v4422_v46, %v1249_v49 }
 0x20a   : > { %v1675_v61 = vadd.f32 -0.4999988, %v1674_v51  ;;  %v1682_v7 = vadd.f32 -0.16666654, %v1681_v55  ;;  %v1265_v47 = vshrl.u32 %v4423_v56, %v6106_v23  ;;  %vm1267_vm14 = vcmp.lt.s32.totalorder %v6114_v5, 1 }
 0x20b   : > { %v6122_v30 = vshrl.u32 %v1488_v9, 30  ;;  %vm1692_vm9 = vcmp.eq.s32.totalorder %v1687_v19, 2  ;;  %v6133_v41 = vor.u32 %v1259_v17, %v1258_v45  ;;  %v1263_v48 = vor.u32 %v1262_v57, %v1261_v14  ;;  %v895_v9 = vld [vmem:[%s4562_s25] sm:$0xff] }
 0x20c   : > { %v1676_v63 = vmul.f32 %v1675_v61, %v1671_v22  ;;  %v1683_v15 = vmul.f32 %v1682_v7, %v1671_v22  ;;  %v6135_v39 = vshll.u32 %v1243_v24, 8  ;;  %vm1270_vm10 = vcmp.lt.s32.totalorder %v6114_v5, 4 }
 0x20d   : > { %v1490_v58 = vshll.u32 %v6122_v30, 30  ;;  %v1266_v59 = vor.u32 %v1265_v47, %v1264_v43  ;;  %vm1268_vm13 = vcmp.lt.s32.totalorder %v6114_v5, 2  ;;  %vm1269_vm15 = vcmp.lt.s32.totalorder %v6114_v5, 3 }
 0x20e   : > { %v1677_v50 = vadd.f32 1.0, %v1676_v63  ;;  %v1684_v4 = vadd.f32 1.0, %v1683_v15  ;;  %v1275_v36 = vsel %vm1267_vm14, %v6124_v2, %v6126_v21  ;;  %vm1686_vm2 = vweird.f32 %v5731_v35 }
 0x20f   : > { %v1491_v22 = vsub.s32 %v1487_v52, %v1490_v58  ;;  %v1279_v33 = vsel %vm1267_vm14, %v6126_v21, %v6133_v41  ;;  %v1280_v27 = vsel %vm1270_vm10, %v1266_v59, 1326507024  ;;  %v1284_v52 = vand.u32 65535, %v6135_v39 }
 0x210   : > { %v1685_v54 = vmul.f32 %v1684_v4, %v1669_v16  ;;  %v1693_v1 = vxor.u32 2147483648, %v1677_v50  ;;  %v1276_v16 = vsel %vm1270_vm10, %v1263_v48, 920167782  ;;  %v1281_v55 = vsel %vm1269_vm15, %v1263_v48, %v1280_v27 }
 0x211   : > { %vm1492_vm1 = vcmp.lt.s32.totalorder %v1491_v22, 0  ;;  %v1493_v53 = vsub.s32 0, %v1491_v22  ;;  %v1277_v49 = vsel %vm1269_vm15, %v6133_v41, %v1276_v16  ;;  %v1285_v24 = vshrl.u32 %v6135_v39, 16 }
 0x212   : > { %v1690_v37 = vxor.u32 2147483648, %v1685_v54  ;;  %v1694_v34 = vsel %vm1692_vm9, %v1693_v1, %v1685_v54  ;;  %v1278_v35 = vsel %vm1268_vm13, %v1275_v36, %v1277_v49  ;;  %v1282_v19 = vsel %vm1268_vm13, %v1279_v33, %v1281_v55 }
 0x213   : > { %v1494_v13 = vsel %vm1492_vm1, %v1493_v53, %v1491_v22  ;;  %v1483_v11 = vadd.s32 %v6095_v18, %v6101_v10  ;;  %v1286_v8 = vand.u32 65535, %v1282_v19  ;;  %v1287_v61 = vshrl.u32 %v1282_v19, 16 }
 0x214   : > { %v1691_v62 = vsel %vm1689_vm0, %v1677_v50, %v1690_v37  ;;  %v1495_v60 = vclz %v1494_v13  ;;  %v1309_v7 = vshrl.u32 %v1278_v35, 16  ;;  %v1251_v17 = vshrl.u32 %v4418_v38, %v6106_v23 }
 0x215   : > { %v1695_v29 = vsel %vm1688_vm12, %v1691_v62, %v1694_v34  ;;  %v1308_v14 = vand.u32 65535, %v1278_v35  ;;  %v1288_v63 = vmul.u32 %v1286_v8, %v1284_v52  ;;  %v1289_v15 = vmul.u32 %v1287_v61, %v1284_v52 }
 0x216   : > { %v1696_v51 = vsel %vm1686_vm2, nan, %v1695_v29  ;;  %v4056_v20 = vadd.s32 4294967294, %v1495_v60  ;;  %v1290_v43 = vmul.u32 %v1286_v8, %v1285_v24  ;;  %v6171_v58 = vmul.f32 0.62831855, %v895_v9 }
 0x217   : > { %v3395_v28 = vadd.f32 1.0, %v1696_v51  ;;  %v1513_v18 = vsub.s32 4, %v6122_v30  ;;  %v1291_v10 = vmul.u32 %v1287_v61, %v1285_v24  ;;  %v1292_v48 = vshll.u32 %v1289_v15, 16 }
 0x218   : > { %vm4057_vm3 = vcmp.lt.s32.totalorder %v4056_v20, 0  ;;  %v1311_v54 = vmul.u32 %v1309_v7, %v1284_v52  ;;  %vm1391_vm4 = vcmp.lt.s32.totalorder %v5919_v12, 0  ;;  %v1271_v59 = vsel %vm1267_vm14, %v1251_v17, %v6124_v2 }
 0x219   : > { %v3411_v45 = vmul.f32 0.5, %v3395_v28  ;;  %v1498_v57 = vsel %vm4057_vm3, 0, %v4056_v20  ;;  %v1294_v36 = vshll.u32 %v1290_v43, 16  ;;  %vm1296_vm6 = vc.u32 %v1288_v63, %v1292_v48 }
 0x21a   : > { %v1499_v47 = vsub.s32 32, %v1498_v57  ;;  %v1500_v50 = vshll.u32 %v1491_v22, %v1498_v57  ;;  %v1503_v4 = vsub.s32 4294967266, %v1498_v57  ;;  %v1298_v37 = vadd.s32 %v1292_v48, %v1288_v63 }
 0x21b   : > { %3445 = vperm.xlu2 %4252, %v3411_v45   ;;  %v1310_v22 = vmul.u32 %v1308_v14, %v1284_v52  ;;  %v1312_v34 = vmul.u32 %v1308_v14, %v1285_v24  ;;  %v1293_v62 = vshrl.u32 %v1289_v15, 16  ;;  %v1297_v13 = vsel %vm1296_vm6, 1, %v4417_v3 }
 0x21c   : > { %v1501_v1 = vshrl.u32 %v1483_v11, %v1499_v47  ;;  %v1504_v23 = vadd.s32 127, %v1503_v4  ;;  %v1299_v49 = vadd.s32 %v1297_v13, %v1291_v10  ;;  %vm1300_vm8 = vc.u32 %v1298_v37, %v1294_v36 }
 0x21d   : > { %v1313_v33 = vmul.u32 %v1309_v7, %v1285_v24  ;;  %v1314_v29 = vshll.u32 %v1311_v54, 16  ;;  %v1301_v27 = vsel %vm1300_vm8, 1, %v4417_v3  ;;  %v1316_v51 = vshll.u32 %v1312_v34, 16 }
 0x21e   : > { %v1502_v53 = vor.u32 %v1501_v1, %v1500_v50  ;;  %v1505_v16 = vshll.u32 %v1504_v23, 23  ;;  %v1272_v2 = vsel %vm1270_vm10, %v6133_v41, 2102212464  ;;  %v1303_v55 = vadd.s32 %v1301_v27, %v1299_v49 }
 0x21f   : > { %vm1318_vm7 = vc.u32 %v1310_v22, %v1314_v29  ;;  %v1320_v52 = vadd.s32 %v1314_v29, %v1310_v22  ;;  %v1295_v20 = vshrl.u32 %v1290_v43, 16  ;;  %v930_v11 = vand.u32 2139095040, %v6171_v58 }
 0x220   : > { %v1506_v60 = vor.u32 4788187, %v1505_v16  ;;  %v1509_v35 = vcvt.s32.f32 %v1502_v53  ;;  %v1319_v19 = vsel %vm1318_vm7, 1, %v4417_v3  ;;  %v1304_v24 = vadd.s32 %v1303_v55, %v1293_v62  ;;  %v896_v16 = vld [vmem:[%s4562_s25 + $0x8] sm:$0xff] }
 0x221   : > { %v1315_v8 = vshrl.u32 %v1311_v54, 16  ;;  %v1321_v61 = vadd.s32 %v1319_v19, %v1313_v33  ;;  %vm1322_vm11 = vc.u32 %v1320_v52, %v1316_v51  ;;  %v1273_v9 = vsel %vm1269_vm15, %v6126_v21, %v1272_v2 }
 0x222   : > { %v1507_v28 = vand.u32 2147483647, %v1506_v60  ;;  %v1323_v41 = vsel %vm1322_vm11, 1, %v4417_v3  ;;  %v931_v45 = vshrl.u32 %v930_v11, 23  ;;  %vm6191_vm12 = vcmp.le.f32.partialorder %v1389_v0, 0.7853982 }
 0x223   : > { %v1514_v14 = vsel %vm1391_vm4, %v1513_v18, %v6122_v30  ;;  %v1317_v57 = vshrl.u32 %v1312_v34, 16  ;;  %v1325_v63 = vadd.s32 %v1323_v41, %v1321_v61  ;;  %v1305_v43 = vadd.s32 %v1304_v24, %v1295_v20 }
 0x224   : > { %v1510_v7 = vmul.f32 %v1509_v35, %v1507_v28  ;;  %v1324_v47 = vadd.s32 %v1320_v52, %v1316_v51  ;;  %v4046_v50 = vadd.s32 4294967169, %v931_v45  ;;  %v1274_v21 = vsel %vm1268_vm13, %v1271_v59, %v1273_v9 }
 0x225   : > { %v1326_v4 = vadd.s32 %v1325_v63, %v1315_v8  ;;  %v927_v10 = vand.u32 2147483647, %v6171_v58  ;;  %v1516_v48 = vsel %vm6191_vm12, 0, %v1514_v14  ;;  %v1328_v5 = vmul.u32 %v6135_v39, %v1274_v21 }
 0x226   : > { %v1511_v15 = vxor.u32 2147483648, %v1510_v7  ;;  %v937_v30 = vadd.s32 1, %v4046_v50  ;;  %vm1330_vm0 = vc.u32 %v1305_v43, %v1324_v47  ;;  %v6209_v23 = vand.u32 3, %v1516_v48 }
 0x227   : > { %v1327_v54 = vadd.s32 %v1326_v4, %v1317_v57  ;;  %v934_v36 = vand.u32 8388607, %v927_v10  ;;  %v6217_v60 = vmul.f32 0.62831855, %v896_v16  ;;  %vm1532_vm15 = vweird.f32 %v5919_v12 }
 0x228   : > { %v1512_v0 = vsel %vm1391_vm4, %v1511_v15, %v1510_v7  ;;  %vm938_vm14 = vcmp.gt.s32.totalorder %v937_v30, 0  ;;  %vm1538_vm9 = vcmp.eq.s32.totalorder %v6209_v23, 2  ;;  %vm1535_vm10 = vcmp.eq.s32.totalorder %v6209_v23, 0 }
 0x229   : > { %v1515_v18 = vsel %vm6191_vm12, %v5919_v12, %v1512_v0  ;;  %v1331_v59 = vadd.s32 1, %v1327_v54  ;;  %v939_v37 = vsel %vm938_vm14, %v937_v30, 0  ;;  %v935_v39 = vor.u32 8388608, %v934_v36 }
 0x22a   : > { %v1517_v1 = vmul.f32 %v1515_v18, %v1515_v18  ;;  %v941_v53 = vand.u32 31, %v939_v37  ;;  %vm1534_vm13 = vcmp.lt.s32.totalorder %v6209_v23, 2  ;;  %v6233_v61 = vshrl.u32 %v939_v37, 5 }
 0x22b   : > { %v1332_v62 = vsel %vm1330_vm0, %v1331_v59, %v1327_v54  ;;  %v1329_v14 = vadd.s32 %v1324_v47, %v1305_v43  ;;  %v6242_v21 = vshll.u32 %v935_v39, 8  ;;  %v1084_v36 = vand.u32 2139095040, %v6217_v60 }
 0x22c   : > { %v1518_v22 = vmul.f32 -0.001358992, %v1517_v1  ;;  %v1525_v34 = vmul.f32 -0.00019511016, %v1517_v1  ;;  %v1333_v33 = vadd.s32 %v1332_v62, %v1328_v5  ;;  %v6214_v29 = vsub.s32 32, %v941_v53 }
 0x22d   : > { %v947_v2 = vshll.u32 %v4419_v40, %v941_v53  ;;  %v950_v52 = vshll.u32 %v4420_v42, %v941_v53  ;;  %v953_v28 = vshll.u32 %v4421_v44, %v941_v53  ;;  %v944_v7 = vshll.u32 %v4418_v38, %v941_v53 }
 0x22e   : > { %v1519_v13 = vadd.f32 0.041655596, %v1518_v22  ;;  %v1526_v49 = vadd.f32 0.008332121, %v1525_v34  ;;  %v1334_v51 = vadd.s32 536870912, %v1333_v33  ;;  %v948_v55 = vshrl.u32 %v4420_v42, %v6214_v29 }
 0x22f   : > { %v954_v20 = vshrl.u32 %v4422_v46, %v6214_v29  ;;  %v951_v8 = vshrl.u32 %v4421_v44, %v6214_v29  ;;  %v945_v9 = vshrl.u32 %v4419_v40, %v6214_v29  ;;  %v956_v41 = vshll.u32 %v4422_v46, %v941_v53 }
 0x230   : > { %v1520_v35 = vmul.f32 %v1519_v13, %v1517_v1  ;;  %v1527_v27 = vmul.f32 %v1526_v49, %v1517_v1  ;;  %v6228_v24 = vshrl.u32 %v1334_v51, 30  ;;  %v949_v63 = vor.u32 %v948_v55, %v947_v2 }
 0x231   : > { %v955_v15 = vor.u32 %v954_v20, %v953_v28  ;;  %v957_v50 = vshrl.u32 %v4423_v56, %v6214_v29  ;;  %v952_v30 = vor.u32 %v951_v8, %v950_v52  ;;  %v946_v54 = vor.u32 %v945_v9, %v944_v7 }
 0x232   : > { %v1521_v19 = vadd.f32 -0.4999988, %v1520_v35  ;;  %v1528_v11 = vadd.f32 -0.16666654, %v1527_v27  ;;  %v1336_v57 = vshll.u32 %v6228_v24, 30  ;;  %vm959_vm1 = vcmp.lt.s32.totalorder %v6233_v61, 1 }
 0x233   : > { %v958_v5 = vor.u32 %v957_v50, %v956_v41  ;;  %vm962_vm2 = vcmp.lt.s32.totalorder %v6233_v61, 4  ;;  %vm960_vm4 = vcmp.lt.s32.totalorder %v6233_v61, 2  ;;  %vm961_vm6 = vcmp.lt.s32.totalorder %v6233_v61, 3 }
 0x234   : > { %v1522_v45 = vmul.f32 %v1521_v19, %v1517_v1  ;;  %v1529_v17 = vmul.f32 %v1528_v11, %v1517_v1  ;;  %v1337_v48 = vsub.s32 %v1333_v33, %v1336_v57  ;;  %v968_v59 = vsel %vm962_vm2, %v955_v15, 920167782 }
 0x235   : > { %v972_v16 = vsel %vm962_vm2, %v958_v5, 1326507024  ;;  %v976_v62 = vand.u32 65535, %v6242_v21  ;;  %v977_v13 = vshrl.u32 %v6242_v21, 16  ;;  %v967_v33 = vsel %vm959_vm1, %v946_v54, %v949_v63 }
 0x236   : > { %v1523_v4 = vadd.f32 1.0, %v1522_v45  ;;  %v1530_v0 = vadd.f32 1.0, %v1529_v17  ;;  %vm1338_vm3 = vcmp.lt.s32.totalorder %v1337_v48, 0  ;;  %v1339_v1 = vsub.s32 0, %v1337_v48 }
 0x237   : > { %v969_v39 = vsel %vm961_vm6, %v952_v30, %v968_v59  ;;  %v973_v35 = vsel %vm961_vm6, %v955_v15, %v972_v16  ;;  %v1085_v55 = vshrl.u32 %v1084_v36, 23  ;;  %v943_v28 = vshrl.u32 %v4418_v38, %v6214_v29 }
 0x238   : > { %v1531_v43 = vmul.f32 %v1530_v0, %v1515_v18  ;;  %v1539_v47 = vxor.u32 2147483648, %v1523_v4  ;;  %v1340_v34 = vsel %vm1338_vm3, %v1339_v1, %v1337_v48  ;;  %v971_v18 = vsel %vm959_vm1, %v949_v63, %v952_v30 }
 0x239   : > { %v1341_v53 = vclz %v1340_v34  ;;  %v974_v2 = vsel %vm960_vm4, %v971_v18, %v973_v35  ;;  %v964_v8 = vsel %vm962_vm2, %v952_v30, 2102212464  ;;  %v970_v23 = vsel %vm960_vm4, %v967_v33, %v969_v39 }
 0x23a   : > { %v1536_v37 = vxor.u32 2147483648, %v1531_v43  ;;  %v1540_v22 = vsel %vm1538_vm9, %v1539_v47, %v1531_v43  ;;  %v978_v20 = vand.u32 65535, %v974_v2  ;;  %v979_v19 = vshrl.u32 %v974_v2, 16 }
 0x23b   : > { %v4053_v51 = vadd.s32 4294967294, %v1341_v53  ;;  %v963_v29 = vsel %vm959_vm1, %v943_v28, %v946_v54  ;;  %v965_v50 = vsel %vm961_vm6, %v949_v63, %v964_v8  ;;  %v4049_v0 = vadd.s32 4294967169, %v1085_v55 }
 0x23c   : > { %v1537_v49 = vsel %vm1535_vm10, %v1523_v4, %v1536_v37  ;;  %v980_v9 = vmul.u32 %v978_v20, %v976_v62  ;;  %v981_v41 = vmul.u32 %v979_v19, %v976_v62  ;;  %v982_v45 = vmul.u32 %v978_v20, %v977_v13 }
 0x23d   : > { %v1541_v27 = vsel %vm1534_vm13, %v1537_v49, %v1540_v22  ;;  %vm4054_vm8 = vcmp.lt.s32.totalorder %v4053_v51, 0  ;;  %v1081_v4 = vand.u32 2147483647, %v6217_v60  ;;  %v983_v43 = vmul.u32 %v979_v19, %v977_v13 }
 0x23e   : > { %v1542_v52 = vsel %vm1532_vm15, nan, %v1541_v27  ;;  %v1344_v7 = vsel %vm4054_vm8, 0, %v4053_v51  ;;  %v984_v47 = vshll.u32 %v981_v41, 16  ;;  %vm1237_vm7 = vcmp.lt.s32.totalorder %v6002_v25, 0 }
 0x23f   : > { %v3394_v11 = vadd.f32 1.0, %v1542_v52  ;;  %v1345_v12 = vsub.s32 32, %v1344_v7  ;;  %v1346_v57 = vshll.u32 %v1337_v48, %v1344_v7  ;;  %v1349_v15 = vsub.s32 4294967266, %v1344_v7 }
 0x240   : > { %v985_v1 = vshrl.u32 %v981_v41, 16  ;;  %v986_v59 = vshll.u32 %v982_v45, 16  ;;  %v1000_v48 = vand.u32 65535, %v970_v23  ;;  %v1001_v36 = vshrl.u32 %v970_v23, 16 }
 0x241   : > { %v3410_v17 = vmul.f32 0.5, %v3394_v11  ;;  %v1347_v30 = vshrl.u32 %v1329_v14, %v1345_v12  ;;  %v1350_v5 = vadd.s32 127, %v1349_v15  ;;  %vm6287_vm11 = vcmp.le.f32.partialorder %v1235_v6, 0.7853982 }
 0x242   : > { %vm988_vm12 = vc.u32 %v980_v9, %v984_v47  ;;  %v990_v22 = vadd.s32 %v984_v47, %v980_v9  ;;  %v1002_v34 = vmul.u32 %v1000_v48, %v976_v62  ;;  %v1003_v18 = vmul.u32 %v1001_v36, %v976_v62 }
 0x243   : > { %3440 = vperm.xlu2 %4252, %v3410_v17   ;;  %v1348_v63 = vor.u32 %v1347_v30, %v1346_v57  ;;  %v1351_v37 = vshll.u32 %v1350_v5, 23  ;;  %v989_v14 = vsel %vm988_vm12, 1, %v4417_v3  ;;  %v1004_v53 = vmul.u32 %v1000_v48, %v977_v13 }
 0x244   : > { %v991_v33 = vadd.s32 %v989_v14, %v983_v43  ;;  %vm992_vm0 = vc.u32 %v990_v22, %v986_v59  ;;  %v1359_v39 = vsub.s32 4, %v6228_v24  ;;  %v1005_v35 = vmul.u32 %v1001_v36, %v977_v13 }
 0x245   : > { %v1352_v16 = vor.u32 4788187, %v1351_v37  ;;  %v1355_v49 = vcvt.s32.f32 %v1348_v63  ;;  %v993_v6 = vsel %vm992_vm0, 1, %v4417_v3  ;;  %v1006_v27 = vshll.u32 %v1003_v18, 16 }
 0x246   : > { %v987_v2 = vshrl.u32 %v982_v45, 16  ;;  %v995_v55 = vadd.s32 %v993_v6, %v991_v33  ;;  %v1008_v52 = vshll.u32 %v1004_v53, 16  ;;  %v966_v28 = vsel %vm960_vm4, %v963_v29, %v965_v50 }
 0x247   : > { %v1353_v51 = vand.u32 2147483647, %v1352_v16  ;;  %vm1010_vm14 = vc.u32 %v1002_v34, %v1006_v27  ;;  %v1012_v62 = vadd.s32 %v1006_v27, %v1002_v34  ;;  %v1091_v20 = vadd.s32 1, %v4049_v0 }
 0x248   : > { %v996_v11 = vadd.s32 %v995_v55, %v985_v1  ;;  %v1007_v8 = vshrl.u32 %v1003_v18, 16  ;;  %v1011_v23 = vsel %vm1010_vm14, 1, %v4417_v3  ;;  %v1009_v17 = vshrl.u32 %v1004_v53, 16 }
 0x249   : > { %v1356_v19 = vmul.f32 %v1355_v49, %v1353_v51  ;;  %v1013_v7 = vadd.s32 %v1011_v23, %v1005_v35  ;;  %vm1014_vm9 = vc.u32 %v1012_v62, %v1008_v52  ;;  %v6297_v9 = vadd.s32 %v1012_v62, %v1008_v52 }
 0x24a   : > { %vm1092_vm10 = vcmp.gt.s32.totalorder %v1091_v20, 0  ;;  %v6299_v41 = vadd.s32 %v996_v11, %v987_v2  ;;  %v1015_v45 = vsel %vm1014_vm9, 1, %v4417_v3  ;;  %v1360_v29 = vsel %vm1237_vm7, %v1359_v39, %v6228_v24 }
 0x24b   : > { %v1357_v13 = vxor.u32 2147483648, %v1356_v19  ;;  %v1093_v61 = vsel %vm1092_vm10, %v1091_v20, 0  ;;  %v1017_v12 = vadd.s32 %v1015_v45, %v1013_v7  ;;  %v1088_v50 = vand.u32 8388607, %v1081_v4 }
 0x24c   : > { %v1095_v57 = vand.u32 31, %v1093_v61  ;;  %v1020_v5 = vmul.u32 %v6242_v21, %v966_v28  ;;  %vm1022_vm13 = vc.u32 %v6299_v41, %v6297_v9  ;;  %v6317_v1 = vshrl.u32 %v1093_v61, 5 }
 0x24d   : > { %v1358_v15 = vsel %vm1237_vm7, %v1357_v13, %v1356_v19  ;;  %v1018_v30 = vadd.s32 %v1017_v12, %v1007_v8  ;;  %v1089_v39 = vor.u32 8388608, %v1088_v50 }
 0x24e   : > { %v1361_v0 = vsel %vm6287_vm11, %v6002_v25, %v1358_v15  ;;  %v6313_v43 = vsub.s32 32, %v1095_v57  ;;  %v1098_v24 = vshll.u32 %v4418_v38, %v1095_v57  ;;  %v1101_v36 = vshll.u32 %v4419_v40, %v1095_v57 }
 0x24f   : > { %v1363_v47 = vmul.f32 %v1361_v0, %v1361_v0  ;;  %v1019_v59 = vadd.s32 %v1018_v30, %v1009_v17  ;;  %v1107_v63 = vshll.u32 %v4421_v44, %v1095_v57  ;;  %v1104_v18 = vshll.u32 %v4420_v42, %v1095_v57 }
 0x250   : > { %v1099_v48 = vshrl.u32 %v4419_v40, %v6313_v43  ;;  %v1102_v22 = vshrl.u32 %v4420_v42, %v6313_v43  ;;  %v1108_v14 = vshrl.u32 %v4422_v46, %v6313_v43  ;;  %v1105_v53 = vshrl.u32 %v4421_v44, %v6313_v43 }
 0x251   : > { %v1364_v37 = vmul.f32 -0.001358992, %v1363_v47  ;;  %v1371_v21 = vmul.f32 -0.00019511016, %v1363_v47  ;;  %v1023_v34 = vadd.s32 1, %v1019_v59  ;;  %v1110_v16 = vshll.u32 %v4422_v46, %v1095_v57 }
 0x252   : > { %v1362_v40 = vsel %vm6287_vm11, 0, %v1360_v29  ;;  %v6337_v35 = vor.u32 %v1099_v48, %v1098_v24  ;;  %v1109_v27 = vor.u32 %v1108_v14, %v1107_v63  ;;  %v1111_v42 = vshrl.u32 %v4423_v56, %v6313_v43 }
 0x253   : > { %v1365_v49 = vadd.f32 0.041655596, %v1364_v37  ;;  %v1372_v33 = vadd.f32 0.008332121, %v1371_v21  ;;  %v1024_v6 = vsel %vm1022_vm13, %v1023_v34, %v1019_v59  ;;  %v6341_v46 = vor.u32 %v1102_v22, %v1101_v36 }
 0x254   : > { %v1025_v2 = vadd.s32 %v1024_v6, %v1020_v5  ;;  %v6343_v54 = vor.u32 %v1105_v53, %v1104_v18  ;;  %v1112_v55 = vor.u32 %v1111_v42, %v1110_v16  ;;  %vm1113_vm15 = vcmp.lt.s32.totalorder %v6317_v1, 1 }
 0x255   : > { %v1366_v51 = vmul.f32 %v1365_v49, %v1363_v47  ;;  %v1373_v44 = vmul.f32 %v1372_v33, %v1363_v47  ;;  %vm1116_vm1 = vcmp.lt.s32.totalorder %v6317_v1, 4  ;;  %vm1115_vm2 = vcmp.lt.s32.totalorder %v6317_v1, 3 }
 0x256   : > { %v1026_v62 = vadd.s32 536870912, %v1025_v2  ;;  %v1379_v20 = vand.u32 3, %v1362_v40  ;;  %v1122_v56 = vsel %vm1116_vm1, %v1109_v27, 920167782  ;;  %v1126_v19 = vsel %vm1116_vm1, %v1112_v55, 1326507024 }
 0x257   : > { %v1367_v52 = vadd.f32 -0.4999988, %v1366_v51  ;;  %v1374_v28 = vadd.f32 -0.16666654, %v1373_v44  ;;  %v6354_v7 = vshll.u32 %v1089_v39, 8  ;;  %vm1114_vm3 = vcmp.lt.s32.totalorder %v6317_v1, 2 }
 0x258   : > { %v6352_v23 = vshrl.u32 %v1026_v62, 30  ;;  %v1121_v13 = vsel %vm1113_vm15, %v6337_v35, %v6341_v46  ;;  %v1125_v45 = vsel %vm1113_vm15, %v6341_v46, %v6343_v54  ;;  %v1127_v61 = vsel %vm1115_vm2, %v1109_v27, %v1126_v19 }
 0x259   : > { %v1368_v11 = vmul.f32 %v1367_v52, %v1363_v47  ;;  %v1375_v8 = vmul.f32 %v1374_v28, %v1363_v47  ;;  %v1123_v15 = vsel %vm1115_vm2, %v6343_v54, %v1122_v56  ;;  %vm1380_vm4 = vcmp.lt.s32.totalorder %v1379_v20, 2  ;;  %v3545_v28 = vpop.permute.xlu1 %3544 }
 0x25a   : > { %v1028_v57 = vshll.u32 %v6352_v23, 30  ;;  %vm1384_vm6 = vcmp.eq.s32.totalorder %v1379_v20, 2  ;;  %v1131_v29 = vshrl.u32 %v6354_v7, 16  ;;  %v1128_v47 = vsel %vm1114_vm3, %v1125_v45, %v1127_v61 }
 0x25b   : > { %v1369_v17 = vadd.f32 1.0, %v1368_v11  ;;  %v1376_v12 = vadd.f32 1.0, %v1375_v8  ;;  %vm1381_vm8 = vcmp.eq.s32.totalorder %v1379_v20, 0  ;;  %v1124_v24 = vsel %vm1114_vm3, %v1121_v13, %v1123_v15 }
 0x25c   : > { %v1029_v5 = vsub.s32 %v1025_v2, %v1028_v57  ;;  %v1130_v59 = vand.u32 65535, %v6354_v7  ;;  %v1132_v48 = vand.u32 65535, %v1128_v47  ;;  %vm1378_vm11 = vweird.f32 %v6002_v25 }
 0x25d   : > { %v1377_v50 = vmul.f32 %v1376_v12, %v1361_v0  ;;  %v1385_v30 = vxor.u32 2147483648, %v1369_v17  ;;  %v1133_v21 = vshrl.u32 %v1128_v47, 16  ;;  %v1155_v34 = vshrl.u32 %v1124_v24, 16 }
 0x25e   : > { %vm1030_vm7 = vcmp.lt.s32.totalorder %v1029_v5, 0  ;;  %v1031_v37 = vsub.s32 0, %v1029_v5  ;;  %v6378_v14 = vmul.u32 %v1132_v48, %v1131_v29  ;;  %v1154_v40 = vand.u32 65535, %v1124_v24 }
 0x25f   : > { %v1382_v36 = vxor.u32 2147483648, %v1377_v50  ;;  %v1386_v63 = vsel %vm1384_vm6, %v1385_v30, %v1377_v50  ;;  %v1135_v16 = vmul.u32 %v1133_v21, %v1130_v59  ;;  %v1134_v33 = vmul.u32 %v1132_v48, %v1130_v59 }
 0x260   : > { %v1032_v22 = vsel %vm1030_vm7, %v1031_v37, %v1029_v5  ;;  %v1021_v42 = vadd.s32 %v6297_v9, %v6299_v41  ;;  %v1137_v25 = vmul.u32 %v1133_v21, %v1131_v29  ;;  %v1140_v51 = vshll.u32 %v6378_v14, 16 }
 0x261   : > { %v1383_v0 = vsel %vm1381_vm8, %v1369_v17, %v1382_v36  ;;  %v1033_v53 = vclz %v1032_v22  ;;  %v1138_v27 = vshll.u32 %v1135_v16, 16  ;;  %v6384_v44 = vmul.u32 %v1155_v34, %v1130_v59 }
 0x262   : > { %v1387_v18 = vsel %vm1380_vm4, %v1383_v0, %v1386_v63  ;;  %v1156_v55 = vmul.u32 %v1154_v40, %v1130_v59  ;;  %v6386_v52 = vmul.u32 %v1154_v40, %v1131_v29  ;;  %v1159_v8 = vmul.u32 %v1155_v34, %v1131_v29  ;;  %v570_v63 = vpop.f32.mrf.mxu0  ;;  %v3551_v34 = vpop.permute.xlu2 %3550 }
 0x263   : > { %v1388_v49 = vsel %vm1378_vm11, nan, %v1387_v18  ;;  %v4047_v6 = vadd.s32 4294967294, %v1033_v53  ;;  %vm1142_vm0 = vc.u32 %v1134_v33, %v1138_v27  ;;  %v1144_v20 = vadd.s32 %v1138_v27, %v1134_v33  ;;  %v3548_v53 = vpop.permute.xlu1 %3547 }
 0x264   : > { %v3393_v39 = vadd.f32 1.0, %v1388_v49  ;;  %v1160_v56 = vshll.u32 %v6384_v44, 16  ;;  %v1143_v41 = vsel %vm1142_vm0, 1, %v4417_v3  ;;  %v1139_v12 = vshrl.u32 %v1135_v16, 16 }
 0x265   : > { %vm4048_vm12 = vcmp.lt.s32.totalorder %v4047_v6, 0  ;;  %vm1146_vm14 = vc.u32 %v1144_v20, %v1140_v51  ;;  %v1145_v61 = vadd.s32 %v1143_v41, %v1137_v25  ;;  %v1162_v57 = vshll.u32 %v6386_v52, 16  ;;  %v6442_v20 = vld [vmem:[%s6711_s6] ss:$0 sm:$0xff] }
 0x266   : > { %v3409_v2 = vmul.f32 0.5, %v3393_v39  ;;  %v1036_v62 = vsel %vm4048_vm12, 0, %v4047_v6  ;;  %v1147_v17 = vsel %vm1146_vm14, 1, %v4417_v3  ;;  %vm1164_vm9 = vc.u32 %v1156_v55, %v1160_v56 }
 0x267   : > { %v1037_v19 = vsub.s32 32, %v1036_v62  ;;  %v1038_v11 = vshll.u32 %v1029_v5, %v1036_v62  ;;  %v1041_v9 = vsub.s32 4294967266, %v1036_v62  ;;  %v1149_v30 = vadd.s32 %v1147_v17, %v1145_v61 }
 0x268   : > { %3435 = vperm.xlu1 %4251, %v3409_v2   ;;  %v1165_v47 = vsel %vm1164_vm9, 1, %v4417_v3  ;;  %v1166_v5 = vadd.s32 %v1160_v56, %v1156_v55  ;;  %vm3587_vm10 = vcmp.eq.s32.totalorder %v5917_v32, %v3545_v28  ;;  %v1097_v48 = vshrl.u32 %v4418_v38, %v6313_v43  ;;  %v4155_v38 = vld [vmem:[%s6712_s7 + $0x38] sm:$0xff] }
 0x269   : > { %v1039_v13 = vshrl.u32 %v1021_v42, %v1037_v19  ;;  %v1042_v45 = vadd.s32 127, %v1041_v9  ;;  %v1167_v24 = vadd.s32 %v1165_v47, %v1159_v8  ;;  %v1118_v36 = vsel %vm1116_vm1, %v6343_v54, 2102212464  ;;  %846 = vmatpush.bf16.msra.mxu1 %v4155_v38  ;;  %4159 = vmatpush.bf16.msra.mxu3 %v4155_v38 }
 0x26a   : > { %vm1168_vm13 = vc.u32 %v1166_v5, %v1162_v57  ;;  %v1141_v21 = vshrl.u32 %v6378_v14, 16  ;;  %v1150_v0 = vadd.s32 %v1149_v30, %v1139_v12  ;;  %v4096_v18 = vsel %vm3587_vm10, 1.0, %v4424_v31  ;;  %v572_v62 = vpop.f32.mrf.mxu0  ;;  %v3554_v19 = vpop.permute.xlu2 %3553 }
 0x26b   : > { %v1040_v15 = vor.u32 %v1039_v13, %v1038_v11  ;;  %v1043_v50 = vshll.u32 %v1042_v45, 23  ;;  %v1169_v22 = vsel %vm1168_vm13, 1, %v4417_v3  ;;  %v1161_v43 = vshrl.u32 %v6384_v44, 16 }
 0x26c   : > { %v1171_v16 = vadd.s32 %v1169_v22, %v1167_v24  ;;  %vm3588_vm1 = vcmp.eq.s32.totalorder %v5917_v32, %v3548_v53  ;;  %v1117_v14 = vsel %vm1113_vm15, %v1097_v48, %v6337_v35  ;;  %v1119_v3 = vsel %vm1115_vm2, %v6341_v46, %v1118_v36 }
 0x26d   : > { %v1044_v59 = vor.u32 4788187, %v1043_v50  ;;  %v1047_v29 = vcvt.s32.f32 %v1040_v15  ;;  %vm6415_vm4 = vcmp.le.f32.partialorder %v927_v10, 0.7853982  ;;  %vm929_vm6 = vcmp.lt.s32.totalorder %v6171_v58, 0 }
 0x26e   : > { %v4097_v49 = vsel %vm3588_vm1, 1.0, %v4424_v31  ;;  %v1163_v33 = vshrl.u32 %v6386_v52, 16  ;;  %v6422_v6 = vadd.s32 %v1150_v0, %v1141_v21  ;;  %v6424_v27 = vadd.s32 %v1166_v5, %v1162_v57 }
 0x26f   : > { %v1045_v37 = vand.u32 2147483647, %v1044_v59  ;;  %v3634_v35 = vpack.c.bf16 %v4097_v49, %v4096_v18  ;;  %v1120_v10 = vsel %vm1114_vm3, %v1117_v14, %v1119_v3  ;;  %v1172_v46 = vadd.s32 %v1171_v16, %v1161_v43 }
 0x270   : > { %v1051_v25 = vsub.s32 4, %v6352_v23  ;;  %v1174_v55 = vmul.u32 %v6354_v7, %v1120_v10  ;;  %vm1176_vm15 = vc.u32 %v6422_v6, %v6424_v27  ;;  %vm3589_vm2 = vcmp.eq.s32.totalorder %v5917_v32, %v3551_v34 }
 0x271   : > { %v1048_v54 = vmul.f32 %v1047_v29, %v1045_v37  ;;  %4119 = vmatmul.msk.bf16.gmra.mxu2 %vm3657_vm5, %v3634_v35  ;;  %v1173_v44 = vadd.s32 %v1172_v46, %v1163_v33  ;;  %vm3590_vm3 = vcmp.eq.s32.totalorder %v5917_v32, %v3554_v19  ;;  %v6449_v8 = vadd.f32 %v6442_v20, %v572_v62 }
 0x272   : > { %v1052_v56 = vsel %vm929_vm6, %v1051_v25, %v6352_v23  ;;  %v4098_v12 = vsel %vm3589_vm2, 1.0, %v4424_v31  ;;  %v6455_v23 = vadd.f32 %v6442_v20, %v570_v63  ;;  %v4099_v57 = vsel %vm3590_vm3, 1.0, %v4424_v31 }
 0x273   : > { %v1049_v39 = vxor.u32 2147483648, %v1048_v54  ;;  %v1177_v1 = vadd.s32 1, %v1173_v44  ;;  %v1054_v13 = vsel %vm6415_vm4, 0, %v1052_v56  ;;  %v627_v5 = vand.u32 2147483647, %v6449_v8 }
 0x274   : > { %v1071_v47 = vand.u32 3, %v1054_v13  ;;  %v3635_v29 = vpack.c.bf16 %v4099_v57, %v4098_v12  ;;  %v626_v36 = vand.u32 2147483647, %v6455_v23  ;;  %vm1070_vm0 = vweird.f32 %v6171_v58 }
 0x275   : > { %v1050_v42 = vsel %vm929_vm6, %v1049_v39, %v1048_v54  ;;  %v1178_v7 = vsel %vm1176_vm15, %v1177_v1, %v1173_v44  ;;  %v643_v0 = vsub.f32 0.0, %v627_v5  ;;  %v1175_v10 = vadd.s32 %v6424_v27, %v6422_v6 }
 0x276   : > { %v1053_v51 = vsel %vm6415_vm4, %v6171_v58, %v1050_v42  ;;  %v1179_v41 = vadd.s32 %v1178_v7, %v1174_v55  ;;  %vm1076_vm8 = vcmp.eq.s32.totalorder %v1071_v47, 2  ;;  %v642_v53 = vsub.f32 0.0, %v626_v36  ;;  %v4154_v7 = vld [vmem:[%s6712_s7 + $0x30] sm:$0xff] }
 0x277   : > { %v1055_v2 = vmul.f32 %v1053_v51, %v1053_v51  ;;  %vm1073_vm11 = vcmp.eq.s32.totalorder %v1071_v47, 0  ;;  %vm1072_vm12 = vcmp.lt.s32.totalorder %v1071_v47, 2  ;;  %v660_v3 = vmul.f32 1.442695, %v643_v0  ;;  %847 = vmatpush.bf16.msra.mxu1 %v4154_v7  ;;  %4160 = vmatpush.bf16.msra.mxu3 %v4154_v7 }
 0x278   : > { %v1180_v17 = vadd.s32 536870912, %v1179_v41  ;;  %v658_v33 = vmul.f32 1.442695, %v642_v53  ;;  %vm1083_vm13 = vcmp.lt.s32.totalorder %v6217_v60, 0  ;;  %vm6483_vm1 = vcmp.le.f32.partialorder %v1081_v4, 0.7853982 }
 0x279   : > { %v1056_v52 = vmul.f32 -0.001358992, %v1055_v2  ;;  %v1063_v28 = vmul.f32 -0.00019511016, %v1055_v2  ;;  %4256 = vpow2.f32 %v660_v3 }
 0x27a   : > { %v6458_v30 = vshrl.u32 %v1180_v17, 30  ;;  %4258 = vpow2.f32 %v658_v33  ;;  %v611_v33 = vmax.f32 %v6449_v8, 0.0 }
 0x27b   : > { %v1057_v11 = vadd.f32 0.041655596, %v1056_v52  ;;  %v1064_v9 = vadd.f32 0.008332121, %v1063_v28  ;;  %v3557_v28 = vpop.permute.xlu0 %3556 }
 0x27c   : > { %v1182_v48 = vshll.u32 %v6458_v30, 30  ;;  %vm3591_vm9 = vcmp.eq.s32.totalorder %v5917_v32, %v3557_v28  ;;  %v4149_v28 = vld [vmem:[%s6712_s7 + $0x8] sm:$0xff] }
 0x27d   : > { %v1058_v45 = vmul.f32 %v1057_v11, %v1055_v2  ;;  %v1065_v61 = vmul.f32 %v1064_v9, %v1055_v2  ;;  %v4100_v11 = vsel %vm3591_vm9, 1.0, %v4424_v31  ;;  %v3560_v9 = vpop.permute.xlu1 %3559 }
 0x27e   : > { %v1183_v63 = vsub.s32 %v1179_v41, %v1182_v48  ;;  %vm3592_vm10 = vcmp.eq.s32.totalorder %v5917_v32, %v3560_v9 }
 0x27f   : > { %v1059_v15 = vadd.f32 -0.4999988, %v1058_v45  ;;  %v1066_v50 = vadd.f32 -0.16666654, %v1065_v61  ;;  %v4257_v52 = vpop.eup %4256  ;;  %v575_v45 = vpop.f32.mrf.mxu0  ;;  %v4153_v61 = vld [vmem:[%s6712_s7 + $0x28] sm:$0xff]  ;;  %v4101_v17 = vsel %vm3592_vm10, 1.0, %v4424_v31 }
 0x280   : > { %vm1184_vm7 = vcmp.lt.s32.totalorder %v1183_v63, 0  ;;  %v1185_v18 = vsub.s32 0, %v1183_v63  ;;  %v4259_v6 = vpop.eup %4258  ;;  %v691_v27 = vadd.f32 1.0, %v4257_v52  ;;  %v6479_v12 = vadd.f32 %v6442_v20, %v575_v45  ;;  %848 = vmatpush.bf16.msra.mxu1 %v4153_v61  ;;  %4161 = vmatpush.bf16.msra.mxu3 %v4153_v61 }
 0x281   : > { %v1060_v24 = vmul.f32 %v1059_v15, %v1055_v2  ;;  %v1067_v59 = vmul.f32 %v1066_v50, %v1055_v2  ;;  %4120 = vmatmul.msk.bf16.gmra.mxu2 %vm3657_vm5, %v3635_v29  ;;  %v690_v41 = vadd.f32 1.0, %v4259_v6  ;;  %v3636_v50 = vpack.c.bf16 %v4101_v17, %v4100_v11 }
 0x282   : > { %v1186_v16 = vsel %vm1184_vm7, %v1185_v18, %v1183_v63  ;;  %4260 = vlog2.f32 %v691_v27  ;;  %v628_v47 = vand.u32 2147483647, %v6479_v12 }
 0x283   : > { %v1061_v37 = vadd.f32 1.0, %v1060_v24  ;;  %v1068_v21 = vadd.f32 1.0, %v1067_v59  ;;  %v1187_v54 = vclz %v1186_v16  ;;  %4262 = vlog2.f32 %v690_v41  ;;  %v4152_v59 = vld [vmem:[%s6712_s7 + $0x20] sm:$0xff]  ;;  %v3563_v16 = vpop.permute.xlu2 %3562 }
 0x284   : > { %v1205_v24 = vsub.s32 4, %v6458_v30  ;;  %v644_v29 = vsub.f32 0.0, %v628_v47  ;;  %849 = vmatpush.bf16.msra.mxu1 %v4152_v59  ;;  %4162 = vmatpush.bf16.msra.mxu3 %v4152_v59  ;;  %vm3593_vm4 = vcmp.eq.s32.totalorder %v5917_v32, %v3563_v16 }
 0x285   : > { %v1069_v22 = vmul.f32 %v1068_v21, %v1053_v51  ;;  %v1077_v34 = vxor.u32 2147483648, %v1061_v37  ;;  %v4050_v49 = vadd.s32 4294967294, %v1187_v54  ;;  %v3566_v54 = vpop.permute.xlu0 %3565 }
 0x286   : > { %v662_v36 = vmul.f32 1.442695, %v644_v29  ;;  %v1206_v21 = vsel %vm1083_vm13, %v1205_v24, %v6458_v30  ;;  %vm3594_vm6 = vcmp.eq.s32.totalorder %v5917_v32, %v3566_v54 }
 0x287   : > { %v1074_v38 = vxor.u32 2147483648, %v1069_v22  ;;  %v1078_v43 = vsel %vm1076_vm8, %v1077_v34, %v1069_v22  ;;  %vm4051_vm14 = vcmp.lt.s32.totalorder %v4050_v49, 0  ;;  %v577_v22 = vpop.f32.mrf.mxu0  ;;  %v4151_v34 = vld [vmem:[%s6712_s7 + $0x18] sm:$0xff]  ;;  %vm1224_vm8 = vweird.f32 %v6217_v60 }
 0x288   : > { %v1190_v46 = vsel %vm4051_vm14, 0, %v4050_v49  ;;  %4264 = vpow2.f32 %v662_v36  ;;  %v6507_v30 = vadd.f32 %v6442_v20, %v577_v22  ;;  %850 = vmatpush.bf16.msra.mxu1 %v4151_v34  ;;  %v4150_v49 = vld [vmem:[%s6712_s7 + $0x10] sm:$0xff]  ;;  %4163 = vmatpush.bf16.msra.mxu3 %v4151_v34 }
 0x289   : > { %v1075_v14 = vsel %vm1073_vm11, %v1061_v37, %v1074_v38  ;;  %v1191_v25 = vsub.s32 32, %v1190_v46  ;;  %v1192_v51 = vshll.u32 %v1183_v63, %v1190_v46  ;;  %v1195_v44 = vsub.s32 4294967266, %v1190_v46  ;;  %v4261_v37 = vpop.eup %4260 }
 0x28a   : > { %v1079_v40 = vsel %vm1072_vm12, %v1075_v14, %v1078_v43  ;;  %v4263_v18 = vpop.eup %4262  ;;  %v1208_v43 = vsel %vm6483_vm1, 0, %v1206_v21  ;;  %v709_v14 = vmul.f32 0.6931472, %v4261_v37 }
 0x28b   : > { %v1080_v39 = vsel %vm1070_vm0, nan, %v1079_v40  ;;  %v1193_v58 = vshrl.u32 %v1175_v10, %v1191_v25  ;;  %v1196_v2 = vadd.s32 127, %v1195_v44  ;;  %v610_v10 = vmax.f32 %v6455_v23, 0.0  ;;  %v3572_v21 = vpop.permute.xlu2 %3571 }
 0x28c   : > { %v3391_v35 = vadd.f32 1.0, %v1080_v39  ;;  %v629_v39 = vand.u32 2147483647, %v6507_v30  ;;  %v1225_v25 = vand.u32 3, %v1208_v43  ;;  %v4102_v44 = vsel %vm3593_vm4, 1.0, %v4424_v31  ;;  %851 = vmatpush.bf16.msra.mxu1 %v4150_v49  ;;  %4164 = vmatpush.bf16.msra.mxu3 %v4150_v49 }
 0x28d   : > { %v1194_v55 = vor.u32 %v1193_v58, %v1192_v51  ;;  %v1197_v1 = vshll.u32 %v1196_v2, 23  ;;  %v4103_v58 = vsel %vm3594_vm6, 1.0, %v4424_v31  ;;  %vm3596_vm7 = vcmp.eq.s32.totalorder %v5917_v32, %v3572_v21 }
 0x28e   : > { %v3407_v42 = vmul.f32 0.5, %v3391_v35  ;;  %v707_v35 = vmul.f32 0.6931472, %v4263_v18  ;;  %v4265_v51 = vpop.eup %4264  ;;  %v645_v2 = vsub.f32 0.0, %v629_v39  ;;  %v3637_v27 = vpack.c.bf16 %v4103_v58, %v4102_v44 }
 0x28f   : > { %v1198_v62 = vor.u32 4788187, %v1197_v1  ;;  %v1201_v56 = vcvt.s32.f32 %v1194_v55  ;;  %v739_v55 = vadd.f32 %v709_v14, %v611_v33  ;;  %v580_v8 = vpop.f32.mrf.mxu0  ;;  %vm1230_vm15 = vcmp.eq.s32.totalorder %v1225_v25, 2 }
 0x290   : > { %3425 = vperm.xlu0 %4250, %v3407_v42   ;;  %v738_v23 = vadd.f32 %v707_v35, %v610_v10  ;;  %v6523_v7 = vadd.f32 %v6442_v20, %v580_v8  ;;  %852 = vmatpush.bf16.msra.mxu1 %v4149_v28  ;;  %vm1227_vm2 = vcmp.eq.s32.totalorder %v1225_v25, 0  ;;  %vm1226_vm3 = vcmp.lt.s32.totalorder %v1225_v25, 2 }
 0x291   : > { %v1199_v19 = vand.u32 2147483647, %v1198_v62  ;;  %4121 = vmatmul.msk.bf16.gmra.mxu2 %vm3657_vm5, %v3636_v50  ;;  %v664_v62 = vmul.f32 1.442695, %v645_v2  ;;  %v3999_v11 = vadd.f32 -0.6931472, %v739_v55  ;;  %4165 = vmatpush.bf16.msra.mxu3 %v4149_v28  ;;  %v3575_v28 = vpop.permute.xlu0 %3574 }
 0x292   : > { %v630_v45 = vand.u32 2147483647, %v6523_v7  ;;  %v3998_v61 = vadd.f32 -0.6931472, %v738_v23  ;;  %v4105_v18 = vsel %vm3596_vm7, 1.0, %v4424_v31  ;;  %v612_v14 = vmax.f32 %v6479_v12, 0.0 }
 0x293   : > { %v1202_v13 = vmul.f32 %v1201_v56, %v1199_v19  ;;  %v692_v19 = vadd.f32 1.0, %v4265_v51  ;;  %4266 = vpow2.f32 %v664_v62  ;;  %v613_v39 = vmax.f32 %v6507_v30, 0.0  ;;  %v3581_v21 = vpop.permute.xlu2 %3580 }
 0x294   : > { %v770_v50 = vpack.c.bf16 %v3999_v11, %v3998_v61  ;;  %vm3597_vm12 = vcmp.eq.s32.totalorder %v5917_v32, %v3575_v28  ;;  %v614_v11 = vmax.f32 %v6523_v7, 0.0  ;;  %vm3599_vm14 = vcmp.eq.s32.totalorder %v5917_v32, %v3581_v21 }
 0x295   : > { %v1203_v15 = vxor.u32 2147483648, %v1202_v13  ;;  %4268 = vlog2.f32 %v692_v19 }
 0x297   : > { %v1204_v5 = vsel %vm1083_vm13, %v1203_v15, %v1202_v13  ;;  %v4148_v13 = vld [vmem:[%s6712_s7] sm:$0xff]  ;;  %v646_v15 = vsub.f32 0.0, %v630_v45 }
 0x298   : > { %v1207_v4 = vsel %vm6483_vm1, %v6217_v60, %v1204_v5  ;;  %853 = vmatpush.bf16.msra.mxu1 %v4148_v13  ;;  %v582_v5 = vpop.f32.mrf.mxu0  ;;  %4166 = vmatpush.bf16.msra.mxu3 %v4148_v13 }
 0x299   : > { %v1209_v48 = vmul.f32 %v1207_v4, %v1207_v4  ;;  %v4267_v24 = vpop.eup %4266  ;;  %v6532_v29 = vadd.f32 %v6442_v20, %v582_v5 }
 0x29a   : > { %v693_v36 = vadd.f32 1.0, %v4267_v24 }
 0x29b   : > { %v1210_v63 = vmul.f32 -0.001358992, %v1209_v48  ;;  %v1217_v0 = vmul.f32 -0.00019511016, %v1209_v48  ;;  %v631_v60 = vand.u32 2147483647, %v6532_v29  ;;  %854 = vmatmul.bf16.vlgmr.msra.gmra.mxu1 %v770_v50 }
 0x29c   : > { %v615_v13 = vmax.f32 %v6532_v29, 0.0 }
 0x29d   : > { %v1211_v53 = vadd.f32 0.041655596, %v1210_v63  ;;  %v1218_v38 = vadd.f32 0.008332121, %v1217_v0  ;;  %v3569_v63 = vpop.permute.xlu1 %3568  ;;  %v4269_v0 = vpop.eup %4268  ;;  %v647_v34 = vsub.f32 0.0, %v631_v60 }
 0x29e   : > { %vm3595_vm11 = vcmp.eq.s32.totalorder %v5917_v32, %v3569_v63  ;;  %v711_v43 = vmul.f32 0.6931472, %v4269_v0  ;;  %v3584_v63 = vpop.permute.xlu0 %3583 }
 0x29f   : > { %v1212_v3 = vmul.f32 %v1211_v53, %v1209_v48  ;;  %v1219_v40 = vmul.f32 %v1218_v38, %v1209_v48  ;;  %v4104_v53 = vsel %vm3595_vm11, 1.0, %v4424_v31  ;;  %v668_v38 = vmul.f32 1.442695, %v647_v34 }
 0x2a0   : > { %v585_v16 = vpop.f32.mrf.mxu0  ;;  %v3638_v49 = vpack.c.bf16 %v4105_v18, %v4104_v53  ;;  %vm3600_vm9 = vcmp.eq.s32.totalorder %v5917_v32, %v3584_v63 }
 0x2a1   : > { %v1213_v46 = vadd.f32 -0.4999988, %v1212_v3  ;;  %v1220_v42 = vadd.f32 -0.16666654, %v1219_v40  ;;  %4122 = vmatmul.msk.bf16.gmra.mxu2 %vm3657_vm5, %v3637_v27  ;;  %v6541_v3 = vadd.f32 %v6442_v20, %v585_v16  ;;  %v4106_v27 = vsel %vm3597_vm12, 1.0, %v4424_v31 }
 0x2a3   : > { %v1214_v1 = vmul.f32 %v1213_v46, %v1209_v48  ;;  %v1221_v52 = vmul.f32 %v1220_v42, %v1209_v48  ;;  %v632_v35 = vand.u32 2147483647, %v6541_v3  ;;  %v740_v46 = vadd.f32 %v711_v43, %v612_v14 }
 0x2a4   : > { %v4109_v43 = vsel %vm3600_vm9, 1.0, %v4424_v31  ;;  %v616_v16 = vmax.f32 %v6541_v3, 0.0 }
 0x2a5   : > { %v1215_v56 = vadd.f32 1.0, %v1214_v1  ;;  %v1222_v6 = vadd.f32 1.0, %v1221_v52  ;;  %v648_v42 = vsub.f32 0.0, %v632_v35  ;;  %v4000_v44 = vadd.f32 -0.6931472, %v740_v46  ;;  %v3578_v1 = vpop.permute.xlu1 %3577 }
 0x2a6   : > { %vm3598_vm0 = vcmp.eq.s32.totalorder %v5917_v32, %v3578_v1 }
 0x2a7   : > { %v1223_v9 = vmul.f32 %v1222_v6, %v1207_v4  ;;  %v1231_v41 = vxor.u32 2147483648, %v1215_v56  ;;  %v666_v4 = vmul.f32 1.442695, %v646_v15  ;;  %v670_v12 = vmul.f32 1.442695, %v648_v42 }
 0x2a8   : > { %v587_v55 = vpop.f32.mrf.mxu0  ;;  %v4107_v19 = vsel %vm3598_vm0, 1.0, %v4424_v31 }
 0x2a9   : > { %v1228_v17 = vxor.u32 2147483648, %v1223_v9  ;;  %v1232_v57 = vsel %vm1230_vm15, %v1231_v41, %v1223_v9  ;;  %4270 = vpow2.f32 %v666_v4  ;;  %v6547_v52 = vadd.f32 %v6442_v20, %v587_v55 }
 0x2aa   : > { %4272 = vlog2.f32 %v693_v36  ;;  %v3639_v50 = vpack.c.bf16 %v4107_v19, %v4106_v27 }
 0x2ab   : > { %v1229_v47 = vsel %vm1227_vm2, %v1215_v56, %v1228_v17  ;;  %4274 = vpow2.f32 %v668_v38  ;;  %v633_v62 = vand.u32 2147483647, %v6547_v52  ;;  %v4108_v38 = vsel %vm3599_vm14, 1.0, %v4424_v31 }
 0x2ac   : > { %v1233_v59 = vsel %vm1226_vm3, %v1229_v47, %v1232_v57 }
 0x2ad   : > { %v1234_v48 = vsel %vm1224_vm8, nan, %v1233_v59  ;;  %v649_v23 = vsub.f32 0.0, %v633_v62 }
 0x2ae   : > { %v3392_v37 = vadd.f32 1.0, %v1234_v48 }
 0x2af   : > { %v4271_v54 = vpop.eup %4270  ;;  %v672_v9 = vmul.f32 1.442695, %v649_v23 }
 0x2b0   : > { %v3408_v22 = vmul.f32 0.5, %v3392_v37  ;;  %v4273_v40 = vpop.eup %4272  ;;  %v694_v33 = vadd.f32 1.0, %v4271_v54  ;;  %v590_v61 = vpop.f32.mrf.mxu0 }
 0x2b1   : > { %v713_v10 = vmul.f32 0.6931472, %v4273_v40  ;;  %4123 = vmatmul.msk.bf16.gmra.mxu2 %vm3657_vm5, %v3638_v49  ;;  %v4275_v51 = vpop.eup %4274  ;;  %v6557_v17 = vadd.f32 %v6442_v20, %v590_v61  ;;  %v617_v40 = vmax.f32 %v6547_v52, 0.0 }
 0x2b2   : > { %3430 = vperm.xlu1 %4251, %v3408_v22   ;;  %4276 = vlog2.f32 %v694_v33  ;;  %v695_v2 = vadd.f32 1.0, %v4275_v51 }
 0x2b3   : > { %v741_v25 = vadd.f32 %v713_v10, %v613_v39  ;;  %4278 = vpow2.f32 %v670_v12  ;;  %v634_v47 = vand.u32 2147483647, %v6557_v17  ;;  %v3640_v10 = vpack.c.bf16 %v4109_v43, %v4108_v38 }
 0x2b4   : > { %4280 = vlog2.f32 %v695_v2  ;;  %v618_v62 = vmax.f32 %v6557_v17, 0.0 }
 0x2b5   : > { %v4001_v58 = vadd.f32 -0.6931472, %v741_v25  ;;  %4282 = vpow2.f32 %v672_v9  ;;  %v650_v7 = vsub.f32 0.0, %v634_v47 }
 0x2b7   : > { %v771_v30 = vpack.c.bf16 %v4001_v58, %v4000_v44  ;;  %v674_v29 = vmul.f32 1.442695, %v650_v7 }
 0x2b8   : > { %v4277_v8 = vpop.eup %4276  ;;  %v592_v37 = vpop.f32.mrf.mxu0 }
 0x2b9   : > { %859 = vmatmul.bf16.gmra.mxu1 %v771_v30  ;;  %v715_v56 = vmul.f32 0.6931472, %v4277_v8  ;;  %v4279_v6 = vpop.eup %4278  ;;  %v593_v60 = vadd.f32 %v6442_v20, %v592_v37 }
 0x2ba   : > { %v4281_v41 = vpop.eup %4280  ;;  %v696_v45 = vadd.f32 1.0, %v4279_v6 }
 0x2bb   : > { %v717_v57 = vmul.f32 0.6931472, %v4281_v41  ;;  %v742_v15 = vadd.f32 %v715_v56, %v614_v11  ;;  %v4283_v4 = vpop.eup %4282  ;;  %v635_v22 = vand.u32 2147483647, %v593_v60  ;;  %v619_v6 = vmax.f32 %v593_v60, 0.0 }
 0x2bc   : > { %4284 = vlog2.f32 %v696_v45  ;;  %v697_v36 = vadd.f32 1.0, %v4283_v4 }
 0x2bd   : > { %v743_v5 = vadd.f32 %v717_v57, %v615_v13  ;;  %v4002_v24 = vadd.f32 -0.6931472, %v742_v15  ;;  %4286 = vpow2.f32 %v674_v29  ;;  %v651_v34 = vsub.f32 0.0, %v635_v22 }
 0x2be   : > { %4288 = vlog2.f32 %v697_v36 }
 0x2bf   : > { %v4003_v59 = vadd.f32 -0.6931472, %v743_v5  ;;  %v676_v54 = vmul.f32 1.442695, %v651_v34 }
 0x2c0   : > { %v595_v33 = vpop.f32.mrf.mxu0 }
 0x2c1   : > { %4124 = vmatmul.msk.bf16.gmra.mxu2 %vm3657_vm5, %v3639_v50  ;;  %v772_v48 = vpack.c.bf16 %v4003_v59, %v4002_v24  ;;  %4290 = vpow2.f32 %v676_v54  ;;  %v6569_v39 = vadd.f32 %v6442_v20, %v595_v33 }
 0x2c2   : > { %v4285_v0 = vpop.eup %4284 }
 0x2c3   : > { %v719_v18 = vmul.f32 0.6931472, %v4285_v0  ;;  %v4287_v53 = vpop.eup %4286  ;;  %v636_v46 = vand.u32 2147483647, %v6569_v39  ;;  %v620_v37 = vmax.f32 %v6569_v39, 0.0 }
 0x2c4   : > { %v4289_v14 = vpop.eup %4288  ;;  %v698_v49 = vadd.f32 1.0, %v4287_v53 }
 0x2c5   : > { %v721_v32 = vmul.f32 0.6931472, %v4289_v14  ;;  %v744_v35 = vadd.f32 %v719_v18, %v616_v16  ;;  %v652_v31 = vsub.f32 0.0, %v636_v46 }
 0x2c6   : > { %4292 = vlog2.f32 %v698_v49 }
 0x2c7   : > { %v745_v42 = vadd.f32 %v721_v32, %v617_v40  ;;  %v4004_v3 = vadd.f32 -0.6931472, %v744_v35  ;;  %v4291_v51 = vpop.eup %4290  ;;  %v678_v12 = vmul.f32 1.442695, %v652_v31 }
 0x2c8   : > { %v699_v58 = vadd.f32 1.0, %v4291_v51  ;;  %v597_v2 = vpop.f32.mrf.mxu0 }
 0x2c9   : > { %864 = vmatmul.bf16.gmra.mxu1 %v772_v48  ;;  %v4005_v25 = vadd.f32 -0.6931472, %v745_v42  ;;  %4294 = vpow2.f32 %v678_v12  ;;  %v598_v55 = vadd.f32 %v6442_v20, %v597_v2 }
 0x2ca   : > { %4296 = vlog2.f32 %v699_v58 }
 0x2cb   : > { %v773_v44 = vpack.c.bf16 %v4005_v25, %v4004_v3  ;;  %v637_v52 = vand.u32 2147483647, %v598_v55  ;;  %v621_v60 = vmax.f32 %v598_v55, 0.0 }
 0x2cc   : > { %v4293_v1 = vpop.eup %4292 }
 0x2cd   : > { %v653_v30 = vsub.f32 0.0, %v637_v52  ;;  %v723_v8 = vmul.f32 0.6931472, %v4293_v1  ;;  %v6582_v52 = vpop.permute.xlu0 %3485 }
 0x2cf   : > { %v4295_v28 = vpop.eup %4294  ;;  %v680_v23 = vmul.f32 1.442695, %v653_v30  ;;  %v746_v41 = vadd.f32 %v723_v8, %v618_v62 }
 0x2d0   : > { %v4297_v56 = vpop.eup %4296  ;;  %v700_v27 = vadd.f32 1.0, %v4295_v28  ;;  %v600_v19 = vpop.f32.mrf.mxu0 }
 0x2d1   : > { %4125 = vmatmul.msk.bf16.gmra.mxu2 %vm3657_vm5, %v3640_v10  ;;  %4298 = vpow2.f32 %v680_v23  ;;  %v601_v11 = vadd.f32 %v6442_v20, %v600_v19  ;;  %v725_v9 = vmul.f32 0.6931472, %v4297_v56  ;;  %v4006_v57 = vadd.f32 -0.6931472, %v746_v41 }
 0x2d2   : > { %4300 = vlog2.f32 %v700_v27 }
 0x2d3   : > { %v638_v13 = vand.u32 2147483647, %v601_v11  ;;  %v747_v45 = vadd.f32 %v725_v9, %v619_v6  ;;  %v622_v25 = vmax.f32 %v601_v11, 0.0 }
 0x2d5   : > { %v654_v61 = vsub.f32 0.0, %v638_v13  ;;  %v4007_v15 = vadd.f32 -0.6931472, %v747_v45  ;;  %v6586_v27 = vpop.permute.xlu0 %3480 }
 0x2d7   : > { %v4299_v50 = vpop.eup %4298  ;;  %v682_v47 = vmul.f32 1.442695, %v654_v61  ;;  %v774_v5 = vpack.c.bf16 %v4007_v15, %v4006_v57  ;;  %v3691_v61 = vpop.f32.mrf.mxu2 }
 0x2d8   : > { %v701_v17 = vadd.f32 1.0, %v4299_v50  ;;  %v602_v7 = vpop.f32.mrf.mxu0  ;;  %v4301_v59 = vpop.eup %4300 }
 0x2d9   : > { %869 = vmatmul.bf16.gmra.mxu1 %v773_v44  ;;  %4302 = vpow2.f32 %v682_v47  ;;  %v603_v24 = vadd.f32 %v6442_v20, %v602_v7  ;;  %v727_v48 = vmul.f32 0.6931472, %v4301_v59  ;;  %v6580_v44 = vpop.permute.xlu1 %3495  ;;  %v6590_v7 = vpop.permute.xlu2 %3500 }
 0x2da   : > { %4304 = vlog2.f32 %v701_v17 }
 0x2db   : > { %v639_v4 = vand.u32 2147483647, %v603_v24  ;;  %v748_v53 = vadd.f32 %v727_v48, %v620_v37  ;;  %v623_v2 = vmax.f32 %v603_v24, 0.0  ;;  %v6597_v48 = vld [vmem:[%s6713_s8] ss:$0 sm:$0xff] }
 0x2dd   : > { %v655_v29 = vsub.f32 0.0, %v639_v4  ;;  %v4008_v54 = vadd.f32 -0.6931472, %v748_v53 }
 0x2df   : > { %v4303_v36 = vpop.eup %4302  ;;  %v684_v21 = vmul.f32 1.442695, %v655_v29  ;;  %v3693_v24 = vpop.f32.mrf.mxu2 }
 0x2e0   : > { %v4305_v63 = vpop.eup %4304  ;;  %v702_v0 = vadd.f32 1.0, %v4303_v36  ;;  %v605_v22 = vpop.f32.mrf.mxu0 }
 0x2e1   : > { %4306 = vpow2.f32 %v684_v21  ;;  %v606_v34 = vadd.f32 %v6442_v20, %v605_v22  ;;  %v729_v18 = vmul.f32 0.6931472, %v4305_v63  ;;  %v6584_v6 = vpop.permute.xlu1 %3490  ;;  %v6592_v29 = vpop.permute.xlu2 %3475 }
 0x2e2   : > { %4308 = vlog2.f32 %v702_v0 }
 0x2e3   : > { %v640_v38 = vand.u32 2147483647, %v606_v34  ;;  %v749_v43 = vadd.f32 %v729_v18, %v621_v60  ;;  %v624_v11 = vmax.f32 %v606_v34, 0.0 }
 0x2e5   : > { %v656_v16 = vsub.f32 0.0, %v640_v38  ;;  %v4009_v14 = vadd.f32 -0.6931472, %v749_v43 }
 0x2e7   : > { %v4307_v40 = vpop.eup %4306  ;;  %v686_v49 = vmul.f32 1.442695, %v656_v16  ;;  %v775_v33 = vpack.c.bf16 %v4009_v14, %v4008_v54 }
 0x2e8   : > { %v703_v39 = vadd.f32 1.0, %v4307_v40  ;;  %v607_v32 = vpop.f32.mrf.mxu0  ;;  %v4309_v10 = vpop.eup %4308 }
 0x2e9   : > { %874 = vmatmul.bf16.gmra.mxu1 %v774_v5  ;;  %4310 = vpow2.f32 %v686_v49  ;;  %v608_v35 = vadd.f32 %v6442_v20, %v607_v32  ;;  %v731_v31 = vmul.f32 0.6931472, %v4309_v10  ;;  %v6588_v15 = vpop.permute.xlu1 %3465  ;;  %v3456_v5 = vpop.permute.xlu0 %3455 }
 0x2ea   : > { %4312 = vlog2.f32 %v703_v39  ;;  %v6602_v34 = vpop.permute.xlu2 %3470 }
 0x2eb   : > { %v641_v46 = vand.u32 2147483647, %v608_v35  ;;  %v750_v1 = vadd.f32 %v731_v31, %v622_v25  ;;  %v625_v41 = vmax.f32 %v608_v35, 0.0 }
 0x2ed   : > { %v657_v42 = vsub.f32 0.0, %v641_v46  ;;  %v4010_v30 = vadd.f32 -0.6931472, %v750_v1 }
 0x2ef   : > { %v4311_v3 = vpop.eup %4310  ;;  %v688_v51 = vmul.f32 1.442695, %v657_v42 }
 0x2f0   : > { %v4313_v12 = vpop.eup %4312  ;;  %v704_v58 = vadd.f32 1.0, %v4311_v3 }
 0x2f1   : > { %4314 = vpow2.f32 %v688_v51  ;;  %v733_v55 = vmul.f32 0.6931472, %v4313_v12  ;;  %v3461_v59 = vpop.permute.xlu1 %3460  ;;  %v3451_v4 = vpop.permute.xlu0 %3450 }
 0x2f2   : > { %4316 = vlog2.f32 %v704_v58  ;;  %v3446_v40 = vpop.permute.xlu2 %3445 }
 0x2f3   : > { %v751_v20 = vadd.f32 %v733_v55, %v623_v2 }
 0x2f4   : > { %v3696_v36 = vpop.f32.mrf.mxu2 }
 0x2f5   : > { %v4011_v8 = vadd.f32 -0.6931472, %v751_v20 }
 0x2f7   : > { %v4315_v28 = vpop.eup %4314  ;;  %v776_v62 = vpack.c.bf16 %v4011_v8, %v4010_v30 }
 0x2f8   : > { %v705_v23 = vadd.f32 1.0, %v4315_v28  ;;  %v4317_v56 = vpop.eup %4316 }
 0x2f9   : > { %879 = vmatmul.bf16.gmra.mxu1 %v775_v33  ;;  %884 = vmatmul.bf16.vlgmr.msra.gmra.mxu3 %v776_v62  ;;  %v735_v19 = vmul.f32 0.6931472, %v4317_v56  ;;  %v3436_v37 = vpop.permute.xlu1 %3435 }
 0x2fa   : > { %4318 = vlog2.f32 %v705_v23  ;;  %v3441_v42 = vpop.permute.xlu2 %3440 }
 0x2fb   : > { %v752_v45 = vadd.f32 %v735_v19, %v624_v11 }
 0x2fc   : > { %v3698_v18 = vpop.f32.mrf.mxu2 }
 0x2fd   : > { %v4012_v50 = vadd.f32 -0.6931472, %v752_v45 }
 0x300   : > { %v4319_v9 = vpop.eup %4318 }
 0x301   : > { %v737_v13 = vmul.f32 0.6931472, %v4319_v9 }
 0x302   : > { %v3426_v60 = vpop.permute.xlu0 %3425 }
 0x303   : > { %v753_v57 = vadd.f32 %v737_v13, %v625_v41 }
 0x304   : > { %v3701_v39 = vpop.f32.mrf.mxu2 }
 0x305   : > { %v4013_v47 = vadd.f32 -0.6931472, %v753_v57 }
 0x307   : > { %v777_v17 = vpack.c.bf16 %v4013_v47, %v4012_v50 }
 0x309   : > { %889 = vmatmul.bf16.gmra.mxu3 %v777_v17 }
 0x30c   : > { %v3703_v3 = vpop.f32.mrf.mxu2 }
 0x314   : > { %v3706_v1 = vpop.f32.mrf.mxu2 }
 0x318   : > { %v855_v21 = vpop.f32.mrf.mxu1 }
 0x319   : > { %v856_v63 = vadd.f32 %v6597_v48, %v855_v21 }
 0x31b   : > { %v3503_v0 = vmul.f32 %v3426_v60, %v856_v63 }
 0x31c   : > { %v3708_v23 = vpop.f32.mrf.mxu2 }
 0x31d   : > { %v6600_v22 = vmul.f32 %v3691_v61, %v3503_v0 }
 0x320   : > { %v857_v53 = vpop.f32.mrf.mxu1 }
 0x321   : > { %v858_v38 = vadd.f32 %v6597_v48, %v857_v53 }
 0x324   : > { %v3431_v43 = vpop.permute.xlu1 %3430  ;;  %v3711_v13 = vpop.f32.mrf.mxu2 }
 0x325   : > { %v3504_v16 = vmul.f32 %v3431_v43, %v858_v38 }
 0x327   : > { %v6605_v54 = vmul.f32 %v3693_v24, %v3504_v16 }
 0x329   : > { %v3747_v14 = vpack.c.bf16 %v6605_v54, %v6600_v22  ;;  %v3777_v22 = vld [vmem:[%s4573_s17 + $0x8] sm:$0xff] }
 0x32c   : > { %v3713_v47 = vpop.f32.mrf.mxu2 }
 0x334   : > { %v3716_v17 = vpop.f32.mrf.mxu2 }
 0x336   : > { %v860_v49 = vpop.f32.mrf.mxu1 }
 0x337   : > { %v861_v33 = vadd.f32 %v6597_v48, %v860_v49 }
 0x339   : > { %v3505_v32 = vmul.f32 %v3436_v37, %v861_v33 }
 0x33b   : > { %v6610_v35 = vmul.f32 %v3696_v36, %v3505_v32 }
 0x33c   : > { %v3718_v24 = vpop.f32.mrf.mxu2 }
 0x33e   : > { %v862_v10 = vpop.f32.mrf.mxu1 }
 0x33f   : > { %v863_v46 = vadd.f32 %v6597_v48, %v862_v10 }
 0x341   : > { %v3506_v31 = vmul.f32 %v3441_v42, %v863_v46 }
 0x343   : > { %v6613_v25 = vmul.f32 %v3698_v18, %v3506_v31 }
 0x344   : > { %v3721_v36 = vpop.f32.mrf.mxu2 }
 0x345   : > { %v3748_v51 = vpack.c.bf16 %v6613_v25, %v6610_v35  ;;  %v3776_v35 = vld [vmem:[%s4573_s17] sm:$0xff] }
 0x346   : > { %v865_v12 = vpop.f32.mrf.mxu1 }
 0x347   : > { %v866_v58 = vadd.f32 %v6597_v48, %v865_v12 }
 0x349   : > { %v3507_v2 = vmul.f32 %v3446_v40, %v866_v58 }
 0x34b   : > { %v6618_v55 = vmul.f32 %v3701_v39, %v3507_v2 }
 0x34c   : > { %v3723_v63 = vpop.f32.mrf.mxu2 }
 0x34e   : > { %v867_v20 = vpop.f32.mrf.mxu1 }
 0x34f   : > { %v868_v30 = vadd.f32 %v6597_v48, %v867_v20 }
 0x351   : > { %v3508_v8 = vmul.f32 %v3451_v4, %v868_v30 }
 0x353   : > { %v3736_v28 = vmul.f32 %v3703_v3, %v3508_v8 }
 0x354   : > { %v3726_v53 = vpop.f32.mrf.mxu2 }
 0x355   : > { %v3749_v62 = vpack.c.bf16 %v3736_v28, %v6618_v55 }
 0x356   : > { %v870_v56 = vpop.f32.mrf.mxu1 }
 0x357   : > { %v871_v19 = vadd.f32 %v6597_v48, %v870_v56 }
 0x359   : > { %v3509_v9 = vmul.f32 %v3456_v5, %v871_v19  ;;  %v3778_v19 = vld [vmem:[%s4573_s17 + $0x10] sm:$0xff] }
 0x35b   : > { %v3737_v61 = vmul.f32 %v3706_v1, %v3509_v9 }
 0x35c   : > { %v3728_v10 = vpop.f32.mrf.mxu2 }
 0x35e   : > { %v872_v11 = vpop.f32.mrf.mxu1 }
 0x35f   : > { %v873_v41 = vadd.f32 %v6597_v48, %v872_v11 }
 0x361   : > { %v3510_v45 = vmul.f32 %v3461_v59, %v873_v41  ;;  %v3779_v41 = vld [vmem:[%s4573_s17 + $0x18] sm:$0xff] }
 0x363   : > { %v3738_v57 = vmul.f32 %v3708_v23, %v3510_v45 }
 0x365   : > { %v3750_v50 = vpack.c.bf16 %v3738_v57, %v3737_v61 }
 0x366   : > { %v875_v4 = vpop.f32.mrf.mxu1 }
 0x367   : > { %v876_v55 = vadd.f32 %v6597_v48, %v875_v4 }
 0x36e   : > { %v877_v21 = vpop.f32.mrf.mxu1 }
 0x36f   : > { %v878_v12 = vadd.f32 %v6597_v48, %v877_v21 }
 0x376   : > { %v880_v0 = vpop.f32.mrf.mxu1 }
 0x377   : > { %v881_v46 = vadd.f32 %v6597_v48, %v880_v0 }
 0x379   : > { %v3513_v1 = vmul.f32 %v6592_v29, %v881_v46  ;;  %v3756_v29 = vshrl.u32 %v3519_v26, 7  ;;  %v4425_v26 = vmov 1.0|1.0  }
 0x37b   : > { %v3741_v8 = vmul.f32 %v3716_v17, %v3513_v1 }
 0x37c   : > { %v885_v37 = vpop.f32.mrf.mxu3 }
 0x37d   : > { %v886_v16 = vadd.f32 %v6597_v48, %v885_v37 }
 0x37e   : > { %v882_v59 = vpop.f32.mrf.mxu1 }
 0x37f   : > { %v883_v33 = vadd.f32 %v6597_v48, %v882_v59  ;;  %v3515_v42 = vmul.f32 %v6582_v52, %v886_v16  ;;  %v3511_v52 = vmul.f32 %v6588_v15, %v876_v55  ;;  %v3758_v15 = vadd.s32 16, %v3756_v29 }
 0x381   : > { %v3514_v58 = vmul.f32 %v6586_v27, %v883_v33  ;;  %v3739_v27 = vmul.f32 %v3711_v13, %v3511_v52 }
 0x383   : > { %v3742_v30 = vmul.f32 %v3718_v24, %v3514_v58 }
 0x384   : > { %v887_v60 = vpop.f32.mrf.mxu3 }
 0x385   : > { %v888_v38 = vadd.f32 %v6597_v48, %v887_v60  ;;  %v3752_v28 = vpack.c.bf16 %v3742_v30, %v3741_v8 }
 0x387   : > { %v3516_v39 = vmul.f32 %v6584_v6, %v888_v38  ;;  %v3743_v6 = vmul.f32 %v3721_v36, %v3515_v42 }
 0x389   : > { %v3744_v2 = vmul.f32 %v3723_v63, %v3516_v39 }
 0x38b   : > { %v3753_v20 = vpack.c.bf16 %v3744_v2, %v3743_v6 }
 0x38c   : > { %v890_v18 = vpop.f32.mrf.mxu3 }
 0x38d   : > { %v891_v5 = vadd.f32 %v6597_v48, %v890_v18 }
 0x38f   : > { %v3517_v40 = vmul.f32 %v6580_v44, %v891_v5 }
 0x391   : > { %v3745_v31 = vmul.f32 %v3726_v53, %v3517_v40 }
 0x394   : > { %v892_v43 = vpop.f32.mrf.mxu3 }
 0x395   : > { %v893_v49 = vadd.f32 %v6597_v48, %v892_v43  ;;  %v3757_v48 = vadd.s32 8, %v3756_v29 }
 0x397   : > { %v3518_v32 = vmul.f32 %v6590_v7, %v893_v49  ;;  %v3512_v7 = vmul.f32 %v6602_v34, %v878_v12  ;;  %v4255_v34 = vld [vmem:[%s456_s16] ss:$0 sm:$0xff]  ;;  %s4158_s16 = sshll.u32 %s4402_s13, 5 }
 0x398   : > { %vm3762_vm5 = vcmp.eq.s32.totalorder %v3756_v29, %v4255_v34  ;;  %vm3763_vm10 = vcmp.eq.s32.totalorder %v3757_v48, %v4255_v34  ;;  %vm3764_vm1 = vcmp.eq.s32.totalorder %v3758_v15, %v4255_v34  ;;  %s3819_s27 = scalar_lea.hbm %s6714_s9, %s4158_s16 }
 0x399   : > { %v3746_v3 = vmul.f32 %v3728_v10, %v3518_v32  ;;  %v3740_v23 = vmul.f32 %v3713_v47, %v3512_v7  ;;  %vm4130_vm13 = vmpackc.low %vm3763_vm10, %vm3762_vm5  ;;  %s3822_s14 = sshll.u32 %s3819_s27, 4  ;;  %s3823_s14 = int_to_ptr.hbm [resolvable:$true] %s3822_s14 }
 0x39a   : > { %s4334_s15 = sshra.s32 %s3823_s14, 4  ;;  %s4335_s15 = int_to_ptr.hbm [resolvable:$true] %s4334_s15 }
 0x39b   : > { %v3754_v44 = vpack.c.bf16 %v3746_v3, %v3745_v31  ;;  %v3751_v56 = vpack.c.bf16 %v3740_v23, %v3739_v27  ;;  %s4336_s13 = scalar_lea.hbm %s4335_s15, 32  ;;  %p4341_p5 = scmp.lt.s32.totalorder %s4335_s15, %s6714_s9 }
 0x39c   : > { %p4337_p1 = scmp.ne.s32.totalorder %s4335_s15, %s4336_s13  ;;  %p4342_p6 = scmp.lt.s32.totalorder %s4340_s22, %s4336_s13 }
 0x39d   : > { %3780 = vmatpush.bf16.msrb.mxu3 %v3754_v44 }
 0x39e   : > { %p4338_p2 = pnand %p4337_p1, %p4527_p3  ;;  %p4343_p7 = por %p4342_p6, %p4341_p5 }
 0x3a0   : > { %p4339_p4 = pneg %p4338_p2 }
 0x3a1   : > { %3781 = vmatpush.bf16.msrb.mxu3 %v3753_v20 }
 0x3a2   : > { %p4344_p8 = pnand %p4343_p7, %p4339_p4 }
 0x3a5   : > { %3782 = vmatpush.bf16.msrb.mxu3 %v3752_v28 }
 0x3a9   : > { %3783 = vmatpush.bf16.msrb.mxu3 %v3751_v56 }
 0x3ad   : > { %3784 = vmatpush.bf16.msrb.mxu3 %v3750_v50 }
 0x3b1   : > { %3785 = vmatpush.bf16.msrb.mxu3 %v3749_v62  ;;  %v3759_v62 = vadd.s32 24, %v3756_v29 }
 0x3b3   : > { %vm3765_vm4 = vcmp.eq.s32.totalorder %v3759_v62, %v4255_v34 }
 0x3b4   : > { %vm4132_vm6 = vmpackc.low %vm3765_vm4, %vm3764_vm1 }
 0x3b5   : > { %3786 = vmatpush.bf16.msrb.mxu3 %v3748_v51 }
 0x3b9   : > { %3787 = vmatpush.bf16.msrb.mxu3 %v3747_v14 }
 0x3bc   : > { %4131 = vmatmul.msk.bf16.vlgmr.msrb.gmra.mxu3 %vm4130_vm13, %v4425_v26 }
 0x3cc   : > { %4133 = vmatmul.msk.bf16.gmra.mxu3 %vm4132_vm6, %v4425_v26 }
 0x43f   : > { %v3789_v25 = vpop.f32.mrf.mxu3 }
 0x440   : > { %v3799_v51 = vadd.f32 %v3789_v25, %v3776_v35 }
 0x442   : > { %3803 = vst [vmem:[%s4573_s17] sm:$0xff] %v3799_v51 }
 0x447   : > { %v3791_v54 = vpop.f32.mrf.mxu3 }
 0x448   : > { %v3800_v14 = vadd.f32 %v3791_v54, %v3777_v22 }
 0x44a   : > { %3804 = vst [vmem:[%s4573_s17 + $0x8] sm:$0xff] %v3800_v14 }
 0x44f   : > { %v3794_v11 = vpop.f32.mrf.mxu3 }
 0x450   : > { %v3801_v9 = vadd.f32 %v3794_v11, %v3778_v19 }
 0x452   : > { %3805 = vst [vmem:[%s4573_s17 + $0x10] sm:$0xff] %v3801_v9 }
 0x457   : > { %v3796_v13 = vpop.f32.mrf.mxu3 }
 0x458   : > { %v3802_v45 = vadd.f32 %v3796_v13, %v3779_v41 }
 0x45a   : > { %3806 = vst [vmem:[%s4573_s17 + $0x18] sm:$0xff] %v3802_v45 }
 0x45b   : > { %4347 = shalt.err (!%p4344_p8)
}
 0x45c   : > { %s4426_s17 = smov 128   ;;  %s4427_s28 = smov 8  }
 0x45d   : > { %4167 = dma.vmem_to_hbm [thread:$0]  (%p4527_p3), %s3821_s30, 512, %s3823_s14, %s3808_s12, %s4426_s17, %s4426_s17, %s4427_s28  }
 0x45e PF: > { %s6766_s18 = sld [smem:[#allocation9_spill]] }
 0x45f   : > { %s6767_s23 = sld [smem:[#allocation5_spill]] }
 0x464   : > { %p4173_p10 = scmp.ge.s32.totalorder %s6766_s18, 2 }
 0x465   : > { %s3837_s29 = sand.u32 1, %s6767_s23  }
 0x466   : > { %p4170_p11 = pnand %p4173_p10, %p4537_p9  ;;  %s3838_s24 = scalar_lea.sflag [#allocation3], %s3837_s29 }
 0x468   : > { %p4171_p12 = pneg %p4170_p11 }
 0x46a   : > { %4381 = dma.done.wait (%p4171_p12), %s3838_s24, 512  }
 0x46b   : > { %4383 = vsyncadd (%p4171_p12), %s3838_s24, 4294966784  ;;  %s22_s16 = sadd.s32 1, %s6766_s18   ;;  %s6769_s27 = sld [smem:[#allocation6_spill]] }
 0x46c   : > { %p19_p13 = scmp.ge.s32.totalorder %s22_s16, 6   ;;  %s6770_s11 = sld [smem:[#allocation13_spill]] }
 0x46d   : > { %s6771_s12 = sld [smem:[#allocation7_spill]]  ;;  %s6775_s30 = smov %s4390_s10 }
 0x46e   : > { %s6772_s13 = sld [smem:[#allocation8_spill]]  ;;  %21 = sbr.rel (!%p19_p13) target bundleno = 5 (0x5), region = 104 }
 0x46f   : > { %s6773_s14 = sld [smem:[#allocation10_spill]] }
 0x470   : > { %s6774_s15 = sld [smem:[#allocation11_spill]] }
 0x471   : > { %s6776_s10 = smov %s6769_s27 }
 0x473   :  { %3844 = vsyncpa [#allocation3], 1 }
 0x474   :  { %3846 = vsyncpa [#allocation3 + $0x1], 1 }

</bundles_post_ra>
